<compile_context>
chip_gen: v6e
topology: v6e:2x2x1
jax: 0.10.0
libtpu: 0.0.40
codegen_flags: <defaults>
</compile_context>

<pallas_src>
from functools import partial

import numpy as np
import jax
import jax.numpy as jnp
from jax import lax
from jax.experimental import pallas as pl
from jax.experimental.pallas import tpu as pltpu

NUM_HEADS = 8


def _vmem():
    return pl.BlockSpec(memory_space=pltpu.MemorySpace.VMEM)


# ---------------------------------------------------------------------------
# In-kernel multi-head attention core with per-head out-proj accumulation
# ---------------------------------------------------------------------------
def _attention_heads(qv_src, q_off, v_off, k_src, k_off, wo3_ref, bo,
                     num_heads, dh):
    """qv_src: (Lq, >=v_off+E) bf16 holding per-head Q (scale folded) at column
    offset q_off and per-head V at v_off.  k_src: (Lk, >=k_off+E) bf16 holding
    per-head K at k_off.  wo3_ref: (nh, dh, E) bf16 out-proj weight.
    bo: (1, E) f32.  Returns (Lq, E) f32."""
    acc = None
    # Static unroll over nh=8 heads (tiny shapes); see TODO for fori_loop at
    # large L to bound live ranges.
    for h in range(num_heads):
        s = h * dh
        qh = qv_src[:, q_off + s: q_off + s + dh]                    # (Lq, dh) bf16
        vh = qv_src[:, v_off + s: v_off + s + dh]                    # (Lk, dh) bf16
        kh = k_src[:, k_off + s: k_off + s + dh]                     # (Lk, dh) bf16
        # qh @ kh^T on the MXU (bf16 operands, f32 accumulate)
        logits = lax.dot_general(qh, kh, (((1,), (1,)), ((), ())),
                                 preferred_element_type=jnp.float32)  # (Lq, Lk) f32
        m = jnp.max(logits, axis=-1, keepdims=True)
        e = jnp.exp(logits - m)
        p = (e * pl.reciprocal(jnp.sum(e, axis=-1, keepdims=True), approx=True)
             ).astype(jnp.bfloat16)                                   # (Lq, Lk) bf16
        ov = jnp.dot(p, vh, preferred_element_type=jnp.float32
                     ).astype(jnp.bfloat16)                           # (Lq, dh) bf16
        # per-head slice of the out-projection; accumulate in f32
        contrib = jnp.dot(ov, wo3_ref[h],
                          preferred_element_type=jnp.float32)         # (Lq, E) f32
        acc = contrib if acc is None else acc + contrib
    return acc + bo


# ---------------------------------------------------------------------------
# Fully fused forward kernel
# ---------------------------------------------------------------------------
def fused_kernel(num_heads,
                 x1_ref, x2_ref,
                 wqv1_ref, bqv1_ref,          # conv11-folded [Wq1*s | Wv1]  (C1, 2E)
                 wkqv2_ref, bkqv2_ref,        # conv21-folded [Wk1 | Wq2*s | Wv2] (C2, 3E)
                 wo1_ref, bo1_ref,            # mha1 out-proj (nh, dh, E), (1, E)
                 wk2_ref, bk2_ref,            # mha2 key proj on a1 (E, E), (1, E)
                 wo2_ref, bo2_ref,            # mha2 out-proj (nh, dh, E), (1, E)
                 w12_ref, b12_ref,            # Conv2d12 (E, C1), (1, C1)
                 w22_ref, b22_ref,            # Conv2d22 (E, C2), (1, C2)
                 y1_ref, y2_ref):
    E = wk2_ref.shape[0]
    dh = E // num_heads

    # Merged, conv-folded input projections (bf16 MXU, f32 accumulate)
    QV1 = (jnp.dot(x1_ref[...], wqv1_ref[...], preferred_element_type=jnp.float32)
           + bqv1_ref[...]).astype(jnp.bfloat16)        # (L1, 2E) = [Q1*s | V1]
    KQV2 = (jnp.dot(x2_ref[...], wkqv2_ref[...], preferred_element_type=jnp.float32)
            + bkqv2_ref[...]).astype(jnp.bfloat16)      # (L2, 3E) = [K1 | Q2*s | V2]

    # --- mha1(q=x1s, k=x2s, v=x1s) ------------------------------------------
    a1 = _attention_heads(QV1, 0, E, KQV2, 0, wo1_ref, bo1_ref[...],
                          num_heads, dh)                # (L1, E) f32
    a1b = a1.astype(jnp.bfloat16)

    # Conv2d12
    y1_ref[...] = (jnp.dot(a1b, w12_ref[...], preferred_element_type=jnp.float32)
                   + b12_ref[...]).astype(y1_ref.dtype)  # (L1, C1)

    # mha2 key projection on a1 (documented key substitution, see header)
    K2 = (jnp.dot(a1b, wk2_ref[...], preferred_element_type=jnp.float32)
          + bk2_ref[...]).astype(jnp.bfloat16)           # (L1, E)

    # --- mha2(q=x2s, k=a1, v=x2s) ---------------------------------------------
    a2 = _attention_heads(KQV2, E, 2 * E, K2, 0, wo2_ref, bo2_ref[...],
                          num_heads, dh)                 # (L2, E) f32

    # Conv2d22
    y2_ref[...] = (jnp.dot(a2.astype(jnp.bfloat16), w22_ref[...],
                           preferred_element_type=jnp.float32)
                   + b22_ref[...]).astype(y2_ref.dtype)  # (L2, C2)


# ---------------------------------------------------------------------------
# Host-side weight preparation (conv folding, scale folding, head-major out-proj)
# ---------------------------------------------------------------------------
def _prep_weights(p, num_heads):
    E = p['w11'].shape[1]
    dh = E // num_heads
    scale = 1.0 / float(np.sqrt(dh))

    w11 = p['w11'].astype(jnp.float32); b11 = p['b11'].astype(jnp.float32)
    w21 = p['w21'].astype(jnp.float32); b21 = p['b21'].astype(jnp.float32)

    def split(params):
        in_w, in_b, out_w, out_b = (a.astype(jnp.float32) for a in params)
        return (in_w[:E], in_w[E:2 * E], in_w[2 * E:],
                in_b[:E], in_b[E:2 * E], in_b[2 * E:], out_w, out_b)

    wq1, wk1, wv1, bq1, bk1, bv1, ow1, ob1 = split(p['mha1'])
    wq2, wk2, wv2, bq2, bk2, bv2, ow2, ob2 = split(p['mha2'])

    # x1 path: Conv2d11 folded into mha1's (scaled) Q and V projections.
    wqv1 = jnp.concatenate([(w11 @ wq1.T) * scale, w11 @ wv1.T], axis=1)       # (C1, 2E)
    bqv1 = jnp.concatenate([(b11 @ wq1.T + bq1) * scale, b11 @ wv1.T + bv1])   # (2E,)

    # x2 path: Conv2d21 folded into mha1's K and mha2's (scaled) Q / V projections.
    wkqv2 = jnp.concatenate([w21 @ wk1.T, (w21 @ wq2.T) * scale, w21 @ wv2.T],
                            axis=1)                                            # (C2, 3E)
    bkqv2 = jnp.concatenate([b21 @ wk1.T + bk1, (b21 @ wq2.T + bq2) * scale,
                             b21 @ wv2.T + bv2])                               # (3E,)

    def bf(x): return x.astype(jnp.bfloat16)
    def f32row(x): return x.reshape(1, -1).astype(jnp.float32)

    return (
        bf(wqv1), f32row(bqv1),
        bf(wkqv2), f32row(bkqv2),
        bf(ow1.T.reshape(num_heads, dh, E)), f32row(ob1),   # mha1 out-proj, head-major
        bf(wk2.T), f32row(bk2),                             # mha2 key proj (on a1)
        bf(ow2.T.reshape(num_heads, dh, E)), f32row(ob2),   # mha2 out-proj, head-major
        bf(p['w12'].astype(jnp.float32)), f32row(p['b12'].astype(jnp.float32)),
        bf(p['w22'].astype(jnp.float32)), f32row(p['b22'].astype(jnp.float32)),
    )


# ---------------------------------------------------------------------------
# Module forward (single fused Pallas call)
# ---------------------------------------------------------------------------
def mha_across_feat_old(p, x1, x2, num_heads=NUM_HEADS):
    # x1: (1, inpd1, H1, W1), x2: (1, inpd2, H2, W2) in NCHW (PyTorch-style)
    _, C1, H1, W1 = x1.shape
    _, C2, H2, W2 = x2.shape
    E = p['w11'].shape[1]
    L1, L2 = H1 * W1, H2 * W2
    assert L1 == L2, "module requires H1*W1 == H2*W2 (key/value length constraint)"
    assert E % num_heads == 0

    # NCHW -> flattened NHWC (L, C); bf16 on the MXU input side
    x1f = jnp.transpose(x1, (0, 2, 3, 1)).reshape(L1, C1).astype(jnp.bfloat16)
    x2f = jnp.transpose(x2, (0, 2, 3, 1)).reshape(L2, C2).astype(jnp.bfloat16)

    args = (x1f, x2f) + _prep_weights(p, num_heads)

    # Advisory cost estimate for XLA scheduling around the custom call.
    flops = (2 * L1 * C1 * 2 * E + 2 * L2 * C2 * 3 * E          # fused input projections
             + 2 * (4 * L1 * L2 * E + 2 * L1 * E * E)           # two attention cores
             + 2 * L1 * E * E                                   # mha2 key projection
             + 2 * L1 * E * C1 + 2 * L2 * E * C2)               # Conv2d12 / Conv2d22
    transcendentals = 2 * num_heads * L1 * L2 + 2 * num_heads * L1
    bytes_accessed = (sum(int(a.size) * a.dtype.itemsize for a in args)
                      + (L1 * C1 + L2 * C2) * 4)
    cost = pl.CostEstimate(flops=int(flops), transcendentals=int(transcendentals),
                           bytes_accessed=int(bytes_accessed))

    y1f, y2f = pl.pallas_call(
        partial(fused_kernel, num_heads),
        out_shape=(jax.ShapeDtypeStruct((L1, C1), jnp.float32),
                   jax.ShapeDtypeStruct((L2, C2), jnp.float32)),
        in_specs=[_vmem()] * len(args),
        out_specs=(_vmem(), _vmem()),
        cost_estimate=cost,
    )(*args)

    y1 = jnp.transpose(y1f.reshape(1, H1, W1, C1), (0, 3, 1, 2))
    y2 = jnp.transpose(y2f.reshape(1, H2, W2, C2), (0, 3, 1, 2))
    return y1, y2


# ---------------------------------------------------------------------------
# Parameter init (deterministic, PyTorch-like uniform bounds)
# ---------------------------------------------------------------------------
def init_params(key, inpd1, inpd2, outd):
    ks = jax.random.split(key, 16)

    def u(k, shape, fan_in):
        b = 1.0 / np.sqrt(fan_in)
        return jax.random.uniform(k, shape, jnp.float32, -b, b)

    p = {}
    # 1x1 convs stored as (Cin, Cout) matmul weights
    p['w11'] = u(ks[0], (inpd1, outd), inpd1); p['b11'] = u(ks[1], (outd,), inpd1)
    p['w12'] = u(ks[2], (outd, inpd1), outd);  p['b12'] = u(ks[3], (inpd1,), outd)
    p['w21'] = u(ks[4], (inpd2, outd), inpd2); p['b21'] = u(ks[5], (outd,), inpd2)
    p['w22'] = u(ks[6], (outd, inpd2), outd);  p['b22'] = u(ks[7], (inpd2,), outd)
    for i, name in enumerate(['mha1', 'mha2']):
        base = 8 + 4 * i
        p[name] = (
            u(ks[base + 0], (3 * outd, outd), outd),   # in_proj_weight
            u(ks[base + 1], (3 * outd,), outd),        # in_proj_bias
            u(ks[base + 2], (outd, outd), outd),       # out_proj.weight
            u(ks[base + 3], (outd,), outd),            # out_proj.bias
        )
    return p


# ---------------------------------------------------------------------------
# Pure-JAX f32 reference (for correctness check)
# ---------------------------------------------------------------------------
def _mha_ref(q, k, v, params, num_heads=NUM_HEADS):
    E = q.shape[-1]
    in_w, in_b, out_w, out_b = params
    Q = q @ in_w[:E].T + in_b[:E]
    K = k @ in_w[E:2 * E].T + in_b[E:2 * E]
    V = v @ in_w[2 * E:].T + in_b[2 * E:]
    dh = E // num_heads
    Qh = Q.reshape(-1, num_heads, dh).transpose(1, 0, 2)
    Kh = K.reshape(-1, num_heads, dh).transpose(1, 0, 2)
    Vh = V.reshape(-1, num_heads, dh).transpose(1, 0, 2)
    logits = jnp.einsum('hld,hmd->hlm', Qh, Kh) / np.sqrt(dh)
    pmat = jax.nn.softmax(logits, axis=-1)
    oh = jnp.einsum('hlm,hmd->hld', pmat, Vh)
    o = oh.transpose(1, 0, 2).reshape(-1, E)
    return o @ out_w.T + out_b


def _ref_forward(p, x1, x2):
    _, C1, H1, W1 = x1.shape
    _, C2, H2, W2 = x2.shape
    x1f = jnp.transpose(x1, (0, 2, 3, 1)).reshape(H1 * W1, C1)
    x2f = jnp.transpose(x2, (0, 2, 3, 1)).reshape(H2 * W2, C2)
    x1s = x1f @ p['w11'] + p['b11']
    x2s = x2f @ p['w21'] + p['b21']
    a1 = _mha_ref(x1s, x2s, x1s, p['mha1'])
    y1f = a1 @ p['w12'] + p['b12']
    y1 = jnp.transpose(y1f.reshape(1, H1, W1, -1), (0, 3, 1, 2))
    a2 = _mha_ref(x2s, a1, x2s, p['mha2'])
    y2f = a2 @ p['w22'] + p['b22']
    y2 = jnp.transpose(y2f.reshape(1, H2, W2, -1), (0, 3, 1, 2))
    return y1, y2


if __name__ == "__main__":
    inpd1, inpd2, outd = 16, 24, 32           # outd divisible by 8 heads
    H, W = 8, 8                               # L1 == L2 required by key/value
    key = jax.random.PRNGKey(0)
    kp, k1, k2 = jax.random.split(key, 3)
    params = init_params(kp, inpd1, inpd2, outd)
    x1 = jax.random.normal(k1, (1, inpd1, H, W), jnp.float32)
    x2 = jax.random.normal(k2, (1, inpd2, H, W), jnp.float32)

    fwd = jax.jit(mha_across_feat_old)
    y1, y2 = fwd(params, x1, x2)
    jax.block_until_ready((y1, y2))

    assert y1.shape == (1, inpd1, H, W)
    assert y2.shape == (1, inpd2, H, W)

    r1, r2 = _ref_forward(params, x1, x2)
    np.testing.assert_allclose(np.asarray(y1), np.asarray(r1), rtol=2e-2, atol=2e-2)
    np.testing.assert_allclose(np.asarray(y2), np.asarray(r2), rtol=2e-2, atol=2e-2)

    print("KERNEL_OK")
</pallas_src>

<mosaic_0001>
module attributes {stable_mosaic.version = 11 : i64} {
  func.func @fused_kernel(%arg0: memref<64x16xbf16, #tpu.memory_space<vmem>>, %arg1: memref<64x24xbf16, #tpu.memory_space<vmem>>, %arg2: memref<16x64xbf16, #tpu.memory_space<vmem>>, %arg3: memref<1x64xf32, #tpu.memory_space<vmem>>, %arg4: memref<24x96xbf16, #tpu.memory_space<vmem>>, %arg5: memref<1x96xf32, #tpu.memory_space<vmem>>, %arg6: memref<8x4x32xbf16, #tpu.memory_space<vmem>>, %arg7: memref<1x32xf32, #tpu.memory_space<vmem>>, %arg8: memref<32x32xbf16, #tpu.memory_space<vmem>>, %arg9: memref<1x32xf32, #tpu.memory_space<vmem>>, %arg10: memref<8x4x32xbf16, #tpu.memory_space<vmem>>, %arg11: memref<1x32xf32, #tpu.memory_space<vmem>>, %arg12: memref<32x16xbf16, #tpu.memory_space<vmem>>, %arg13: memref<1x16xf32, #tpu.memory_space<vmem>>, %arg14: memref<32x24xbf16, #tpu.memory_space<vmem>>, %arg15: memref<1x24xf32, #tpu.memory_space<vmem>>, %arg16: memref<64x16xf32, #tpu.memory_space<vmem>>, %arg17: memref<64x24xf32, #tpu.memory_space<vmem>>) attributes {dimension_semantics = [], scalar_prefetch = 0 : i64, scratch_operands = 0 : i64, tpu.core_type = #tpu.core_type<tc>} {
    %c0 = arith.constant 0 : index
    %c0_0 = arith.constant 0 : index
    %0 = vector.load %arg0[%c0, %c0_0] : memref<64x16xbf16, #tpu.memory_space<vmem>>, vector<64x16xbf16>
    %c0_1 = arith.constant 0 : index
    %c0_2 = arith.constant 0 : index
    %1 = vector.load %arg2[%c0_1, %c0_2] : memref<16x64xbf16, #tpu.memory_space<vmem>>, vector<16x64xbf16>
    %cst = arith.constant dense<0.000000e+00> : vector<64x64xf32>
    %2 = tpu.matmul %0, %1, %cst {dimension_numbers = #tpu.dot_dimension_numbers<[1], [0], [0], [1], [0, 0, 1, 1], [], []>} : vector<64x16xbf16>, vector<16x64xbf16>, vector<64x64xf32> -> vector<64x64xf32>
    %c0_3 = arith.constant 0 : index
    %c0_4 = arith.constant 0 : index
    %3 = vector.load %arg3[%c0_3, %c0_4] : memref<1x64xf32, #tpu.memory_space<vmem>>, vector<1x64xf32>
    %4 = vector.broadcast %3 : vector<1x64xf32> to vector<64x64xf32>
    %5 = arith.addf %2, %4 : vector<64x64xf32>
    %6 = arith.truncf %5 : vector<64x64xf32> to vector<64x64xbf16>
    %c0_5 = arith.constant 0 : index
    %c0_6 = arith.constant 0 : index
    %7 = vector.load %arg1[%c0_5, %c0_6] : memref<64x24xbf16, #tpu.memory_space<vmem>>, vector<64x24xbf16>
    %c0_7 = arith.constant 0 : index
    %c0_8 = arith.constant 0 : index
    %8 = vector.load %arg4[%c0_7, %c0_8] : memref<24x96xbf16, #tpu.memory_space<vmem>>, vector<24x96xbf16>
    %cst_9 = arith.constant dense<0.000000e+00> : vector<64x96xf32>
    %9 = tpu.matmul %7, %8, %cst_9 {dimension_numbers = #tpu.dot_dimension_numbers<[1], [0], [0], [1], [0, 0, 1, 1], [], []>} : vector<64x24xbf16>, vector<24x96xbf16>, vector<64x96xf32> -> vector<64x96xf32>
    %c0_10 = arith.constant 0 : index
    %c0_11 = arith.constant 0 : index
    %10 = vector.load %arg5[%c0_10, %c0_11] : memref<1x96xf32, #tpu.memory_space<vmem>>, vector<1x96xf32>
    %11 = vector.broadcast %10 : vector<1x96xf32> to vector<64x96xf32>
    %12 = arith.addf %9, %11 : vector<64x96xf32>
    %13 = arith.truncf %12 : vector<64x96xf32> to vector<64x96xbf16>
    %c0_12 = arith.constant 0 : index
    %c0_13 = arith.constant 0 : index
    %14 = vector.load %arg7[%c0_12, %c0_13] : memref<1x32xf32, #tpu.memory_space<vmem>>, vector<1x32xf32>
    %15 = vector.extract_strided_slice %6 {offsets = [0, 0], sizes = [64, 4], strides = [1, 1]} : vector<64x64xbf16> to vector<64x4xbf16>
    %16 = vector.extract_strided_slice %6 {offsets = [0, 32], sizes = [64, 4], strides = [1, 1]} : vector<64x64xbf16> to vector<64x4xbf16>
    %17 = vector.extract_strided_slice %13 {offsets = [0, 0], sizes = [64, 4], strides = [1, 1]} : vector<64x96xbf16> to vector<64x4xbf16>
    %cst_14 = arith.constant dense<0.000000e+00> : vector<64x64xf32>
    %18 = tpu.matmul %15, %17, %cst_14 {dimension_numbers = #tpu.dot_dimension_numbers<[1], [1], [0], [0], [0, 0, 1, 0], [], []>} : vector<64x4xbf16>, vector<64x4xbf16>, vector<64x64xf32> -> vector<64x64xf32>
    %cst_15 = arith.constant dense<0xFF800000> : vector<64xf32>
    %19 = vector.multi_reduction <maximumf>, %18, %cst_15 [1] : vector<64x64xf32> to vector<64xf32>
    %20 = vector.shape_cast %19 : vector<64xf32> to vector<64x1xf32>
    %21 = vector.broadcast %20 : vector<64x1xf32> to vector<64x64xf32>
    %22 = arith.subf %18, %21 : vector<64x64xf32>
    %23 = math.exp %22 : vector<64x64xf32>
    %cst_16 = arith.constant dense<0.000000e+00> : vector<64xf32>
    %24 = vector.multi_reduction <add>, %23, %cst_16 [1] : vector<64x64xf32> to vector<64xf32>
    %25 = vector.shape_cast %24 : vector<64xf32> to vector<64x1xf32>
    %26 = tpu.reciprocal %25 {approx = true} : vector<64x1xf32> -> vector<64x1xf32>
    %27 = vector.broadcast %26 : vector<64x1xf32> to vector<64x64xf32>
    %28 = arith.mulf %23, %27 : vector<64x64xf32>
    %29 = arith.truncf %28 : vector<64x64xf32> to vector<64x64xbf16>
    %cst_17 = arith.constant dense<0.000000e+00> : vector<64x4xf32>
    %30 = tpu.matmul %29, %16, %cst_17 {dimension_numbers = #tpu.dot_dimension_numbers<[1], [0], [0], [1], [0, 0, 1, 1], [], []>} : vector<64x64xbf16>, vector<64x4xbf16>, vector<64x4xf32> -> vector<64x4xf32>
    %31 = arith.truncf %30 : vector<64x4xf32> to vector<64x4xbf16>
    %c0_18 = arith.constant 0 : index
    %c0_19 = arith.constant 0 : index
    %c0_20 = arith.constant 0 : index
    %32 = vector.load %arg6[%c0_18, %c0_19, %c0_20] : memref<8x4x32xbf16, #tpu.memory_space<vmem>>, vector<1x4x32xbf16>
    %33 = vector.shape_cast %32 : vector<1x4x32xbf16> to vector<4x32xbf16>
    %cst_21 = arith.constant dense<0.000000e+00> : vector<64x32xf32>
    %34 = tpu.matmul %31, %33, %cst_21 {dimension_numbers = #tpu.dot_dimension_numbers<[1], [0], [0], [1], [0, 0, 1, 1], [], []>} : vector<64x4xbf16>, vector<4x32xbf16>, vector<64x32xf32> -> vector<64x32xf32>
    %35 = vector.extract_strided_slice %6 {offsets = [0, 4], sizes = [64, 4], strides = [1, 1]} : vector<64x64xbf16> to vector<64x4xbf16>
    %36 = vector.extract_strided_slice %6 {offsets = [0, 36], sizes = [64, 4], strides = [1, 1]} : vector<64x64xbf16> to vector<64x4xbf16>
    %37 = vector.extract_strided_slice %13 {offsets = [0, 4], sizes = [64, 4], strides = [1, 1]} : vector<64x96xbf16> to vector<64x4xbf16>
    %cst_22 = arith.constant dense<0.000000e+00> : vector<64x64xf32>
    %38 = tpu.matmul %35, %37, %cst_22 {dimension_numbers = #tpu.dot_dimension_numbers<[1], [1], [0], [0], [0, 0, 1, 0], [], []>} : vector<64x4xbf16>, vector<64x4xbf16>, vector<64x64xf32> -> vector<64x64xf32>
    %cst_23 = arith.constant dense<0xFF800000> : vector<64xf32>
    %39 = vector.multi_reduction <maximumf>, %38, %cst_23 [1] : vector<64x64xf32> to vector<64xf32>
    %40 = vector.shape_cast %39 : vector<64xf32> to vector<64x1xf32>
    %41 = vector.broadcast %40 : vector<64x1xf32> to vector<64x64xf32>
    %42 = arith.subf %38, %41 : vector<64x64xf32>
    %43 = math.exp %42 : vector<64x64xf32>
    %cst_24 = arith.constant dense<0.000000e+00> : vector<64xf32>
    %44 = vector.multi_reduction <add>, %43, %cst_24 [1] : vector<64x64xf32> to vector<64xf32>
    %45 = vector.shape_cast %44 : vector<64xf32> to vector<64x1xf32>
    %46 = tpu.reciprocal %45 {approx = true} : vector<64x1xf32> -> vector<64x1xf32>
    %47 = vector.broadcast %46 : vector<64x1xf32> to vector<64x64xf32>
    %48 = arith.mulf %43, %47 : vector<64x64xf32>
    %49 = arith.truncf %48 : vector<64x64xf32> to vector<64x64xbf16>
    %cst_25 = arith.constant dense<0.000000e+00> : vector<64x4xf32>
    %50 = tpu.matmul %49, %36, %cst_25 {dimension_numbers = #tpu.dot_dimension_numbers<[1], [0], [0], [1], [0, 0, 1, 1], [], []>} : vector<64x64xbf16>, vector<64x4xbf16>, vector<64x4xf32> -> vector<64x4xf32>
    %51 = arith.truncf %50 : vector<64x4xf32> to vector<64x4xbf16>
    %c1 = arith.constant 1 : index
    %c0_26 = arith.constant 0 : index
    %c0_27 = arith.constant 0 : index
    %52 = vector.load %arg6[%c1, %c0_26, %c0_27] : memref<8x4x32xbf16, #tpu.memory_space<vmem>>, vector<1x4x32xbf16>
    %53 = vector.shape_cast %52 : vector<1x4x32xbf16> to vector<4x32xbf16>
    %cst_28 = arith.constant dense<0.000000e+00> : vector<64x32xf32>
    %54 = tpu.matmul %51, %53, %cst_28 {dimension_numbers = #tpu.dot_dimension_numbers<[1], [0], [0], [1], [0, 0, 1, 1], [], []>} : vector<64x4xbf16>, vector<4x32xbf16>, vector<64x32xf32> -> vector<64x32xf32>
    %55 = arith.addf %34, %54 : vector<64x32xf32>
    %56 = vector.extract_strided_slice %6 {offsets = [0, 8], sizes = [64, 4], strides = [1, 1]} : vector<64x64xbf16> to vector<64x4xbf16>
    %57 = vector.extract_strided_slice %6 {offsets = [0, 40], sizes = [64, 4], strides = [1, 1]} : vector<64x64xbf16> to vector<64x4xbf16>
    %58 = vector.extract_strided_slice %13 {offsets = [0, 8], sizes = [64, 4], strides = [1, 1]} : vector<64x96xbf16> to vector<64x4xbf16>
    %cst_29 = arith.constant dense<0.000000e+00> : vector<64x64xf32>
    %59 = tpu.matmul %56, %58, %cst_29 {dimension_numbers = #tpu.dot_dimension_numbers<[1], [1], [0], [0], [0, 0, 1, 0], [], []>} : vector<64x4xbf16>, vector<64x4xbf16>, vector<64x64xf32> -> vector<64x64xf32>
    %cst_30 = arith.constant dense<0xFF800000> : vector<64xf32>
    %60 = vector.multi_reduction <maximumf>, %59, %cst_30 [1] : vector<64x64xf32> to vector<64xf32>
    %61 = vector.shape_cast %60 : vector<64xf32> to vector<64x1xf32>
    %62 = vector.broadcast %61 : vector<64x1xf32> to vector<64x64xf32>
    %63 = arith.subf %59, %62 : vector<64x64xf32>
    %64 = math.exp %63 : vector<64x64xf32>
    %cst_31 = arith.constant dense<0.000000e+00> : vector<64xf32>
    %65 = vector.multi_reduction <add>, %64, %cst_31 [1] : vector<64x64xf32> to vector<64xf32>
    %66 = vector.shape_cast %65 : vector<64xf32> to vector<64x1xf32>
    %67 = tpu.reciprocal %66 {approx = true} : vector<64x1xf32> -> vector<64x1xf32>
    %68 = vector.broadcast %67 : vector<64x1xf32> to vector<64x64xf32>
    %69 = arith.mulf %64, %68 : vector<64x64xf32>
    %70 = arith.truncf %69 : vector<64x64xf32> to vector<64x64xbf16>
    %cst_32 = arith.constant dense<0.000000e+00> : vector<64x4xf32>
    %71 = tpu.matmul %70, %57, %cst_32 {dimension_numbers = #tpu.dot_dimension_numbers<[1], [0], [0], [1], [0, 0, 1, 1], [], []>} : vector<64x64xbf16>, vector<64x4xbf16>, vector<64x4xf32> -> vector<64x4xf32>
    %72 = arith.truncf %71 : vector<64x4xf32> to vector<64x4xbf16>
    %c2 = arith.constant 2 : index
    %c0_33 = arith.constant 0 : index
    %c0_34 = arith.constant 0 : index
    %73 = vector.load %arg6[%c2, %c0_33, %c0_34] : memref<8x4x32xbf16, #tpu.memory_space<vmem>>, vector<1x4x32xbf16>
    %74 = vector.shape_cast %73 : vector<1x4x32xbf16> to vector<4x32xbf16>
    %cst_35 = arith.constant dense<0.000000e+00> : vector<64x32xf32>
    %75 = tpu.matmul %72, %74, %cst_35 {dimension_numbers = #tpu.dot_dimension_numbers<[1], [0], [0], [1], [0, 0, 1, 1], [], []>} : vector<64x4xbf16>, vector<4x32xbf16>, vector<64x32xf32> -> vector<64x32xf32>
    %76 = arith.addf %55, %75 : vector<64x32xf32>
    %77 = vector.extract_strided_slice %6 {offsets = [0, 12], sizes = [64, 4], strides = [1, 1]} : vector<64x64xbf16> to vector<64x4xbf16>
    %78 = vector.extract_strided_slice %6 {offsets = [0, 44], sizes = [64, 4], strides = [1, 1]} : vector<64x64xbf16> to vector<64x4xbf16>
    %79 = vector.extract_strided_slice %13 {offsets = [0, 12], sizes = [64, 4], strides = [1, 1]} : vector<64x96xbf16> to vector<64x4xbf16>
    %cst_36 = arith.constant dense<0.000000e+00> : vector<64x64xf32>
    %80 = tpu.matmul %77, %79, %cst_36 {dimension_numbers = #tpu.dot_dimension_numbers<[1], [1], [0], [0], [0, 0, 1, 0], [], []>} : vector<64x4xbf16>, vector<64x4xbf16>, vector<64x64xf32> -> vector<64x64xf32>
    %cst_37 = arith.constant dense<0xFF800000> : vector<64xf32>
    %81 = vector.multi_reduction <maximumf>, %80, %cst_37 [1] : vector<64x64xf32> to vector<64xf32>
    %82 = vector.shape_cast %81 : vector<64xf32> to vector<64x1xf32>
    %83 = vector.broadcast %82 : vector<64x1xf32> to vector<64x64xf32>
    %84 = arith.subf %80, %83 : vector<64x64xf32>
    %85 = math.exp %84 : vector<64x64xf32>
    %cst_38 = arith.constant dense<0.000000e+00> : vector<64xf32>
    %86 = vector.multi_reduction <add>, %85, %cst_38 [1] : vector<64x64xf32> to vector<64xf32>
    %87 = vector.shape_cast %86 : vector<64xf32> to vector<64x1xf32>
    %88 = tpu.reciprocal %87 {approx = true} : vector<64x1xf32> -> vector<64x1xf32>
    %89 = vector.broadcast %88 : vector<64x1xf32> to vector<64x64xf32>
    %90 = arith.mulf %85, %89 : vector<64x64xf32>
    %91 = arith.truncf %90 : vector<64x64xf32> to vector<64x64xbf16>
    %cst_39 = arith.constant dense<0.000000e+00> : vector<64x4xf32>
    %92 = tpu.matmul %91, %78, %cst_39 {dimension_numbers = #tpu.dot_dimension_numbers<[1], [0], [0], [1], [0, 0, 1, 1], [], []>} : vector<64x64xbf16>, vector<64x4xbf16>, vector<64x4xf32> -> vector<64x4xf32>
    %93 = arith.truncf %92 : vector<64x4xf32> to vector<64x4xbf16>
    %c3 = arith.constant 3 : index
    %c0_40 = arith.constant 0 : index
    %c0_41 = arith.constant 0 : index
    %94 = vector.load %arg6[%c3, %c0_40, %c0_41] : memref<8x4x32xbf16, #tpu.memory_space<vmem>>, vector<1x4x32xbf16>
    %95 = vector.shape_cast %94 : vector<1x4x32xbf16> to vector<4x32xbf16>
    %cst_42 = arith.constant dense<0.000000e+00> : vector<64x32xf32>
    %96 = tpu.matmul %93, %95, %cst_42 {dimension_numbers = #tpu.dot_dimension_numbers<[1], [0], [0], [1], [0, 0, 1, 1], [], []>} : vector<64x4xbf16>, vector<4x32xbf16>, vector<64x32xf32> -> vector<64x32xf32>
    %97 = arith.addf %76, %96 : vector<64x32xf32>
    %98 = vector.extract_strided_slice %6 {offsets = [0, 16], sizes = [64, 4], strides = [1, 1]} : vector<64x64xbf16> to vector<64x4xbf16>
    %99 = vector.extract_strided_slice %6 {offsets = [0, 48], sizes = [64, 4], strides = [1, 1]} : vector<64x64xbf16> to vector<64x4xbf16>
    %100 = vector.extract_strided_slice %13 {offsets = [0, 16], sizes = [64, 4], strides = [1, 1]} : vector<64x96xbf16> to vector<64x4xbf16>
    %cst_43 = arith.constant dense<0.000000e+00> : vector<64x64xf32>
    %101 = tpu.matmul %98, %100, %cst_43 {dimension_numbers = #tpu.dot_dimension_numbers<[1], [1], [0], [0], [0, 0, 1, 0], [], []>} : vector<64x4xbf16>, vector<64x4xbf16>, vector<64x64xf32> -> vector<64x64xf32>
    %cst_44 = arith.constant dense<0xFF800000> : vector<64xf32>
    %102 = vector.multi_reduction <maximumf>, %101, %cst_44 [1] : vector<64x64xf32> to vector<64xf32>
    %103 = vector.shape_cast %102 : vector<64xf32> to vector<64x1xf32>
    %104 = vector.broadcast %103 : vector<64x1xf32> to vector<64x64xf32>
    %105 = arith.subf %101, %104 : vector<64x64xf32>
    %106 = math.exp %105 : vector<64x64xf32>
    %cst_45 = arith.constant dense<0.000000e+00> : vector<64xf32>
    %107 = vector.multi_reduction <add>, %106, %cst_45 [1] : vector<64x64xf32> to vector<64xf32>
    %108 = vector.shape_cast %107 : vector<64xf32> to vector<64x1xf32>
    %109 = tpu.reciprocal %108 {approx = true} : vector<64x1xf32> -> vector<64x1xf32>
    %110 = vector.broadcast %109 : vector<64x1xf32> to vector<64x64xf32>
    %111 = arith.mulf %106, %110 : vector<64x64xf32>
    %112 = arith.truncf %111 : vector<64x64xf32> to vector<64x64xbf16>
    %cst_46 = arith.constant dense<0.000000e+00> : vector<64x4xf32>
    %113 = tpu.matmul %112, %99, %cst_46 {dimension_numbers = #tpu.dot_dimension_numbers<[1], [0], [0], [1], [0, 0, 1, 1], [], []>} : vector<64x64xbf16>, vector<64x4xbf16>, vector<64x4xf32> -> vector<64x4xf32>
    %114 = arith.truncf %113 : vector<64x4xf32> to vector<64x4xbf16>
    %c4 = arith.constant 4 : index
    %c0_47 = arith.constant 0 : index
    %c0_48 = arith.constant 0 : index
    %115 = vector.load %arg6[%c4, %c0_47, %c0_48] : memref<8x4x32xbf16, #tpu.memory_space<vmem>>, vector<1x4x32xbf16>
    %116 = vector.shape_cast %115 : vector<1x4x32xbf16> to vector<4x32xbf16>
    %cst_49 = arith.constant dense<0.000000e+00> : vector<64x32xf32>
    %117 = tpu.matmul %114, %116, %cst_49 {dimension_numbers = #tpu.dot_dimension_numbers<[1], [0], [0], [1], [0, 0, 1, 1], [], []>} : vector<64x4xbf16>, vector<4x32xbf16>, vector<64x32xf32> -> vector<64x32xf32>
    %118 = arith.addf %97, %117 : vector<64x32xf32>
    %119 = vector.extract_strided_slice %6 {offsets = [0, 20], sizes = [64, 4], strides = [1, 1]} : vector<64x64xbf16> to vector<64x4xbf16>
    %120 = vector.extract_strided_slice %6 {offsets = [0, 52], sizes = [64, 4], strides = [1, 1]} : vector<64x64xbf16> to vector<64x4xbf16>
    %121 = vector.extract_strided_slice %13 {offsets = [0, 20], sizes = [64, 4], strides = [1, 1]} : vector<64x96xbf16> to vector<64x4xbf16>
    %cst_50 = arith.constant dense<0.000000e+00> : vector<64x64xf32>
    %122 = tpu.matmul %119, %121, %cst_50 {dimension_numbers = #tpu.dot_dimension_numbers<[1], [1], [0], [0], [0, 0, 1, 0], [], []>} : vector<64x4xbf16>, vector<64x4xbf16>, vector<64x64xf32> -> vector<64x64xf32>
    %cst_51 = arith.constant dense<0xFF800000> : vector<64xf32>
    %123 = vector.multi_reduction <maximumf>, %122, %cst_51 [1] : vector<64x64xf32> to vector<64xf32>
    %124 = vector.shape_cast %123 : vector<64xf32> to vector<64x1xf32>
    %125 = vector.broadcast %124 : vector<64x1xf32> to vector<64x64xf32>
    %126 = arith.subf %122, %125 : vector<64x64xf32>
    %127 = math.exp %126 : vector<64x64xf32>
    %cst_52 = arith.constant dense<0.000000e+00> : vector<64xf32>
    %128 = vector.multi_reduction <add>, %127, %cst_52 [1] : vector<64x64xf32> to vector<64xf32>
    %129 = vector.shape_cast %128 : vector<64xf32> to vector<64x1xf32>
    %130 = tpu.reciprocal %129 {approx = true} : vector<64x1xf32> -> vector<64x1xf32>
    %131 = vector.broadcast %130 : vector<64x1xf32> to vector<64x64xf32>
    %132 = arith.mulf %127, %131 : vector<64x64xf32>
    %133 = arith.truncf %132 : vector<64x64xf32> to vector<64x64xbf16>
    %cst_53 = arith.constant dense<0.000000e+00> : vector<64x4xf32>
    %134 = tpu.matmul %133, %120, %cst_53 {dimension_numbers = #tpu.dot_dimension_numbers<[1], [0], [0], [1], [0, 0, 1, 1], [], []>} : vector<64x64xbf16>, vector<64x4xbf16>, vector<64x4xf32> -> vector<64x4xf32>
    %135 = arith.truncf %134 : vector<64x4xf32> to vector<64x4xbf16>
    %c5 = arith.constant 5 : index
    %c0_54 = arith.constant 0 : index
    %c0_55 = arith.constant 0 : index
    %136 = vector.load %arg6[%c5, %c0_54, %c0_55] : memref<8x4x32xbf16, #tpu.memory_space<vmem>>, vector<1x4x32xbf16>
    %137 = vector.shape_cast %136 : vector<1x4x32xbf16> to vector<4x32xbf16>
    %cst_56 = arith.constant dense<0.000000e+00> : vector<64x32xf32>
    %138 = tpu.matmul %135, %137, %cst_56 {dimension_numbers = #tpu.dot_dimension_numbers<[1], [0], [0], [1], [0, 0, 1, 1], [], []>} : vector<64x4xbf16>, vector<4x32xbf16>, vector<64x32xf32> -> vector<64x32xf32>
    %139 = arith.addf %118, %138 : vector<64x32xf32>
    %140 = vector.extract_strided_slice %6 {offsets = [0, 24], sizes = [64, 4], strides = [1, 1]} : vector<64x64xbf16> to vector<64x4xbf16>
    %141 = vector.extract_strided_slice %6 {offsets = [0, 56], sizes = [64, 4], strides = [1, 1]} : vector<64x64xbf16> to vector<64x4xbf16>
    %142 = vector.extract_strided_slice %13 {offsets = [0, 24], sizes = [64, 4], strides = [1, 1]} : vector<64x96xbf16> to vector<64x4xbf16>
    %cst_57 = arith.constant dense<0.000000e+00> : vector<64x64xf32>
    %143 = tpu.matmul %140, %142, %cst_57 {dimension_numbers = #tpu.dot_dimension_numbers<[1], [1], [0], [0], [0, 0, 1, 0], [], []>} : vector<64x4xbf16>, vector<64x4xbf16>, vector<64x64xf32> -> vector<64x64xf32>
    %cst_58 = arith.constant dense<0xFF800000> : vector<64xf32>
    %144 = vector.multi_reduction <maximumf>, %143, %cst_58 [1] : vector<64x64xf32> to vector<64xf32>
    %145 = vector.shape_cast %144 : vector<64xf32> to vector<64x1xf32>
    %146 = vector.broadcast %145 : vector<64x1xf32> to vector<64x64xf32>
    %147 = arith.subf %143, %146 : vector<64x64xf32>
    %148 = math.exp %147 : vector<64x64xf32>
    %cst_59 = arith.constant dense<0.000000e+00> : vector<64xf32>
    %149 = vector.multi_reduction <add>, %148, %cst_59 [1] : vector<64x64xf32> to vector<64xf32>
    %150 = vector.shape_cast %149 : vector<64xf32> to vector<64x1xf32>
    %151 = tpu.reciprocal %150 {approx = true} : vector<64x1xf32> -> vector<64x1xf32>
    %152 = vector.broadcast %151 : vector<64x1xf32> to vector<64x64xf32>
    %153 = arith.mulf %148, %152 : vector<64x64xf32>
    %154 = arith.truncf %153 : vector<64x64xf32> to vector<64x64xbf16>
    %cst_60 = arith.constant dense<0.000000e+00> : vector<64x4xf32>
    %155 = tpu.matmul %154, %141, %cst_60 {dimension_numbers = #tpu.dot_dimension_numbers<[1], [0], [0], [1], [0, 0, 1, 1], [], []>} : vector<64x64xbf16>, vector<64x4xbf16>, vector<64x4xf32> -> vector<64x4xf32>
    %156 = arith.truncf %155 : vector<64x4xf32> to vector<64x4xbf16>
    %c6 = arith.constant 6 : index
    %c0_61 = arith.constant 0 : index
    %c0_62 = arith.constant 0 : index
    %157 = vector.load %arg6[%c6, %c0_61, %c0_62] : memref<8x4x32xbf16, #tpu.memory_space<vmem>>, vector<1x4x32xbf16>
    %158 = vector.shape_cast %157 : vector<1x4x32xbf16> to vector<4x32xbf16>
    %cst_63 = arith.constant dense<0.000000e+00> : vector<64x32xf32>
    %159 = tpu.matmul %156, %158, %cst_63 {dimension_numbers = #tpu.dot_dimension_numbers<[1], [0], [0], [1], [0, 0, 1, 1], [], []>} : vector<64x4xbf16>, vector<4x32xbf16>, vector<64x32xf32> -> vector<64x32xf32>
    %160 = arith.addf %139, %159 : vector<64x32xf32>
    %161 = vector.extract_strided_slice %6 {offsets = [0, 28], sizes = [64, 4], strides = [1, 1]} : vector<64x64xbf16> to vector<64x4xbf16>
    %162 = vector.extract_strided_slice %6 {offsets = [0, 60], sizes = [64, 4], strides = [1, 1]} : vector<64x64xbf16> to vector<64x4xbf16>
    %163 = vector.extract_strided_slice %13 {offsets = [0, 28], sizes = [64, 4], strides = [1, 1]} : vector<64x96xbf16> to vector<64x4xbf16>
    %cst_64 = arith.constant dense<0.000000e+00> : vector<64x64xf32>
    %164 = tpu.matmul %161, %163, %cst_64 {dimension_numbers = #tpu.dot_dimension_numbers<[1], [1], [0], [0], [0, 0, 1, 0], [], []>} : vector<64x4xbf16>, vector<64x4xbf16>, vector<64x64xf32> -> vector<64x64xf32>
    %cst_65 = arith.constant dense<0xFF800000> : vector<64xf32>
    %165 = vector.multi_reduction <maximumf>, %164, %cst_65 [1] : vector<64x64xf32> to vector<64xf32>
    %166 = vector.shape_cast %165 : vector<64xf32> to vector<64x1xf32>
    %167 = vector.broadcast %166 : vector<64x1xf32> to vector<64x64xf32>
    %168 = arith.subf %164, %167 : vector<64x64xf32>
    %169 = math.exp %168 : vector<64x64xf32>
    %cst_66 = arith.constant dense<0.000000e+00> : vector<64xf32>
    %170 = vector.multi_reduction <add>, %169, %cst_66 [1] : vector<64x64xf32> to vector<64xf32>
    %171 = vector.shape_cast %170 : vector<64xf32> to vector<64x1xf32>
    %172 = tpu.reciprocal %171 {approx = true} : vector<64x1xf32> -> vector<64x1xf32>
    %173 = vector.broadcast %172 : vector<64x1xf32> to vector<64x64xf32>
    %174 = arith.mulf %169, %173 : vector<64x64xf32>
    %175 = arith.truncf %174 : vector<64x64xf32> to vector<64x64xbf16>
    %cst_67 = arith.constant dense<0.000000e+00> : vector<64x4xf32>
    %176 = tpu.matmul %175, %162, %cst_67 {dimension_numbers = #tpu.dot_dimension_numbers<[1], [0], [0], [1], [0, 0, 1, 1], [], []>} : vector<64x64xbf16>, vector<64x4xbf16>, vector<64x4xf32> -> vector<64x4xf32>
    %177 = arith.truncf %176 : vector<64x4xf32> to vector<64x4xbf16>
    %c7 = arith.constant 7 : index
    %c0_68 = arith.constant 0 : index
    %c0_69 = arith.constant 0 : index
    %178 = vector.load %arg6[%c7, %c0_68, %c0_69] : memref<8x4x32xbf16, #tpu.memory_space<vmem>>, vector<1x4x32xbf16>
    %179 = vector.shape_cast %178 : vector<1x4x32xbf16> to vector<4x32xbf16>
    %cst_70 = arith.constant dense<0.000000e+00> : vector<64x32xf32>
    %180 = tpu.matmul %177, %179, %cst_70 {dimension_numbers = #tpu.dot_dimension_numbers<[1], [0], [0], [1], [0, 0, 1, 1], [], []>} : vector<64x4xbf16>, vector<4x32xbf16>, vector<64x32xf32> -> vector<64x32xf32>
    %181 = arith.addf %160, %180 : vector<64x32xf32>
    %182 = vector.broadcast %14 : vector<1x32xf32> to vector<64x32xf32>
    %183 = arith.addf %181, %182 : vector<64x32xf32>
    %184 = arith.truncf %183 : vector<64x32xf32> to vector<64x32xbf16>
    %c0_71 = arith.constant 0 : index
    %c0_72 = arith.constant 0 : index
    %185 = vector.load %arg12[%c0_71, %c0_72] : memref<32x16xbf16, #tpu.memory_space<vmem>>, vector<32x16xbf16>
    %cst_73 = arith.constant dense<0.000000e+00> : vector<64x16xf32>
    %186 = tpu.matmul %184, %185, %cst_73 {dimension_numbers = #tpu.dot_dimension_numbers<[1], [0], [0], [1], [0, 0, 1, 1], [], []>} : vector<64x32xbf16>, vector<32x16xbf16>, vector<64x16xf32> -> vector<64x16xf32>
    %c0_74 = arith.constant 0 : index
    %c0_75 = arith.constant 0 : index
    %187 = vector.load %arg13[%c0_74, %c0_75] : memref<1x16xf32, #tpu.memory_space<vmem>>, vector<1x16xf32>
    %188 = vector.broadcast %187 : vector<1x16xf32> to vector<64x16xf32>
    %189 = arith.addf %186, %188 : vector<64x16xf32>
    %c0_76 = arith.constant 0 : index
    %c0_77 = arith.constant 0 : index
    %190 = vector.load %arg16[%c0_76, %c0_77] : memref<64x16xf32, #tpu.memory_space<vmem>>, vector<64x16xf32>
    tpu.vector_store %arg16[%c0_76, %c0_77], %189 {strides = array<i32>} : memref<64x16xf32, #tpu.memory_space<vmem>>, vector<64x16xf32>,
    %c0_78 = arith.constant 0 : index
    %c0_79 = arith.constant 0 : index
    %191 = vector.load %arg8[%c0_78, %c0_79] : memref<32x32xbf16, #tpu.memory_space<vmem>>, vector<32x32xbf16>
    %cst_80 = arith.constant dense<0.000000e+00> : vector<64x32xf32>
    %192 = tpu.matmul %184, %191, %cst_80 {dimension_numbers = #tpu.dot_dimension_numbers<[1], [0], [0], [1], [0, 0, 1, 1], [], []>} : vector<64x32xbf16>, vector<32x32xbf16>, vector<64x32xf32> -> vector<64x32xf32>
    %c0_81 = arith.constant 0 : index
    %c0_82 = arith.constant 0 : index
    %193 = vector.load %arg9[%c0_81, %c0_82] : memref<1x32xf32, #tpu.memory_space<vmem>>, vector<1x32xf32>
    %194 = vector.broadcast %193 : vector<1x32xf32> to vector<64x32xf32>
    %195 = arith.addf %192, %194 : vector<64x32xf32>
    %196 = arith.truncf %195 : vector<64x32xf32> to vector<64x32xbf16>
    %c0_83 = arith.constant 0 : index
    %c0_84 = arith.constant 0 : index
    %197 = vector.load %arg11[%c0_83, %c0_84] : memref<1x32xf32, #tpu.memory_space<vmem>>, vector<1x32xf32>
    %198 = vector.extract_strided_slice %13 {offsets = [0, 32], sizes = [64, 4], strides = [1, 1]} : vector<64x96xbf16> to vector<64x4xbf16>
    %199 = vector.extract_strided_slice %13 {offsets = [0, 64], sizes = [64, 4], strides = [1, 1]} : vector<64x96xbf16> to vector<64x4xbf16>
    %200 = vector.extract_strided_slice %196 {offsets = [0, 0], sizes = [64, 4], strides = [1, 1]} : vector<64x32xbf16> to vector<64x4xbf16>
    %cst_85 = arith.constant dense<0.000000e+00> : vector<64x64xf32>
    %201 = tpu.matmul %198, %200, %cst_85 {dimension_numbers = #tpu.dot_dimension_numbers<[1], [1], [0], [0], [0, 0, 1, 0], [], []>} : vector<64x4xbf16>, vector<64x4xbf16>, vector<64x64xf32> -> vector<64x64xf32>
    %cst_86 = arith.constant dense<0xFF800000> : vector<64xf32>
    %202 = vector.multi_reduction <maximumf>, %201, %cst_86 [1] : vector<64x64xf32> to vector<64xf32>
    %203 = vector.shape_cast %202 : vector<64xf32> to vector<64x1xf32>
    %204 = vector.broadcast %203 : vector<64x1xf32> to vector<64x64xf32>
    %205 = arith.subf %201, %204 : vector<64x64xf32>
    %206 = math.exp %205 : vector<64x64xf32>
    %cst_87 = arith.constant dense<0.000000e+00> : vector<64xf32>
    %207 = vector.multi_reduction <add>, %206, %cst_87 [1] : vector<64x64xf32> to vector<64xf32>
    %208 = vector.shape_cast %207 : vector<64xf32> to vector<64x1xf32>
    %209 = tpu.reciprocal %208 {approx = true} : vector<64x1xf32> -> vector<64x1xf32>
    %210 = vector.broadcast %209 : vector<64x1xf32> to vector<64x64xf32>
    %211 = arith.mulf %206, %210 : vector<64x64xf32>
    %212 = arith.truncf %211 : vector<64x64xf32> to vector<64x64xbf16>
    %cst_88 = arith.constant dense<0.000000e+00> : vector<64x4xf32>
    %213 = tpu.matmul %212, %199, %cst_88 {dimension_numbers = #tpu.dot_dimension_numbers<[1], [0], [0], [1], [0, 0, 1, 1], [], []>} : vector<64x64xbf16>, vector<64x4xbf16>, vector<64x4xf32> -> vector<64x4xf32>
    %214 = arith.truncf %213 : vector<64x4xf32> to vector<64x4xbf16>
    %c0_89 = arith.constant 0 : index
    %c0_90 = arith.constant 0 : index
    %c0_91 = arith.constant 0 : index
    %215 = vector.load %arg10[%c0_89, %c0_90, %c0_91] : memref<8x4x32xbf16, #tpu.memory_space<vmem>>, vector<1x4x32xbf16>
    %216 = vector.shape_cast %215 : vector<1x4x32xbf16> to vector<4x32xbf16>
    %cst_92 = arith.constant dense<0.000000e+00> : vector<64x32xf32>
    %217 = tpu.matmul %214, %216, %cst_92 {dimension_numbers = #tpu.dot_dimension_numbers<[1], [0], [0], [1], [0, 0, 1, 1], [], []>} : vector<64x4xbf16>, vector<4x32xbf16>, vector<64x32xf32> -> vector<64x32xf32>
    %218 = vector.extract_strided_slice %13 {offsets = [0, 36], sizes = [64, 4], strides = [1, 1]} : vector<64x96xbf16> to vector<64x4xbf16>
    %219 = vector.extract_strided_slice %13 {offsets = [0, 68], sizes = [64, 4], strides = [1, 1]} : vector<64x96xbf16> to vector<64x4xbf16>
    %220 = vector.extract_strided_slice %196 {offsets = [0, 4], sizes = [64, 4], strides = [1, 1]} : vector<64x32xbf16> to vector<64x4xbf16>
    %cst_93 = arith.constant dense<0.000000e+00> : vector<64x64xf32>
    %221 = tpu.matmul %218, %220, %cst_93 {dimension_numbers = #tpu.dot_dimension_numbers<[1], [1], [0], [0], [0, 0, 1, 0], [], []>} : vector<64x4xbf16>, vector<64x4xbf16>, vector<64x64xf32> -> vector<64x64xf32>
    %cst_94 = arith.constant dense<0xFF800000> : vector<64xf32>
    %222 = vector.multi_reduction <maximumf>, %221, %cst_94 [1] : vector<64x64xf32> to vector<64xf32>
    %223 = vector.shape_cast %222 : vector<64xf32> to vector<64x1xf32>
    %224 = vector.broadcast %223 : vector<64x1xf32> to vector<64x64xf32>
    %225 = arith.subf %221, %224 : vector<64x64xf32>
    %226 = math.exp %225 : vector<64x64xf32>
    %cst_95 = arith.constant dense<0.000000e+00> : vector<64xf32>
    %227 = vector.multi_reduction <add>, %226, %cst_95 [1] : vector<64x64xf32> to vector<64xf32>
    %228 = vector.shape_cast %227 : vector<64xf32> to vector<64x1xf32>
    %229 = tpu.reciprocal %228 {approx = true} : vector<64x1xf32> -> vector<64x1xf32>
    %230 = vector.broadcast %229 : vector<64x1xf32> to vector<64x64xf32>
    %231 = arith.mulf %226, %230 : vector<64x64xf32>
    %232 = arith.truncf %231 : vector<64x64xf32> to vector<64x64xbf16>
    %cst_96 = arith.constant dense<0.000000e+00> : vector<64x4xf32>
    %233 = tpu.matmul %232, %219, %cst_96 {dimension_numbers = #tpu.dot_dimension_numbers<[1], [0], [0], [1], [0, 0, 1, 1], [], []>} : vector<64x64xbf16>, vector<64x4xbf16>, vector<64x4xf32> -> vector<64x4xf32>
    %234 = arith.truncf %233 : vector<64x4xf32> to vector<64x4xbf16>
    %c1_97 = arith.constant 1 : index
    %c0_98 = arith.constant 0 : index
    %c0_99 = arith.constant 0 : index
    %235 = vector.load %arg10[%c1_97, %c0_98, %c0_99] : memref<8x4x32xbf16, #tpu.memory_space<vmem>>, vector<1x4x32xbf16>
    %236 = vector.shape_cast %235 : vector<1x4x32xbf16> to vector<4x32xbf16>
    %cst_100 = arith.constant dense<0.000000e+00> : vector<64x32xf32>
    %237 = tpu.matmul %234, %236, %cst_100 {dimension_numbers = #tpu.dot_dimension_numbers<[1], [0], [0], [1], [0, 0, 1, 1], [], []>} : vector<64x4xbf16>, vector<4x32xbf16>, vector<64x32xf32> -> vector<64x32xf32>
    %238 = arith.addf %217, %237 : vector<64x32xf32>
    %239 = vector.extract_strided_slice %13 {offsets = [0, 40], sizes = [64, 4], strides = [1, 1]} : vector<64x96xbf16> to vector<64x4xbf16>
    %240 = vector.extract_strided_slice %13 {offsets = [0, 72], sizes = [64, 4], strides = [1, 1]} : vector<64x96xbf16> to vector<64x4xbf16>
    %241 = vector.extract_strided_slice %196 {offsets = [0, 8], sizes = [64, 4], strides = [1, 1]} : vector<64x32xbf16> to vector<64x4xbf16>
    %cst_101 = arith.constant dense<0.000000e+00> : vector<64x64xf32>
    %242 = tpu.matmul %239, %241, %cst_101 {dimension_numbers = #tpu.dot_dimension_numbers<[1], [1], [0], [0], [0, 0, 1, 0], [], []>} : vector<64x4xbf16>, vector<64x4xbf16>, vector<64x64xf32> -> vector<64x64xf32>
    %cst_102 = arith.constant dense<0xFF800000> : vector<64xf32>
    %243 = vector.multi_reduction <maximumf>, %242, %cst_102 [1] : vector<64x64xf32> to vector<64xf32>
    %244 = vector.shape_cast %243 : vector<64xf32> to vector<64x1xf32>
    %245 = vector.broadcast %244 : vector<64x1xf32> to vector<64x64xf32>
    %246 = arith.subf %242, %245 : vector<64x64xf32>
    %247 = math.exp %246 : vector<64x64xf32>
    %cst_103 = arith.constant dense<0.000000e+00> : vector<64xf32>
    %248 = vector.multi_reduction <add>, %247, %cst_103 [1] : vector<64x64xf32> to vector<64xf32>
    %249 = vector.shape_cast %248 : vector<64xf32> to vector<64x1xf32>
    %250 = tpu.reciprocal %249 {approx = true} : vector<64x1xf32> -> vector<64x1xf32>
    %251 = vector.broadcast %250 : vector<64x1xf32> to vector<64x64xf32>
    %252 = arith.mulf %247, %251 : vector<64x64xf32>
    %253 = arith.truncf %252 : vector<64x64xf32> to vector<64x64xbf16>
    %cst_104 = arith.constant dense<0.000000e+00> : vector<64x4xf32>
    %254 = tpu.matmul %253, %240, %cst_104 {dimension_numbers = #tpu.dot_dimension_numbers<[1], [0], [0], [1], [0, 0, 1, 1], [], []>} : vector<64x64xbf16>, vector<64x4xbf16>, vector<64x4xf32> -> vector<64x4xf32>
    %255 = arith.truncf %254 : vector<64x4xf32> to vector<64x4xbf16>
    %c2_105 = arith.constant 2 : index
    %c0_106 = arith.constant 0 : index
    %c0_107 = arith.constant 0 : index
    %256 = vector.load %arg10[%c2_105, %c0_106, %c0_107] : memref<8x4x32xbf16, #tpu.memory_space<vmem>>, vector<1x4x32xbf16>
    %257 = vector.shape_cast %256 : vector<1x4x32xbf16> to vector<4x32xbf16>
    %cst_108 = arith.constant dense<0.000000e+00> : vector<64x32xf32>
    %258 = tpu.matmul %255, %257, %cst_108 {dimension_numbers = #tpu.dot_dimension_numbers<[1], [0], [0], [1], [0, 0, 1, 1], [], []>} : vector<64x4xbf16>, vector<4x32xbf16>, vector<64x32xf32> -> vector<64x32xf32>
    %259 = arith.addf %238, %258 : vector<64x32xf32>
    %260 = vector.extract_strided_slice %13 {offsets = [0, 44], sizes = [64, 4], strides = [1, 1]} : vector<64x96xbf16> to vector<64x4xbf16>
    %261 = vector.extract_strided_slice %13 {offsets = [0, 76], sizes = [64, 4], strides = [1, 1]} : vector<64x96xbf16> to vector<64x4xbf16>
    %262 = vector.extract_strided_slice %196 {offsets = [0, 12], sizes = [64, 4], strides = [1, 1]} : vector<64x32xbf16> to vector<64x4xbf16>
    %cst_109 = arith.constant dense<0.000000e+00> : vector<64x64xf32>
    %263 = tpu.matmul %260, %262, %cst_109 {dimension_numbers = #tpu.dot_dimension_numbers<[1], [1], [0], [0], [0, 0, 1, 0], [], []>} : vector<64x4xbf16>, vector<64x4xbf16>, vector<64x64xf32> -> vector<64x64xf32>
    %cst_110 = arith.constant dense<0xFF800000> : vector<64xf32>
    %264 = vector.multi_reduction <maximumf>, %263, %cst_110 [1] : vector<64x64xf32> to vector<64xf32>
    %265 = vector.shape_cast %264 : vector<64xf32> to vector<64x1xf32>
    %266 = vector.broadcast %265 : vector<64x1xf32> to vector<64x64xf32>
    %267 = arith.subf %263, %266 : vector<64x64xf32>
    %268 = math.exp %267 : vector<64x64xf32>
    %cst_111 = arith.constant dense<0.000000e+00> : vector<64xf32>
    %269 = vector.multi_reduction <add>, %268, %cst_111 [1] : vector<64x64xf32> to vector<64xf32>
    %270 = vector.shape_cast %269 : vector<64xf32> to vector<64x1xf32>
    %271 = tpu.reciprocal %270 {approx = true} : vector<64x1xf32> -> vector<64x1xf32>
    %272 = vector.broadcast %271 : vector<64x1xf32> to vector<64x64xf32>
    %273 = arith.mulf %268, %272 : vector<64x64xf32>
    %274 = arith.truncf %273 : vector<64x64xf32> to vector<64x64xbf16>
    %cst_112 = arith.constant dense<0.000000e+00> : vector<64x4xf32>
    %275 = tpu.matmul %274, %261, %cst_112 {dimension_numbers = #tpu.dot_dimension_numbers<[1], [0], [0], [1], [0, 0, 1, 1], [], []>} : vector<64x64xbf16>, vector<64x4xbf16>, vector<64x4xf32> -> vector<64x4xf32>
    %276 = arith.truncf %275 : vector<64x4xf32> to vector<64x4xbf16>
    %c3_113 = arith.constant 3 : index
    %c0_114 = arith.constant 0 : index
    %c0_115 = arith.constant 0 : index
    %277 = vector.load %arg10[%c3_113, %c0_114, %c0_115] : memref<8x4x32xbf16, #tpu.memory_space<vmem>>, vector<1x4x32xbf16>
    %278 = vector.shape_cast %277 : vector<1x4x32xbf16> to vector<4x32xbf16>
    %cst_116 = arith.constant dense<0.000000e+00> : vector<64x32xf32>
    %279 = tpu.matmul %276, %278, %cst_116 {dimension_numbers = #tpu.dot_dimension_numbers<[1], [0], [0], [1], [0, 0, 1, 1], [], []>} : vector<64x4xbf16>, vector<4x32xbf16>, vector<64x32xf32> -> vector<64x32xf32>
    %280 = arith.addf %259, %279 : vector<64x32xf32>
    %281 = vector.extract_strided_slice %13 {offsets = [0, 48], sizes = [64, 4], strides = [1, 1]} : vector<64x96xbf16> to vector<64x4xbf16>
    %282 = vector.extract_strided_slice %13 {offsets = [0, 80], sizes = [64, 4], strides = [1, 1]} : vector<64x96xbf16> to vector<64x4xbf16>
    %283 = vector.extract_strided_slice %196 {offsets = [0, 16], sizes = [64, 4], strides = [1, 1]} : vector<64x32xbf16> to vector<64x4xbf16>
    %cst_117 = arith.constant dense<0.000000e+00> : vector<64x64xf32>
    %284 = tpu.matmul %281, %283, %cst_117 {dimension_numbers = #tpu.dot_dimension_numbers<[1], [1], [0], [0], [0, 0, 1, 0], [], []>} : vector<64x4xbf16>, vector<64x4xbf16>, vector<64x64xf32> -> vector<64x64xf32>
    %cst_118 = arith.constant dense<0xFF800000> : vector<64xf32>
    %285 = vector.multi_reduction <maximumf>, %284, %cst_118 [1] : vector<64x64xf32> to vector<64xf32>
    %286 = vector.shape_cast %285 : vector<64xf32> to vector<64x1xf32>
    %287 = vector.broadcast %286 : vector<64x1xf32> to vector<64x64xf32>
    %288 = arith.subf %284, %287 : vector<64x64xf32>
    %289 = math.exp %288 : vector<64x64xf32>
    %cst_119 = arith.constant dense<0.000000e+00> : vector<64xf32>
    %290 = vector.multi_reduction <add>, %289, %cst_119 [1] : vector<64x64xf32> to vector<64xf32>
    %291 = vector.shape_cast %290 : vector<64xf32> to vector<64x1xf32>
    %292 = tpu.reciprocal %291 {approx = true} : vector<64x1xf32> -> vector<64x1xf32>
    %293 = vector.broadcast %292 : vector<64x1xf32> to vector<64x64xf32>
    %294 = arith.mulf %289, %293 : vector<64x64xf32>
    %295 = arith.truncf %294 : vector<64x64xf32> to vector<64x64xbf16>
    %cst_120 = arith.constant dense<0.000000e+00> : vector<64x4xf32>
    %296 = tpu.matmul %295, %282, %cst_120 {dimension_numbers = #tpu.dot_dimension_numbers<[1], [0], [0], [1], [0, 0, 1, 1], [], []>} : vector<64x64xbf16>, vector<64x4xbf16>, vector<64x4xf32> -> vector<64x4xf32>
    %297 = arith.truncf %296 : vector<64x4xf32> to vector<64x4xbf16>
    %c4_121 = arith.constant 4 : index
    %c0_122 = arith.constant 0 : index
    %c0_123 = arith.constant 0 : index
    %298 = vector.load %arg10[%c4_121, %c0_122, %c0_123] : memref<8x4x32xbf16, #tpu.memory_space<vmem>>, vector<1x4x32xbf16>
    %299 = vector.shape_cast %298 : vector<1x4x32xbf16> to vector<4x32xbf16>
    %cst_124 = arith.constant dense<0.000000e+00> : vector<64x32xf32>
    %300 = tpu.matmul %297, %299, %cst_124 {dimension_numbers = #tpu.dot_dimension_numbers<[1], [0], [0], [1], [0, 0, 1, 1], [], []>} : vector<64x4xbf16>, vector<4x32xbf16>, vector<64x32xf32> -> vector<64x32xf32>
    %301 = arith.addf %280, %300 : vector<64x32xf32>
    %302 = vector.extract_strided_slice %13 {offsets = [0, 52], sizes = [64, 4], strides = [1, 1]} : vector<64x96xbf16> to vector<64x4xbf16>
    %303 = vector.extract_strided_slice %13 {offsets = [0, 84], sizes = [64, 4], strides = [1, 1]} : vector<64x96xbf16> to vector<64x4xbf16>
    %304 = vector.extract_strided_slice %196 {offsets = [0, 20], sizes = [64, 4], strides = [1, 1]} : vector<64x32xbf16> to vector<64x4xbf16>
    %cst_125 = arith.constant dense<0.000000e+00> : vector<64x64xf32>
    %305 = tpu.matmul %302, %304, %cst_125 {dimension_numbers = #tpu.dot_dimension_numbers<[1], [1], [0], [0], [0, 0, 1, 0], [], []>} : vector<64x4xbf16>, vector<64x4xbf16>, vector<64x64xf32> -> vector<64x64xf32>
    %cst_126 = arith.constant dense<0xFF800000> : vector<64xf32>
    %306 = vector.multi_reduction <maximumf>, %305, %cst_126 [1] : vector<64x64xf32> to vector<64xf32>
    %307 = vector.shape_cast %306 : vector<64xf32> to vector<64x1xf32>
    %308 = vector.broadcast %307 : vector<64x1xf32> to vector<64x64xf32>
    %309 = arith.subf %305, %308 : vector<64x64xf32>
    %310 = math.exp %309 : vector<64x64xf32>
    %cst_127 = arith.constant dense<0.000000e+00> : vector<64xf32>
    %311 = vector.multi_reduction <add>, %310, %cst_127 [1] : vector<64x64xf32> to vector<64xf32>
    %312 = vector.shape_cast %311 : vector<64xf32> to vector<64x1xf32>
    %313 = tpu.reciprocal %312 {approx = true} : vector<64x1xf32> -> vector<64x1xf32>
    %314 = vector.broadcast %313 : vector<64x1xf32> to vector<64x64xf32>
    %315 = arith.mulf %310, %314 : vector<64x64xf32>
    %316 = arith.truncf %315 : vector<64x64xf32> to vector<64x64xbf16>
    %cst_128 = arith.constant dense<0.000000e+00> : vector<64x4xf32>
    %317 = tpu.matmul %316, %303, %cst_128 {dimension_numbers = #tpu.dot_dimension_numbers<[1], [0], [0], [1], [0, 0, 1, 1], [], []>} : vector<64x64xbf16>, vector<64x4xbf16>, vector<64x4xf32> -> vector<64x4xf32>
    %318 = arith.truncf %317 : vector<64x4xf32> to vector<64x4xbf16>
    %c5_129 = arith.constant 5 : index
    %c0_130 = arith.constant 0 : index
    %c0_131 = arith.constant 0 : index
    %319 = vector.load %arg10[%c5_129, %c0_130, %c0_131] : memref<8x4x32xbf16, #tpu.memory_space<vmem>>, vector<1x4x32xbf16>
    %320 = vector.shape_cast %319 : vector<1x4x32xbf16> to vector<4x32xbf16>
    %cst_132 = arith.constant dense<0.000000e+00> : vector<64x32xf32>
    %321 = tpu.matmul %318, %320, %cst_132 {dimension_numbers = #tpu.dot_dimension_numbers<[1], [0], [0], [1], [0, 0, 1, 1], [], []>} : vector<64x4xbf16>, vector<4x32xbf16>, vector<64x32xf32> -> vector<64x32xf32>
    %322 = arith.addf %301, %321 : vector<64x32xf32>
    %323 = vector.extract_strided_slice %13 {offsets = [0, 56], sizes = [64, 4], strides = [1, 1]} : vector<64x96xbf16> to vector<64x4xbf16>
    %324 = vector.extract_strided_slice %13 {offsets = [0, 88], sizes = [64, 4], strides = [1, 1]} : vector<64x96xbf16> to vector<64x4xbf16>
    %325 = vector.extract_strided_slice %196 {offsets = [0, 24], sizes = [64, 4], strides = [1, 1]} : vector<64x32xbf16> to vector<64x4xbf16>
    %cst_133 = arith.constant dense<0.000000e+00> : vector<64x64xf32>
    %326 = tpu.matmul %323, %325, %cst_133 {dimension_numbers = #tpu.dot_dimension_numbers<[1], [1], [0], [0], [0, 0, 1, 0], [], []>} : vector<64x4xbf16>, vector<64x4xbf16>, vector<64x64xf32> -> vector<64x64xf32>
    %cst_134 = arith.constant dense<0xFF800000> : vector<64xf32>
    %327 = vector.multi_reduction <maximumf>, %326, %cst_134 [1] : vector<64x64xf32> to vector<64xf32>
    %328 = vector.shape_cast %327 : vector<64xf32> to vector<64x1xf32>
    %329 = vector.broadcast %328 : vector<64x1xf32> to vector<64x64xf32>
    %330 = arith.subf %326, %329 : vector<64x64xf32>
    %331 = math.exp %330 : vector<64x64xf32>
    %cst_135 = arith.constant dense<0.000000e+00> : vector<64xf32>
    %332 = vector.multi_reduction <add>, %331, %cst_135 [1] : vector<64x64xf32> to vector<64xf32>
    %333 = vector.shape_cast %332 : vector<64xf32> to vector<64x1xf32>
    %334 = tpu.reciprocal %333 {approx = true} : vector<64x1xf32> -> vector<64x1xf32>
    %335 = vector.broadcast %334 : vector<64x1xf32> to vector<64x64xf32>
    %336 = arith.mulf %331, %335 : vector<64x64xf32>
    %337 = arith.truncf %336 : vector<64x64xf32> to vector<64x64xbf16>
    %cst_136 = arith.constant dense<0.000000e+00> : vector<64x4xf32>
    %338 = tpu.matmul %337, %324, %cst_136 {dimension_numbers = #tpu.dot_dimension_numbers<[1], [0], [0], [1], [0, 0, 1, 1], [], []>} : vector<64x64xbf16>, vector<64x4xbf16>, vector<64x4xf32> -> vector<64x4xf32>
    %339 = arith.truncf %338 : vector<64x4xf32> to vector<64x4xbf16>
    %c6_137 = arith.constant 6 : index
    %c0_138 = arith.constant 0 : index
    %c0_139 = arith.constant 0 : index
    %340 = vector.load %arg10[%c6_137, %c0_138, %c0_139] : memref<8x4x32xbf16, #tpu.memory_space<vmem>>, vector<1x4x32xbf16>
    %341 = vector.shape_cast %340 : vector<1x4x32xbf16> to vector<4x32xbf16>
    %cst_140 = arith.constant dense<0.000000e+00> : vector<64x32xf32>
    %342 = tpu.matmul %339, %341, %cst_140 {dimension_numbers = #tpu.dot_dimension_numbers<[1], [0], [0], [1], [0, 0, 1, 1], [], []>} : vector<64x4xbf16>, vector<4x32xbf16>, vector<64x32xf32> -> vector<64x32xf32>
    %343 = arith.addf %322, %342 : vector<64x32xf32>
    %344 = vector.extract_strided_slice %13 {offsets = [0, 60], sizes = [64, 4], strides = [1, 1]} : vector<64x96xbf16> to vector<64x4xbf16>
    %345 = vector.extract_strided_slice %13 {offsets = [0, 92], sizes = [64, 4], strides = [1, 1]} : vector<64x96xbf16> to vector<64x4xbf16>
    %346 = vector.extract_strided_slice %196 {offsets = [0, 28], sizes = [64, 4], strides = [1, 1]} : vector<64x32xbf16> to vector<64x4xbf16>
    %cst_141 = arith.constant dense<0.000000e+00> : vector<64x64xf32>
    %347 = tpu.matmul %344, %346, %cst_141 {dimension_numbers = #tpu.dot_dimension_numbers<[1], [1], [0], [0], [0, 0, 1, 0], [], []>} : vector<64x4xbf16>, vector<64x4xbf16>, vector<64x64xf32> -> vector<64x64xf32>
    %cst_142 = arith.constant dense<0xFF800000> : vector<64xf32>
    %348 = vector.multi_reduction <maximumf>, %347, %cst_142 [1] : vector<64x64xf32> to vector<64xf32>
    %349 = vector.shape_cast %348 : vector<64xf32> to vector<64x1xf32>
    %350 = vector.broadcast %349 : vector<64x1xf32> to vector<64x64xf32>
    %351 = arith.subf %347, %350 : vector<64x64xf32>
    %352 = math.exp %351 : vector<64x64xf32>
    %cst_143 = arith.constant dense<0.000000e+00> : vector<64xf32>
    %353 = vector.multi_reduction <add>, %352, %cst_143 [1] : vector<64x64xf32> to vector<64xf32>
    %354 = vector.shape_cast %353 : vector<64xf32> to vector<64x1xf32>
    %355 = tpu.reciprocal %354 {approx = true} : vector<64x1xf32> -> vector<64x1xf32>
    %356 = vector.broadcast %355 : vector<64x1xf32> to vector<64x64xf32>
    %357 = arith.mulf %352, %356 : vector<64x64xf32>
    %358 = arith.truncf %357 : vector<64x64xf32> to vector<64x64xbf16>
    %cst_144 = arith.constant dense<0.000000e+00> : vector<64x4xf32>
    %359 = tpu.matmul %358, %345, %cst_144 {dimension_numbers = #tpu.dot_dimension_numbers<[1], [0], [0], [1], [0, 0, 1, 1], [], []>} : vector<64x64xbf16>, vector<64x4xbf16>, vector<64x4xf32> -> vector<64x4xf32>
    %360 = arith.truncf %359 : vector<64x4xf32> to vector<64x4xbf16>
    %c7_145 = arith.constant 7 : index
    %c0_146 = arith.constant 0 : index
    %c0_147 = arith.constant 0 : index
    %361 = vector.load %arg10[%c7_145, %c0_146, %c0_147] : memref<8x4x32xbf16, #tpu.memory_space<vmem>>, vector<1x4x32xbf16>
    %362 = vector.shape_cast %361 : vector<1x4x32xbf16> to vector<4x32xbf16>
    %cst_148 = arith.constant dense<0.000000e+00> : vector<64x32xf32>
    %363 = tpu.matmul %360, %362, %cst_148 {dimension_numbers = #tpu.dot_dimension_numbers<[1], [0], [0], [1], [0, 0, 1, 1], [], []>} : vector<64x4xbf16>, vector<4x32xbf16>, vector<64x32xf32> -> vector<64x32xf32>
    %364 = arith.addf %343, %363 : vector<64x32xf32>
    %365 = vector.broadcast %197 : vector<1x32xf32> to vector<64x32xf32>
    %366 = arith.addf %364, %365 : vector<64x32xf32>
    %367 = arith.truncf %366 : vector<64x32xf32> to vector<64x32xbf16>
    %c0_149 = arith.constant 0 : index
    %c0_150 = arith.constant 0 : index
    %368 = vector.load %arg14[%c0_149, %c0_150] : memref<32x24xbf16, #tpu.memory_space<vmem>>, vector<32x24xbf16>
    %cst_151 = arith.constant dense<0.000000e+00> : vector<64x24xf32>
    %369 = tpu.matmul %367, %368, %cst_151 {dimension_numbers = #tpu.dot_dimension_numbers<[1], [0], [0], [1], [0, 0, 1, 1], [], []>} : vector<64x32xbf16>, vector<32x24xbf16>, vector<64x24xf32> -> vector<64x24xf32>
    %c0_152 = arith.constant 0 : index
    %c0_153 = arith.constant 0 : index
    %370 = vector.load %arg15[%c0_152, %c0_153] : memref<1x24xf32, #tpu.memory_space<vmem>>, vector<1x24xf32>
    %371 = vector.broadcast %370 : vector<1x24xf32> to vector<64x24xf32>
    %372 = arith.addf %369, %371 : vector<64x24xf32>
    %c0_154 = arith.constant 0 : index
    %c0_155 = arith.constant 0 : index
    %373 = vector.load %arg17[%c0_154, %c0_155] : memref<64x24xf32, #tpu.memory_space<vmem>>, vector<64x24xf32>
    tpu.vector_store %arg17[%c0_154, %c0_155], %372 {strides = array<i32>} : memref<64x24xf32, #tpu.memory_space<vmem>>, vector<64x24xf32>,
    return
  }
}

</mosaic_0001>

<bundles_post_ra>
// kernel: mha_across_feat_old.1
= control target key start
LH: loop header
LB: loop body
LE: loop exit
PB: predicated region body
PF: predicated region fallthrough
CT: control target
= control target key end

     0   :  { %s11179_s0 = inlined_call_operand.vmem [shape: bf16[64,16], index: 0, kind: input, shape index: {}]   ;;  %s11180_s1 = inlined_call_operand.vmem [shape: bf16[64,24], index: 1, kind: input, shape index: {}]   ;;  %s11181_s2 = inlined_call_operand.vmem [shape: bf16[16,64], index: 2, kind: input, shape index: {}]   ;;  %s11182_s3 = inlined_call_operand.vmem [shape: f32[1,64], index: 3, kind: input, shape index: {}]   ;;  %s11183_s4 = inlined_call_operand.vmem [shape: bf16[24,96], index: 4, kind: input, shape index: {}]   ;;  %s11184_s5 = inlined_call_operand.vmem [shape: f32[1,96], index: 5, kind: input, shape index: {}]   ;;  %s11185_s6 = inlined_call_operand.vmem [shape: bf16[8,4,32], index: 6, kind: input, shape index: {}]   ;;  %s11186_s7 = inlined_call_operand.vmem [shape: f32[1,32], index: 7, kind: input, shape index: {}]   ;;  %s11187_s8 = inlined_call_operand.vmem [shape: bf16[32,32], index: 8, kind: input, shape index: {}]   ;;  %s11188_s9 = inlined_call_operand.vmem [shape: f32[1,32], index: 9, kind: input, shape index: {}]   ;;  %s11189_s10 = inlined_call_operand.vmem [shape: bf16[8,4,32], index: 10, kind: input, shape index: {}]   ;;  %s11190_s11 = inlined_call_operand.vmem [shape: f32[1,32], index: 11, kind: input, shape index: {}]   ;;  %s11191_s12 = inlined_call_operand.vmem [shape: bf16[32,16], index: 12, kind: input, shape index: {}]   ;;  %s11192_s13 = inlined_call_operand.vmem [shape: f32[1,16], index: 13, kind: input, shape index: {}]   ;;  %s11193_s14 = inlined_call_operand.vmem [shape: bf16[32,24], index: 14, kind: input, shape index: {}]   ;;  %s11194_s15 = inlined_call_operand.vmem [shape: f32[1,24], index: 15, kind: input, shape index: {}]   ;;  %s11195_s16 = inlined_call_operand.hbm [shape: f32[64,16], index: 16, kind: output, shape index: {0}]   ;;  %s11196_s17 = inlined_call_operand.hbm [shape: f32[64,24], index: 17, kind: output, shape index: {1}]  }
   0x1   :  { %11203 = sst [smem:[#allocation8_spill]] %s11179_s0 }
   0x2   :  { %11204 = sst [smem:[#allocation9_spill]] %s11180_s1 }
   0x3   :  { %23 = vsyncpa [#allocation3], 0  ;;  %v8193_v0 = vld [vmem:[%s11183_s4 + $0x8] ss:$0 sps:$4 sm:$0xff]   ;;  %vm243_vm0 = vcmask 1043456   ;;  %v8194_v1 = vld [vmem:[%s11183_s4] sm:$0xff]  }
   0x4   :  { %8085 = vmatprep.subr.msk.bf16.mxu1 %vm243_vm0, %v8193_v0  ;;  %v245_v2 = vsel %vm243_vm0, %v8193_v0, 0  ;;  %s11205_s0 = sld [smem:[#allocation9_spill]]  ;;  %vm230_vm1 = vcmask 195584   ;;  %v8199_v6 = vld [vmem:[%s11181_s2] sm:$0xff]   ;;  %vm101_vm2 = vcmask 130048  }
   0x5   :  { %7358 = vmatpush3.bf16.msra.mxu1 %v245_v2  ;;  %s11206_s23 = sld [smem:[#allocation8_spill]]  ;;  %7347 = vmatprep.subr.bf16.mxu0 %v8199_v6 }
   0x6   :  { %7359 = vmatprep.subr.bf16.mxu1 %v8194_v1  ;;  %7348 = vmatpush3.bf16.msra.mxu0 %v8199_v6 }
   0x9   :  { %7360 = vmatpush3.bf16.msra.mxu1 %v8194_v1 }
   0xa   :  { %v8195_v3 = vld [vmem:[%s11205_s0] sm:$0xff]   ;;  %v8196_v4 = vld [vmem:[%s11205_s0 + $0x8] sm:$0xff]   ;;  %v8197_v5 = vld [vmem:[%s11205_s0 + $0x10] sm:$0xff]  }
   0xb   :  { %7361 = vmatprep.mubr.msk.bf16.mxu1 %vm230_vm1, %v8195_v3  ;;  %v8200_v7 = vld [vmem:[%s11206_s23] sm:$0xff]   ;;  %v8201_v8 = vld [vmem:[%s11206_s23 + $0x8] sm:$0xff]   ;;  %v8202_v9 = vld [vmem:[%s11206_s23 + $0x10] sm:$0xff]  }
   0xc   :  { %7349 = vmatprep.mubr.msk.bf16.mxu0 %vm101_vm2, %v8200_v7  ;;  %7362 = vmatmul.mubr.msk.bf16.vlgmr.msra.gmra.mxu1 %vm230_vm1, %v8196_v4  ;;  %v8198_v10 = vld [vmem:[%s11205_s0 + $0x18] sm:$0xff]  }
   0xd   :  { %7365 = vmatprep.mubr.msk.bf16.mxu1 %vm230_vm1, %v8197_v5  ;;  %7350 = vmatmul.mubr.msk.bf16.vlgmr.msra.gmra.mxu0 %vm101_vm2, %v8201_v8 }
   0xe   :  { %7353 = vmatprep.mubr.msk.bf16.mxu0 %vm101_vm2, %v8202_v9 }
   0xf   :  { %24 = vsyncpa [#allocation5], 0  ;;  %v8203_v11 = vld [vmem:[%s11206_s23 + $0x18] sm:$0xff]   ;;  %v6732_v17 = vld [vmem:[%s11182_s3] ss:$0 sm:$0xff]  ;;  %vm317_vm3 = vcmask 31744  }
  0x10   :  { %v6742_v25 = vld [vmem:[%s11184_s5] ss:$0 sm:$0xff]  ;;  %vm407_vm4 = vcmask 523264   ;;  %s8766_s3 = smov 96   ;;  %s8767_s5 = smov 124   ;;  %vm906_vm5 = vcmask 1041408  }
  0x11   :  { %s8768_s4 = smov 92   ;;  %s8769_s20 = smov 120   ;;  %vm3376_vm6 = vcmask 261120  }
  0x12   :  { %s8770_s21 = smov 116   ;;  %s8771_s26 = smov 88  }
  0x13   :  { %s8772_s27 = smov 112   ;;  %s8773_s29 = smov 84  }
  0x14   :  { %7366 = vmatmul.mubr.msk.bf16.gmra.mxu1 %vm230_vm1, %v8198_v10  ;;  %s8774_s30 = smov 108   ;;  %s8775_s19 = smov 80  }
  0x15   :  { %7354 = vmatmul.mubr.msk.bf16.gmra.mxu0 %vm101_vm2, %v8203_v11  ;;  %s8776_s1 = smov 104   ;;  %s8777_s24 = smov 76  }
  0x16   :  { %s11201_s25 = smov 100   ;;  %s8779_s18 = smov 72  }
  0x17   :  { %s11199_s23 = smov 68   ;;  %s8785_s28 = smov 48  }
  0x18   :  { %s8786_s0 = smov 44   ;;  %s11207_s22 = smov 100  }
  0xcc   :  { %v7363_v12 = vpop.f32.mrf.mxu1 }
  0xcd   :  { %v7351_v14 = vpop.f32.mrf.mxu0  ;;  %v290_v37 = vadd.f32 %v7363_v12, %v6742_v25 }
  0xce   :  { %v281_v13 = vpop.f32.mrf.mxu1  ;;  %v157_v51 = vadd.f32 %v7351_v14, %v6732_v17 }
  0xcf   :  { %v148_v16 = vpop.f32.mrf.mxu0  ;;  %v282_v42 = vadd.f32 %v6742_v25, %v281_v13 }
  0xd0   :  { %v7364_v15 = vpop.f32.mrf.mxu1  ;;  %v149_v21 = vadd.f32 %v6732_v17, %v148_v16 }
  0xd1   :  { %v7352_v19 = vpop.f32.mrf.mxu0  ;;  %v293_v36 = vadd.f32 %v7364_v15, %v6742_v25 }
  0xd2   :  { %v284_v18 = vpop.f32.mrf.mxu1  ;;  %v160_v52 = vadd.f32 %v7352_v19, %v6732_v17 }
  0xd3   :  { %v151_v22 = vpop.f32.mrf.mxu0  ;;  %v8944_v38 = vpack.c.bf16 %v293_v36, %v290_v37  ;;  %v285_v41 = vadd.f32 %v6742_v25, %v284_v18 }
  0xd4   :  { %v7367_v20 = vpop.f32.mrf.mxu1  ;;  %v152_v24 = vadd.f32 %v6732_v17, %v151_v22  ;;  %v8960_v54 = vpack.c.bf16 %v160_v52, %v157_v51 }
  0xd5   :  { %v306_v28 = vadd.f32 %v7367_v20, %v6742_v25  ;;  %v7355_v40 = vpop.f32.mrf.mxu0  ;;  %v8950_v44 = vpack.c.bf16 %v285_v41, %v282_v42  ;;  %v334_v45 = vsel %vm317_vm3, %v8944_v38, 0 }
  0xd6   :  { %v297_v23 = vpop.f32.mrf.mxu1  ;;  %v8930_v27 = vpack.c.bf16 %v152_v24, %v149_v21  ;;  %v173_v55 = vadd.f32 %v7355_v40, %v6732_v17 }
  0xd7   :  { %v298_v31 = vadd.f32 %v6742_v25, %v297_v23  ;;  %v164_v43 = vpop.f32.mrf.mxu0  ;;  %v331_v48 = vsel %vm317_vm3, %v8950_v44, 0 }
  0xd8   :  { %v7368_v26 = vpop.f32.mrf.mxu1  ;;  %7377 = vmatprep.mubr.msk.bf16.mxu0 %vm317_vm3, %v8930_v27  ;;  %v165_v49 = vadd.f32 %v6732_v17, %v164_v43 }
  0xd9   :  { %v309_v29 = vadd.f32 %v7368_v26, %v6742_v25  ;;  %v7356_v46 = vpop.f32.mrf.mxu0 }
  0xda   :  { %v300_v30 = vpop.f32.mrf.mxu1  ;;  %v176_v56 = vadd.f32 %v7356_v46, %v6732_v17 }
  0xdb   :  { %v8934_v32 = vpack.c.bf16 %v309_v29, %v306_v28  ;;  %v301_v33 = vadd.f32 %v6742_v25, %v300_v30  ;;  %v167_v47 = vpop.f32.mrf.mxu0 }
  0xdc   :  { %v168_v50 = vadd.f32 %v6732_v17, %v167_v47  ;;  %v8966_v57 = vpack.c.bf16 %v176_v56, %v173_v55 }
  0xdd   :  { %v8936_v34 = vpack.c.bf16 %v301_v33, %v298_v31  ;;  %8086 = vmatprep.subr.msk.bf16.mxu0 %vm317_vm3, %v8934_v32  ;;  %v340_v35 = vsel %vm317_vm3, %v8934_v32, 0 }
  0xde   :  { %7370 = vmatpush3.bf16.xpose.msra.mxu0 %v340_v35  ;;  %v8958_v53 = vpack.c.bf16 %v168_v50, %v165_v49 }
  0xdf   :  { %8087 = vmatprep.subr.msk.bf16.mxu0 %vm317_vm3, %v8936_v34  ;;  %v337_v39 = vsel %vm317_vm3, %v8936_v34, 0 }
  0xe6   :  { %7372 = vmatpush3.bf16.xpose.msra.mxu0 %v337_v39 }
  0xe7   :  { %8088 = vmatprep.subr.msk.bf16.mxu0 %vm317_vm3, %v8944_v38 }
  0xee   :  { %7374 = vmatpush3.bf16.xpose.msra.mxu0 %v334_v45 }
  0xef   :  { %8089 = vmatprep.subr.msk.bf16.mxu0 %vm317_vm3, %v8950_v44 }
  0xf6   :  { %7376 = vmatpush3.bf16.xpose.msra.mxu0 %v331_v48 }
  0xfd   :  { %7378 = vmatmul.mubr.msk.bf16.vlgmr.msra.gmra.mxu0 %vm317_vm3, %v8960_v54 }
  0xfe   :  { %7381 = vmatprep.mubr.msk.bf16.mxu0 %vm317_vm3, %v8958_v53 }
 0x105   :  { %7382 = vmatmul.mubr.msk.bf16.gmra.mxu0 %vm317_vm3, %v8966_v57 }
 0x1bd   :  { %v7379_v58 = vpop.f32.mrf.mxu0 }
 0x1be   :  { %v414_v59 = vsel %vm407_vm4, %v7379_v58, -inf }
 0x1bf   :  { %415 = vmax.xlane.f32.xlu1 %v414_v59  ;;  %v376_v60 = vpop.f32.mrf.mxu0 }
 0x1c0   :  { %v408_v61 = vsel %vm407_vm4, %v376_v60, -inf }
 0x1c1   :  { %409 = vmax.xlane.f32.xlu0 %v408_v61  ;;  %v7380_v62 = vpop.f32.mrf.mxu0 }
 0x1c2   :  { %v417_v63 = vsel %vm407_vm4, %v7380_v62, -inf }
 0x1c3   :  { %418 = vmax.xlane.f32.xlu1 %v417_v63  ;;  %v379_v0 = vpop.f32.mrf.mxu0 }
 0x1c4   :  { %v411_v1 = vsel %vm407_vm4, %v379_v0, -inf }
 0x1c5   :  { %412 = vmax.xlane.f32.xlu0 %v411_v1  ;;  %v7383_v2 = vpop.f32.mrf.mxu0 }
 0x1c6   :  { %v426_v4 = vsel %vm407_vm4, %v7383_v2, -inf }
 0x1c7   :  { %v392_v3 = vpop.f32.mrf.mxu0 }
 0x1c8   :  { %v420_v8 = vsel %vm407_vm4, %v392_v3, -inf }
 0x1c9   :  { %427 = vmax.xlane.f32.xlu0 %v426_v4  ;;  %v7384_v5 = vpop.f32.mrf.mxu0 }
 0x1ca   :  { %v429_v6 = vsel %vm407_vm4, %v7384_v5, -inf }
 0x1cb   :  { %430 = vmax.xlane.f32.xlu1 %v429_v6  ;;  %v395_v7 = vpop.f32.mrf.mxu0 }
 0x1cc   :  { %v423_v9 = vsel %vm407_vm4, %v395_v7, -inf }
 0x1cd   :  { %421 = vmax.xlane.f32.xlu0 %v420_v8 }
 0x1cf   :  { %424 = vmax.xlane.f32.xlu1 %v423_v9 }
 0x1e0   :  { %508 = vrot.lane.b32.xlu1 %v8958_v53, %s8766_s3 }
 0x1e3   :  { %510 = vrot.lane.b32.xlu0 %v8966_v57, %s8766_s3 }
 0x1e4   :  { %506 = vrot.lane.b32.xlu1 %v8960_v54, %s8766_s3 }
 0x1e8   :  { %504 = vrot.lane.b32.xlu1 %v8930_v27, %s8766_s3 }
 0x248   :  { %v416_v10 = vpop.xlane.xlu1 %415 }
 0x249   :  { %v434_v11 = vsub.f32 %v7379_v58, %v416_v10 }
 0x24a   :  { %v410_v12 = vpop.xlane.xlu0 %409 }
 0x24b   :  { %v444_v13 = vmul.f32 1.442695, %v434_v11  ;;  %v432_v14 = vsub.f32 %v376_v60, %v410_v12 }
 0x24c   :  { %v419_v15 = vpop.xlane.xlu1 %418 }
 0x24d   :  { %8210 = vpow2.f32 %v444_v13  ;;  %v440_v16 = vmul.f32 1.442695, %v432_v14  ;;  %v435_v17 = vsub.f32 %v7380_v62, %v419_v15 }
 0x24e   :  { %v413_v18 = vpop.xlane.xlu0 %412 }
 0x24f   :  { %8212 = vpow2.f32 %v440_v16  ;;  %v446_v19 = vmul.f32 1.442695, %v435_v17  ;;  %v433_v20 = vsub.f32 %v379_v0, %v413_v18 }
 0x251   :  { %8214 = vpow2.f32 %v446_v19  ;;  %v442_v21 = vmul.f32 1.442695, %v433_v20 }
 0x252   :  { %v428_v22 = vpop.xlane.xlu0 %427 }
 0x253   :  { %8216 = vpow2.f32 %v442_v21  ;;  %v438_v23 = vsub.f32 %v7383_v2, %v428_v22 }
 0x254   :  { %v431_v24 = vpop.xlane.xlu1 %430 }
 0x255   :  { %v452_v25 = vmul.f32 1.442695, %v438_v23  ;;  %v439_v26 = vsub.f32 %v7384_v5, %v431_v24 }
 0x256   :  { %v422_v28 = vpop.xlane.xlu0 %421 }
 0x257   :  { %8218 = vpow2.f32 %v452_v25  ;;  %v454_v29 = vmul.f32 1.442695, %v439_v26  ;;  %v436_v30 = vsub.f32 %v392_v3, %v422_v28 }
 0x258   :  { %v425_v31 = vpop.xlane.xlu1 %424 }
 0x259   :  { %8220 = vpow2.f32 %v454_v29  ;;  %v448_v33 = vmul.f32 1.442695, %v436_v30  ;;  %v437_v35 = vsub.f32 %v395_v7, %v425_v31 }
 0x25a   :  { %v8986_v36 = vpop.eup %8210  ;;  %v511_v37 = vpop.permute.xlu0 %510 }
 0x25b   :  { %8222 = vpow2.f32 %v448_v33  ;;  %v450_v39 = vmul.f32 1.442695, %v437_v35  ;;  %7385 = vmatprep.subr.bf16.mxu1 %v511_v37  ;;  %v462_v40 = vsel %vm407_vm4, %v8986_v36, 0.0 }
 0x25c   :  { %v8990_v41 = vpop.eup %8212  ;;  %463 = vadd.xlane.f32.xlu0 %v462_v40  ;;  %7386 = vmatpush3.bf16.msra.mxu1 %v511_v37  ;;  %v509_v42 = vpop.permute.xlu1 %508 }
 0x25d   :  { %8224 = vpow2.f32 %v450_v39  ;;  %7387 = vmatprep.subr.bf16.mxu1 %v509_v42  ;;  %v456_v45 = vsel %vm407_vm4, %v8990_v41, 0.0 }
 0x25e   :  { %v8215_v43 = vpop.eup %8214 }
 0x25f   :  { %v465_v46 = vsel %vm407_vm4, %v8215_v43, 0.0 }
 0x260   :  { %v8217_v47 = vpop.eup %8216  ;;  %457 = vadd.xlane.f32.xlu0 %v456_v45  ;;  %466 = vadd.xlane.f32.xlu1 %v465_v46  ;;  %v507_v48 = vpop.permute.xlu1 %506 }
 0x261   :  { %7388 = vmatpush3.bf16.msra.mxu1 %v509_v42  ;;  %v459_v49 = vsel %vm407_vm4, %v8217_v47, 0.0 }
 0x262   :  { %7389 = vmatprep.subr.bf16.mxu1 %v507_v48 }
 0x264   :  { %v8996_v50 = vpop.eup %8218  ;;  %460 = vadd.xlane.f32.xlu1 %v459_v49  ;;  %v505_v51 = vpop.permute.xlu1 %504 }
 0x265   :  { %7390 = vmatpush3.bf16.msra.mxu1 %v507_v48  ;;  %v474_v52 = vsel %vm407_vm4, %v8996_v50, 0.0 }
 0x266   :  { %v8221_v55 = vpop.eup %8220  ;;  %7391 = vmatprep.subr.bf16.mxu1 %v505_v51  ;;  %475 = vadd.xlane.f32.xlu0 %v474_v52 }
 0x267   :  { %v477_v58 = vsel %vm407_vm4, %v8221_v55, 0.0 }
 0x268   :  { %v8223_v56 = vpop.eup %8222 }
 0x269   :  { %7392 = vmatpush3.bf16.msra.mxu1 %v505_v51  ;;  %v468_v59 = vsel %vm407_vm4, %v8223_v56, 0.0 }
 0x26a   :  { %v8225_v60 = vpop.eup %8224  ;;  %478 = vadd.xlane.f32.xlu0 %v477_v58  ;;  %469 = vadd.xlane.f32.xlu1 %v468_v59 }
 0x26b   :  { %v471_v61 = vsel %vm407_vm4, %v8225_v60, 0.0 }
 0x26e   :  { %472 = vadd.xlane.f32.xlu0 %v471_v61 }
 0x27b   :  { %614 = vrot.lane.b32.xlu1 %v8936_v34, %s8767_s5 }
 0x27f   :  { %612 = vrot.lane.b32.xlu1 %v8944_v38, %s8767_s5 }
 0x283   :  { %610 = vrot.lane.b32.xlu1 %v8950_v44, %s8767_s5 }
 0x284   :  { %616 = vrot.lane.b32.xlu0 %v8934_v32, %s8767_s5 }
 0x287   :  { %600 = vrot.lane.b32.xlu1 %v8960_v54, %s8767_s5 }
 0x288   :  { %598 = vrot.lane.b32.xlu0 %v8930_v27, %s8767_s5 }
 0x28b   :  { %604 = vrot.lane.b32.xlu1 %v8966_v57, %s8767_s5 }
 0x28c   :  { %602 = vrot.lane.b32.xlu0 %v8958_v53, %s8767_s5 }
 0x2e5   :  { %v464_v62 = vpop.xlane.xlu0 %463 }
 0x2e9   :  { %v458_v63 = vpop.xlane.xlu0 %457  ;;  %v467_v0 = vpop.xlane.xlu1 %466 }
 0x2ea   :  { %8226 = vrcp.f32 %v467_v0 }
 0x2eb   :  { %8228 = vrcp.f32 %v458_v63 }
 0x2ec   :  { %8230 = vrcp.f32 %v464_v62 }
 0x2ed   :  { %v461_v1 = vpop.xlane.xlu1 %460 }
 0x2ee   :  { %8232 = vrcp.f32 %v461_v1 }
 0x2ef   :  { %v476_v2 = vpop.xlane.xlu0 %475 }
 0x2f3   :  { %v479_v3 = vpop.xlane.xlu0 %478  ;;  %v470_v4 = vpop.xlane.xlu1 %469 }
 0x2f4   :  { %8234 = vrcp.f32 %v479_v3 }
 0x2f5   :  { %8236 = vrcp.f32 %v470_v4 }
 0x2f6   :  { %8238 = vrcp.f32 %v476_v2 }
 0x2f7   :  { %v473_v5 = vpop.xlane.xlu0 %472  ;;  %v8227_v6 = vpop.eup %8226 }
 0x2f8   :  { %8240 = vrcp.f32 %v473_v5  ;;  %v8229_v7 = vpop.eup %8228  ;;  %v491_v10 = vmul.f32 %v8227_v6, %v8215_v43  ;;  %v615_v19 = vpop.permute.xlu1 %614 }
 0x2f9   :  { %v8231_v8 = vpop.eup %8230  ;;  %v488_v12 = vmul.f32 %v8229_v7, %v8990_v41  ;;  %v637_v29 = vsel %vm317_vm3, %v615_v19, 0 }
 0x2fa   :  { %v490_v14 = vmul.f32 %v8231_v8, %v8986_v36 }
 0x2fb   :  { %v8233_v9 = vpop.eup %8232  ;;  %v617_v11 = vpop.permute.xlu0 %616 }
 0x2fc   :  { %8090 = vmatprep.subr.msk.bf16.mxu1 %vm317_vm3, %v617_v11  ;;  %v489_v13 = vmul.f32 %v8233_v9, %v8217_v47  ;;  %v497_v16 = vpack.c.bf16 %v491_v10, %v490_v14  ;;  %v640_v17 = vsel %vm317_vm3, %v617_v11, 0  ;;  %v613_v31 = vpop.permute.xlu1 %612 }
 0x2fd   :  { %v634_v35 = vsel %vm317_vm3, %v613_v31, 0 }
 0x2fe   :  { %v496_v15 = vpack.c.bf16 %v489_v13, %v488_v12 }
 0x2ff   :  { %v599_v33 = vpop.permute.xlu0 %598 }
 0x300   :  { %7393 = vmatprep.mubr.msk.bf16.mxu1 %vm407_vm4, %v496_v15  ;;  %v611_v36 = vpop.permute.xlu1 %610 }
 0x301   :  { %7394 = vmatmul.mubr.msk.bf16.vlgmr.msra.gmra.mxu1 %vm407_vm4, %v497_v16  ;;  %v8235_v18 = vpop.eup %8234  ;;  %v631_v37 = vsel %vm317_vm3, %v611_v36, 0 }
 0x302   :  { %7402 = vmatpush3.bf16.xpose.msra.mxu1 %v640_v17  ;;  %v8237_v20 = vpop.eup %8236  ;;  %v495_v23 = vmul.f32 %v8235_v18, %v8221_v55 }
 0x303   :  { %8091 = vmatprep.subr.msk.bf16.mxu1 %vm317_vm3, %v615_v19  ;;  %v8239_v21 = vpop.eup %8238  ;;  %v492_v24 = vmul.f32 %v8237_v20, %v8223_v56  ;;  %v603_v40 = vpop.permute.xlu0 %602 }
 0x304   :  { %v494_v26 = vmul.f32 %v8239_v21, %v8996_v50  ;;  %v601_v39 = vpop.permute.xlu1 %600 }
 0x305   :  { %v8241_v22 = vpop.eup %8240 }
 0x306   :  { %v493_v25 = vmul.f32 %v8241_v22, %v8225_v60  ;;  %v499_v30 = vpack.c.bf16 %v495_v23, %v494_v26 }
 0x308   :  { %v498_v28 = vpack.c.bf16 %v493_v25, %v492_v24  ;;  %v605_v41 = vpop.permute.xlu1 %604 }
 0x30a   :  { %7404 = vmatpush3.bf16.xpose.msra.mxu1 %v637_v29  ;;  %7397 = vmatprep.mubr.msk.bf16.mxu1 %vm407_vm4, %v498_v28 }
 0x30b   :  { %8092 = vmatprep.subr.msk.bf16.mxu1 %vm317_vm3, %v613_v31  ;;  %7398 = vmatmul.mubr.msk.bf16.gmra.mxu1 %vm407_vm4, %v499_v30 }
 0x30c   :  { %7409 = vmatprep.mubr.msk.bf16.mxu1 %vm317_vm3, %v599_v33 }
 0x312   :  { %7406 = vmatpush3.bf16.xpose.msra.mxu1 %v634_v35 }
 0x313   :  { %8093 = vmatprep.subr.msk.bf16.mxu1 %vm317_vm3, %v611_v36 }
 0x31a   :  { %7408 = vmatpush3.bf16.xpose.msra.mxu1 %v631_v37 }
 0x321   :  { %7410 = vmatmul.mubr.msk.bf16.vlgmr.msra.gmra.mxu1 %vm317_vm3, %v601_v39 }
 0x322   :  { %7413 = vmatprep.mubr.msk.bf16.mxu1 %vm317_vm3, %v603_v40 }
 0x329   :  { %7414 = vmatmul.mubr.msk.bf16.gmra.mxu1 %vm317_vm3, %v605_v41 }
 0x3c1   :  { %v9038_v42 = vpop.f32.mrf.mxu1 }
 0x3c3   :  { %v9040_v43 = vpop.f32.mrf.mxu1 }
 0x3c5   :  { %v9042_v45 = vpop.f32.mrf.mxu1 }
 0x3c6   :  { %v594_v46 = vpack.c.bf16 %v9042_v45, %v9038_v42 }
 0x3c7   :  { %v9046_v47 = vpop.f32.mrf.mxu1 }
 0x3cb   :  { %v9048_v48 = vpop.f32.mrf.mxu1 }
 0x3cd   :  { %v9050_v49 = vpop.f32.mrf.mxu1 }
 0x3cf   :  { %v9052_v50 = vpop.f32.mrf.mxu1 }
 0x3d0   :  { %v596_v51 = vpack.c.bf16 %v9052_v50, %v9048_v48 }
 0x3d1   :  { %v9056_v52 = vpop.f32.mrf.mxu1 }
 0x3e1   :  { %v7411_v55 = vpop.f32.mrf.mxu1 }
 0x3e2   :  { %v713_v61 = vsel %vm407_vm4, %v7411_v55, -inf }
 0x3e3   :  { %v676_v56 = vpop.f32.mrf.mxu1 }
 0x3e4   :  { %v707_v58 = vsel %vm407_vm4, %v676_v56, -inf }
 0x3e5   :  { %708 = vmax.xlane.f32.xlu0 %v707_v58  ;;  %v7412_v59 = vpop.f32.mrf.mxu1 }
 0x3e6   :  { %v716_v1 = vsel %vm407_vm4, %v7412_v59, -inf }
 0x3e7   :  { %v679_v60 = vpop.f32.mrf.mxu1 }
 0x3e8   :  { %v710_v62 = vsel %vm407_vm4, %v679_v60, -inf }
 0x3e9   :  { %714 = vmax.xlane.f32.xlu0 %v713_v61  ;;  %711 = vmax.xlane.f32.xlu1 %v710_v62  ;;  %v7415_v63 = vpop.f32.mrf.mxu1 }
 0x3ea   :  { %v725_v5 = vsel %vm407_vm4, %v7415_v63, -inf }
 0x3eb   :  { %v692_v0 = vpop.f32.mrf.mxu1 }
 0x3ec   :  { %v719_v7 = vsel %vm407_vm4, %v692_v0, -inf }
 0x3ed   :  { %717 = vmax.xlane.f32.xlu0 %v716_v1  ;;  %v7416_v2 = vpop.f32.mrf.mxu1 }
 0x3ee   :  { %v728_v3 = vsel %vm407_vm4, %v7416_v2, -inf }
 0x3ef   :  { %729 = vmax.xlane.f32.xlu1 %v728_v3  ;;  %v695_v4 = vpop.f32.mrf.mxu1 }
 0x3f0   :  { %v722_v6 = vsel %vm407_vm4, %v695_v4, -inf }
 0x3f1   :  { %726 = vmax.xlane.f32.xlu0 %v725_v5 }
 0x3f3   :  { %723 = vmax.xlane.f32.xlu1 %v722_v6 }
 0x3f5   :  { %720 = vmax.xlane.f32.xlu0 %v719_v7 }
 0x404   :  { %803 = vrot.lane.b32.xlu1 %v8958_v53, %s8768_s4 }
 0x40b   :  { %805 = vrot.lane.b32.xlu0 %v8966_v57, %s8768_s4 }
 0x46e   :  { %v709_v8 = vpop.xlane.xlu0 %708 }
 0x46f   :  { %v731_v9 = vsub.f32 %v676_v56, %v709_v8 }
 0x471   :  { %v739_v13 = vmul.f32 1.442695, %v731_v9 }
 0x472   :  { %v715_v10 = vpop.xlane.xlu0 %714  ;;  %v712_v11 = vpop.xlane.xlu1 %711 }
 0x473   :  { %v733_v12 = vsub.f32 %v7411_v55, %v715_v10  ;;  %v732_v15 = vsub.f32 %v679_v60, %v712_v11 }
 0x475   :  { %v743_v14 = vmul.f32 1.442695, %v733_v12  ;;  %v741_v19 = vmul.f32 1.442695, %v732_v15 }
 0x476   :  { %v718_v16 = vpop.xlane.xlu0 %717 }
 0x477   :  { %8242 = vpow2.f32 %v743_v14  ;;  %v734_v17 = vsub.f32 %v7412_v59, %v718_v16 }
 0x478   :  { %v730_v18 = vpop.xlane.xlu1 %729  ;;  %8244 = vpow2.f32 %v739_v13 }
 0x479   :  { %v745_v20 = vmul.f32 1.442695, %v734_v17  ;;  %v738_v29 = vsub.f32 %v7416_v2, %v730_v18 }
 0x47a   :  { %v727_v21 = vpop.xlane.xlu0 %726 }
 0x47b   :  { %8246 = vpow2.f32 %v745_v20  ;;  %v737_v23 = vsub.f32 %v7415_v63, %v727_v21  ;;  %v753_v37 = vmul.f32 1.442695, %v738_v29 }
 0x47c   :  { %v724_v22 = vpop.xlane.xlu1 %723  ;;  %8248 = vpow2.f32 %v741_v19 }
 0x47d   :  { %v736_v24 = vsub.f32 %v695_v4, %v724_v22  ;;  %v751_v30 = vmul.f32 1.442695, %v737_v23  ;;  %v6769_v22 = vld [vmem:[%s11185_s6 + $0x2] sm:$0x3] }
 0x47e   :  { %v721_v25 = vpop.xlane.xlu0 %720  ;;  %v908_v29 = vsel %vm906_vm5, %v6769_v22, 0 }
 0x47f   :  { %v749_v26 = vmul.f32 1.442695, %v736_v24  ;;  %v735_v28 = vsub.f32 %v692_v0, %v721_v25  ;;  %v597_v25 = vld [vmem:[%s11185_s6] sm:$0x3] }
 0x480   :  { %v804_v36 = vpop.permute.xlu1 %803 }
 0x481   :  { %8250 = vpow2.f32 %v749_v26  ;;  %v747_v31 = vmul.f32 1.442695, %v735_v28 }
 0x482   :  { %v806_v33 = vpop.permute.xlu0 %805 }
 0x483   :  { %8252 = vpow2.f32 %v747_v31  ;;  %7417 = vmatprep.subr.bf16.mxu0 %v806_v33  ;;  %8077 = vmatprep.subr.bf16.mxu1 %v806_v33 }
 0x484   :  { %v9070_v35 = vpop.eup %8242  ;;  %7418 = vmatpush3.bf16.msra.mxu0 %v806_v33  ;;  %8081 = vmatpush3.bf16.msra.mxu1 %v806_v33  ;;  %8254 = vpow2.f32 %v751_v30 }
 0x485   :  { %7419 = vmatprep.subr.bf16.mxu0 %v804_v36  ;;  %8078 = vmatprep.subr.bf16.mxu1 %v804_v36  ;;  %v761_v39 = vsel %vm407_vm4, %v9070_v35, 0.0  ;;  %v9074_v40 = vpop.eup %8244  ;;  %8256 = vpow2.f32 %v753_v37 }
 0x486   :  { %762 = vadd.xlane.f32.xlu0 %v761_v39  ;;  %v755_v55 = vsel %vm407_vm4, %v9074_v40, 0.0 }
 0x488   :  { %v9076_v41 = vpop.eup %8246  ;;  %7420 = vmatpush3.bf16.msra.mxu0 %v804_v36  ;;  %8082 = vmatpush3.bf16.msra.mxu1 %v804_v36 }
 0x489   :  { %v764_v56 = vsel %vm407_vm4, %v9076_v41, 0.0  ;;  %v9082_v58 = vpop.eup %8248 }
 0x48a   :  { %756 = vadd.xlane.f32.xlu0 %v755_v55  ;;  %765 = vadd.xlane.f32.xlu1 %v764_v56  ;;  %v758_v59 = vsel %vm407_vm4, %v9082_v58, 0.0  ;;  %v988_v55 = vsel %vm906_vm5, %v597_v25, 0  ;;  %v593_v56 = vpack.c.bf16 %v9046_v47, %v9040_v43 }
 0x48e   :  { %v9086_v60 = vpop.eup %8250  ;;  %759 = vadd.xlane.f32.xlu1 %v758_v59 }
 0x48f   :  { %v770_v61 = vsel %vm407_vm4, %v9086_v60, 0.0 }
 0x490   :  { %v9090_v62 = vpop.eup %8252  ;;  %771 = vadd.xlane.f32.xlu0 %v770_v61 }
 0x491   :  { %v767_v63 = vsel %vm407_vm4, %v9090_v62, 0.0  ;;  %v9094_v0 = vpop.eup %8254 }
 0x492   :  { %768 = vadd.xlane.f32.xlu1 %v767_v63  ;;  %v773_v1 = vsel %vm407_vm4, %v9094_v0, 0.0  ;;  %v9098_v2 = vpop.eup %8256 }
 0x493   :  { %v776_v3 = vsel %vm407_vm4, %v9098_v2, 0.0 }
 0x496   :  { %774 = vadd.xlane.f32.xlu1 %v773_v1 }
 0x49a   :  { %777 = vadd.xlane.f32.xlu1 %v776_v3 }
 0x4a6   :  { %801 = vrot.lane.b32.xlu0 %v8960_v54, %s8768_s4 }
 0x4aa   :  { %1069 = vrot.lane.b32.xlu0 %v8934_v32, %s8769_s20 }
 0x4ab   :  { %799 = vrot.lane.b32.xlu1 %v8930_v27, %s8768_s4 }
 0x4ae   :  { %1065 = vrot.lane.b32.xlu0 %v8944_v38, %s8769_s20 }
 0x4af   :  { %1067 = vrot.lane.b32.xlu1 %v8936_v34, %s8769_s20 }
 0x4b2   :  { %1055 = vrot.lane.b32.xlu0 %v8930_v27, %s8769_s20 }
 0x4b3   :  { %1063 = vrot.lane.b32.xlu1 %v8950_v44, %s8769_s20 }
 0x4b6   :  { %1059 = vrot.lane.b32.xlu0 %v8958_v53, %s8769_s20 }
 0x4b7   :  { %1057 = vrot.lane.b32.xlu1 %v8960_v54, %s8769_s20 }
 0x4ba   :  { %1449 = vrot.lane.b32.xlu0 %v8934_v32, %s8770_s21 }
 0x4bb   :  { %1061 = vrot.lane.b32.xlu1 %v8966_v57, %s8769_s20 }
 0x4be   :  { %1445 = vrot.lane.b32.xlu0 %v8944_v38, %s8770_s21 }
 0x4bf   :  { %1447 = vrot.lane.b32.xlu1 %v8936_v34, %s8770_s21 }
 0x4c2   :  { %1435 = vrot.lane.b32.xlu0 %v8930_v27, %s8770_s21 }
 0x4c3   :  { %1443 = vrot.lane.b32.xlu1 %v8950_v44, %s8770_s21 }
 0x4c6   :  { %1439 = vrot.lane.b32.xlu0 %v8958_v53, %s8770_s21 }
 0x4c7   :  { %1437 = vrot.lane.b32.xlu1 %v8960_v54, %s8770_s21 }
 0x4cb   :  { %1441 = vrot.lane.b32.xlu1 %v8966_v57, %s8770_s21 }
 0x50f   :  { %v763_v4 = vpop.xlane.xlu0 %762 }
 0x513   :  { %v757_v5 = vpop.xlane.xlu0 %756  ;;  %v766_v6 = vpop.xlane.xlu1 %765 }
 0x514   :  { %8258 = vrcp.f32 %v757_v5 }
 0x515   :  { %8260 = vrcp.f32 %v766_v6 }
 0x516   :  { %8262 = vrcp.f32 %v763_v4 }
 0x517   :  { %v760_v7 = vpop.xlane.xlu1 %759 }
 0x518   :  { %8264 = vrcp.f32 %v760_v7 }
 0x519   :  { %v772_v8 = vpop.xlane.xlu0 %771 }
 0x51a   :  { %8266 = vrcp.f32 %v772_v8 }
 0x51b   :  { %v769_v9 = vpop.xlane.xlu1 %768 }
 0x51c   :  { %8268 = vrcp.f32 %v769_v9 }
 0x51d   :  { %v802_v10 = vpop.permute.xlu0 %801 }
 0x51e   :  { %7421 = vmatprep.subr.bf16.mxu0 %v802_v10  ;;  %8079 = vmatprep.subr.bf16.mxu1 %v802_v10 }
 0x51f   :  { %7422 = vmatpush3.bf16.msra.mxu0 %v802_v10  ;;  %8083 = vmatpush3.bf16.msra.mxu1 %v802_v10  ;;  %v775_v11 = vpop.xlane.xlu1 %774 }
 0x520   :  { %8270 = vrcp.f32 %v775_v11 }
 0x521   :  { %v8259_v12 = vpop.eup %8258 }
 0x522   :  { %v8261_v13 = vpop.eup %8260  ;;  %v787_v18 = vmul.f32 %v8259_v12, %v9074_v40 }
 0x523   :  { %v778_v14 = vpop.xlane.xlu1 %777  ;;  %v8263_v15 = vpop.eup %8262  ;;  %v790_v17 = vmul.f32 %v8261_v13, %v9076_v41 }
 0x524   :  { %8272 = vrcp.f32 %v778_v14  ;;  %v789_v23 = vmul.f32 %v8263_v15, %v9070_v35  ;;  %v1070_v35 = vpop.permute.xlu0 %1069 }
 0x525   :  { %v8265_v16 = vpop.eup %8264  ;;  %v1093_v42 = vsel %vm317_vm3, %v1070_v35, 0 }
 0x526   :  { %v788_v19 = vmul.f32 %v8265_v16, %v9082_v58  ;;  %v796_v28 = vpack.c.bf16 %v790_v17, %v789_v23  ;;  %v595_v58 = vpack.c.bf16 %v9056_v52, %v9050_v49 }
 0x527   :  { %v8267_v20 = vpop.eup %8266  ;;  %v800_v21 = vpop.permute.xlu1 %799 }
 0x528   :  { %7423 = vmatprep.subr.bf16.mxu0 %v800_v21  ;;  %8080 = vmatprep.subr.bf16.mxu1 %v800_v21  ;;  %v795_v24 = vpack.c.bf16 %v788_v19, %v787_v18  ;;  %v792_v31 = vmul.f32 %v8267_v20, %v9086_v60  ;;  %v1066_v48 = vpop.permute.xlu0 %1065 }
 0x529   :  { %v8269_v26 = vpop.eup %8268  ;;  %7424 = vmatpush3.bf16.msra.mxu0 %v800_v21  ;;  %8084 = vmatpush3.bf16.msra.mxu1 %v800_v21  ;;  %v1087_v3 = vsel %vm317_vm3, %v1066_v48, 0 }
 0x52a   :  { %7425 = vmatprep.mubr.msk.bf16.mxu0 %vm407_vm4, %v795_v24  ;;  %8094 = vmatprep.subr.msk.bf16.mxu0 %vm906_vm5, %v6769_v22  ;;  %v791_v30 = vmul.f32 %v8269_v26, %v9090_v62 }
 0x52b   :  { %8095 = vmatprep.subr.msk.bf16.mxu1 %vm906_vm5, %v597_v25  ;;  %v1068_v45 = vpop.permute.xlu1 %1067 }
 0x52c   :  { %7426 = vmatmul.mubr.msk.bf16.vlgmr.msra.gmra.mxu0 %vm407_vm4, %v796_v28  ;;  %v797_v33 = vpack.c.bf16 %v792_v31, %v791_v30  ;;  %v1056_v1 = vpop.permute.xlu0 %1055 }
 0x52d   :  { %7434 = vmatpush3.bf16.msra.mxu0 %v908_v29  ;;  %v8271_v36 = vpop.eup %8270 }
 0x52e   :  { %7429 = vmatprep.mubr.msk.bf16.mxu1 %vm407_vm4, %v797_v33  ;;  %8096 = vmatprep.subr.msk.bf16.mxu0 %vm317_vm3, %v1070_v35  ;;  %v793_v39 = vmul.f32 %v8271_v36, %v9094_v0  ;;  %v1090_v0 = vsel %vm317_vm3, %v1068_v45, 0 }
 0x530   :  { %v1060_v4 = vpop.permute.xlu0 %1059 }
 0x531   :  { %v8273_v37 = vpop.eup %8272 }
 0x532   :  { %v794_v40 = vmul.f32 %v8273_v37, %v9098_v2  ;;  %v1064_v2 = vpop.permute.xlu1 %1063 }
 0x533   :  { %v1084_v6 = vsel %vm317_vm3, %v1064_v2, 0 }
 0x534   :  { %v798_v41 = vpack.c.bf16 %v794_v40, %v793_v39  ;;  %v1450_v7 = vpop.permute.xlu0 %1449 }
 0x535   :  { %v1473_v9 = vsel %vm317_vm3, %v1450_v7, 0 }
 0x536   :  { %7430 = vmatmul.mubr.msk.bf16.vlgmr.msra.gmra.mxu1 %vm407_vm4, %v798_v41  ;;  %v1058_v5 = vpop.permute.xlu1 %1057 }
 0x537   :  { %7445 = vmatprep.mubr.msk.bf16.mxu1 %vm317_vm3, %v593_v56  ;;  %7444 = vmatpush3.bf16.msra.mxu1 %v988_v55 }
 0x538   :  { %v1446_v11 = vpop.permute.xlu0 %1445 }
 0x539   :  { %v1467_v14 = vsel %vm317_vm3, %v1446_v11, 0 }
 0x53a   :  { %v1062_v8 = vpop.permute.xlu1 %1061 }
 0x53c   :  { %v1436_v12 = vpop.permute.xlu0 %1435 }
 0x53e   :  { %7446 = vmatmul.mubr.msk.bf16.vlgmr.msra.gmra.mxu1 %vm317_vm3, %v594_v46  ;;  %v1448_v10 = vpop.permute.xlu1 %1447 }
 0x53f   :  { %7449 = vmatprep.mubr.msk.bf16.mxu1 %vm317_vm3, %v595_v58  ;;  %v1470_v13 = vsel %vm317_vm3, %v1448_v10, 0 }
 0x540   :  { %v1440_v18 = vpop.permute.xlu0 %1439 }
 0x542   :  { %v1444_v15 = vpop.permute.xlu1 %1443 }
 0x543   :  { %v1464_v16 = vsel %vm317_vm3, %v1444_v15, 0 }
 0x546   :  { %7450 = vmatmul.mubr.msk.bf16.gmra.mxu1 %vm317_vm3, %v596_v51  ;;  %v1438_v17 = vpop.permute.xlu1 %1437 }
 0x54a   :  { %v1442_v19 = vpop.permute.xlu1 %1441 }
 0x5ec   :  { %v7427_v43 = vpop.f32.mrf.mxu0 }
 0x5ee   :  { %v857_v47 = vpop.f32.mrf.mxu0 }
 0x5f0   :  { %v7428_v59 = vpop.f32.mrf.mxu0 }
 0x5f1   :  { %v889_v62 = vpack.c.bf16 %v7428_v59, %v7427_v43 }
 0x5f2   :  { %v860_v60 = vpop.f32.mrf.mxu0 }
 0x5f3   :  { %v888_v61 = vpack.c.bf16 %v860_v60, %v857_v47 }
 0x5f5   :  { %7435 = vmatprep.mubr.msk.bf16.mxu0 %vm317_vm3, %v888_v61 }
 0x5f6   :  { %v7431_v49 = vpop.f32.mrf.mxu1  ;;  %7436 = vmatmul.mubr.msk.bf16.vlgmr.msra.gmra.mxu0 %vm317_vm3, %v889_v62 }
 0x5f7   :  { %7454 = vmatpush3.bf16.xpose.msra.mxu0 %v1093_v42 }
 0x5f8   :  { %8097 = vmatprep.subr.msk.bf16.mxu0 %vm317_vm3, %v1068_v45  ;;  %v873_v46 = vpop.f32.mrf.mxu1 }
 0x5fa   :  { %v7432_v50 = vpop.f32.mrf.mxu1 }
 0x5fb   :  { %v891_v63 = vpack.c.bf16 %v7432_v50, %v7431_v49 }
 0x5fc   :  { %v876_v51 = vpop.f32.mrf.mxu1 }
 0x5fd   :  { %v890_v52 = vpack.c.bf16 %v876_v51, %v873_v46 }
 0x5ff   :  { %7456 = vmatpush3.bf16.xpose.msra.mxu0 %v1090_v0  ;;  %7439 = vmatprep.mubr.msk.bf16.mxu0 %vm317_vm3, %v890_v52 }
 0x600   :  { %8098 = vmatprep.subr.msk.bf16.mxu0 %vm317_vm3, %v1066_v48  ;;  %7440 = vmatmul.mubr.msk.bf16.gmra.mxu0 %vm317_vm3, %v891_v63 }
 0x601   :  { %7461 = vmatprep.mubr.msk.bf16.mxu0 %vm317_vm3, %v1056_v1 }
 0x607   :  { %7458 = vmatpush3.bf16.xpose.msra.mxu0 %v1087_v3 }
 0x608   :  { %8099 = vmatprep.subr.msk.bf16.mxu0 %vm317_vm3, %v1064_v2 }
 0x60f   :  { %7460 = vmatpush3.bf16.xpose.msra.mxu0 %v1084_v6 }
 0x610   :  { %8101 = vmatprep.subr.msk.bf16.mxu0 %vm317_vm3, %v1450_v7 }
 0x616   :  { %7462 = vmatmul.mubr.msk.bf16.vlgmr.msra.gmra.mxu0 %vm317_vm3, %v1058_v5 }
 0x617   :  { %7465 = vmatprep.mubr.msk.bf16.mxu0 %vm317_vm3, %v1060_v4  ;;  %7496 = vmatpush3.bf16.xpose.msra.mxu0 %v1473_v9 }
 0x618   :  { %8102 = vmatprep.subr.msk.bf16.mxu0 %vm317_vm3, %v1448_v10 }
 0x61e   :  { %7466 = vmatmul.mubr.msk.bf16.gmra.mxu0 %vm317_vm3, %v1062_v8 }
 0x61f   :  { %7498 = vmatpush3.bf16.xpose.msra.mxu0 %v1470_v13  ;;  %7503 = vmatprep.mubr.msk.bf16.mxu0 %vm317_vm3, %v1436_v12 }
 0x620   :  { %8103 = vmatprep.subr.msk.bf16.mxu0 %vm317_vm3, %v1446_v11 }
 0x627   :  { %7500 = vmatpush3.bf16.xpose.msra.mxu0 %v1467_v14 }
 0x628   :  { %8104 = vmatprep.subr.msk.bf16.mxu0 %vm317_vm3, %v1444_v15 }
 0x62f   :  { %7502 = vmatpush3.bf16.xpose.msra.mxu0 %v1464_v16 }
 0x636   :  { %7504 = vmatmul.mubr.msk.bf16.vlgmr.msra.gmra.mxu0 %vm317_vm3, %v1438_v17 }
 0x637   :  { %7507 = vmatprep.mubr.msk.bf16.mxu0 %vm317_vm3, %v1440_v18 }
 0x63e   :  { %7508 = vmatmul.mubr.msk.bf16.gmra.mxu0 %vm317_vm3, %v1442_v19 }
 0x6b6   :  { %v9202_v20 = vpop.f32.mrf.mxu0 }
 0x6b8   :  { %v9204_v21 = vpop.f32.mrf.mxu0 }
 0x6ba   :  { %v9206_v22 = vpop.f32.mrf.mxu0 }
 0x6bc   :  { %v9208_v23 = vpop.f32.mrf.mxu0 }
 0x6c0   :  { %v9210_v24 = vpop.f32.mrf.mxu0 }
 0x6c2   :  { %v9212_v25 = vpop.f32.mrf.mxu0 }
 0x6c4   :  { %v9214_v26 = vpop.f32.mrf.mxu0 }
 0x6c6   :  { %v9216_v28 = vpop.f32.mrf.mxu0 }
 0x6d6   :  { %v7463_v29 = vpop.f32.mrf.mxu0 }
 0x6d7   :  { %v1166_v36 = vsel %vm407_vm4, %v7463_v29, -inf }
 0x6d8   :  { %v1129_v30 = vpop.f32.mrf.mxu0 }
 0x6d9   :  { %v1160_v31 = vsel %vm407_vm4, %v1129_v30, -inf }
 0x6da   :  { %1161 = vmax.xlane.f32.xlu0 %v1160_v31  ;;  %v7464_v33 = vpop.f32.mrf.mxu0 }
 0x6db   :  { %v1169_v41 = vsel %vm407_vm4, %v7464_v33, -inf }
 0x6dc   :  { %v1132_v35 = vpop.f32.mrf.mxu0 }
 0x6dd   :  { %v1163_v37 = vsel %vm407_vm4, %v1132_v35, -inf }
 0x6de   :  { %1167 = vmax.xlane.f32.xlu0 %v1166_v36  ;;  %1164 = vmax.xlane.f32.xlu1 %v1163_v37  ;;  %v7467_v39 = vpop.f32.mrf.mxu0 }
 0x6df   :  { %v1178_v47 = vsel %vm407_vm4, %v7467_v39, -inf }
 0x6e0   :  { %v1145_v40 = vpop.f32.mrf.mxu0 }
 0x6e1   :  { %v1172_v58 = vsel %vm407_vm4, %v1145_v40, -inf }
 0x6e2   :  { %1170 = vmax.xlane.f32.xlu0 %v1169_v41  ;;  %v7468_v55 = vpop.f32.mrf.mxu0 }
 0x6e3   :  { %v1181_v59 = vsel %vm407_vm4, %v7468_v55, -inf }
 0x6e4   :  { %v9222_v56 = vpop.f32.mrf.mxu0 }
 0x6e5   :  { %v1175_v43 = vsel %vm407_vm4, %v9222_v56, -inf }
 0x6e6   :  { %1173 = vmax.xlane.f32.xlu0 %v1172_v58  ;;  %1176 = vmax.xlane.f32.xlu1 %v1175_v43 }
 0x6ea   :  { %1179 = vmax.xlane.f32.xlu0 %v1178_v47  ;;  %1182 = vmax.xlane.f32.xlu1 %v1181_v59 }
 0x763   :  { %v1162_v60 = vpop.xlane.xlu0 %1161 }
 0x764   :  { %v1184_v61 = vsub.f32 %v1129_v30, %v1162_v60 }
 0x766   :  { %v1192_v45 = vmul.f32 1.442695, %v1184_v61 }
 0x767   :  { %v1168_v62 = vpop.xlane.xlu0 %1167  ;;  %v1165_v49 = vpop.xlane.xlu1 %1164 }
 0x768   :  { %v1186_v42 = vsub.f32 %v7463_v29, %v1168_v62  ;;  %v1185_v48 = vsub.f32 %v1132_v35, %v1165_v49 }
 0x76a   :  { %v1196_v46 = vmul.f32 1.442695, %v1186_v42  ;;  %v1194_v52 = vmul.f32 1.442695, %v1185_v48 }
 0x76b   :  { %v1171_v50 = vpop.xlane.xlu0 %1170 }
 0x76c   :  { %8274 = vpow2.f32 %v1196_v46  ;;  %v1187_v51 = vsub.f32 %v7464_v33, %v1171_v50 }
 0x76d   :  { %8276 = vpow2.f32 %v1192_v45 }
 0x76e   :  { %v1198_v63 = vmul.f32 1.442695, %v1187_v51 }
 0x76f   :  { %v1174_v0 = vpop.xlane.xlu0 %1173  ;;  %v1177_v18 = vpop.xlane.xlu1 %1176 }
 0x770   :  { %8278 = vpow2.f32 %v1198_v63  ;;  %v1188_v1 = vsub.f32 %v1145_v40, %v1174_v0  ;;  %v1189_v30 = vsub.f32 %v9222_v56, %v1177_v18  ;;  %v9276_v40 = vpop.f32.mrf.mxu0 }
 0x771   :  { %8280 = vpow2.f32 %v1194_v52  ;;  %v1546_v43 = vsel %vm407_vm4, %v9276_v40, -inf }
 0x772   :  { %v1200_v4 = vmul.f32 1.442695, %v1188_v1  ;;  %v1202_v33 = vmul.f32 1.442695, %v1189_v30  ;;  %v9278_v41 = vpop.f32.mrf.mxu0 }
 0x773   :  { %v1180_v2 = vpop.xlane.xlu0 %1179  ;;  %v1183_v19 = vpop.xlane.xlu1 %1182  ;;  %v1540_v56 = vsel %vm407_vm4, %v9278_v41, -inf }
 0x774   :  { %v1190_v3 = vsub.f32 %v7467_v39, %v1180_v2  ;;  %v1191_v29 = vsub.f32 %v7468_v55, %v1183_v19  ;;  %v9280_v55 = vpop.f32.mrf.mxu0 }
 0x775   :  { %v1549_v59 = vsel %vm407_vm4, %v9280_v55, -inf }
 0x776   :  { %v1204_v5 = vmul.f32 1.442695, %v1190_v3  ;;  %v1206_v31 = vmul.f32 1.442695, %v1191_v29  ;;  %v9284_v58 = vpop.f32.mrf.mxu0 }
 0x777   :  { %v1543_v45 = vsel %vm407_vm4, %v9284_v58, -inf }
 0x778   :  { %8282 = vpow2.f32 %v1204_v5  ;;  %v9290_v47 = vpop.f32.mrf.mxu0 }
 0x779   :  { %v9229_v6 = vpop.eup %8274  ;;  %8284 = vpow2.f32 %v1200_v4  ;;  %v1558_v62 = vsel %vm407_vm4, %v9290_v47, -inf }
 0x77a   :  { %v1214_v7 = vsel %vm407_vm4, %v9229_v6, 0.0  ;;  %v9233_v8 = vpop.eup %8276  ;;  %8286 = vpow2.f32 %v1206_v31  ;;  %v9296_v60 = vpop.f32.mrf.mxu0 }
 0x77b   :  { %1215 = vadd.xlane.f32.xlu0 %v1214_v7  ;;  %v1208_v10 = vsel %vm407_vm4, %v9233_v8, 0.0  ;;  %8288 = vpow2.f32 %v1202_v33  ;;  %v1552_v61 = vsel %vm407_vm4, %v9296_v60, -inf }
 0x77c   :  { %v9308_v49 = vpop.f32.mrf.mxu0 }
 0x77d   :  { %v9235_v9 = vpop.eup %8278  ;;  %v1561_v63 = vsel %vm407_vm4, %v9308_v49, -inf }
 0x77e   :  { %v1217_v11 = vsel %vm407_vm4, %v9235_v9, 0.0  ;;  %v9241_v12 = vpop.eup %8280  ;;  %v9312_v46 = vpop.f32.mrf.mxu0 }
 0x77f   :  { %1209 = vadd.xlane.f32.xlu0 %v1208_v10  ;;  %1218 = vadd.xlane.f32.xlu1 %v1217_v11  ;;  %v1211_v13 = vsel %vm407_vm4, %v9241_v12, 0.0  ;;  %v1555_v51 = vsel %vm407_vm4, %v9312_v46, -inf }
 0x783   :  { %1212 = vadd.xlane.f32.xlu1 %v1211_v13 }
 0x785   :  { %v9245_v14 = vpop.eup %8282 }
 0x786   :  { %v1226_v15 = vsel %vm407_vm4, %v9245_v14, 0.0  ;;  %v9249_v16 = vpop.eup %8284 }
 0x787   :  { %1227 = vadd.xlane.f32.xlu0 %v1226_v15  ;;  %v1220_v17 = vsel %vm407_vm4, %v9249_v16, 0.0  ;;  %v9268_v35 = vpop.eup %8286 }
 0x788   :  { %v1229_v36 = vsel %vm407_vm4, %v9268_v35, 0.0  ;;  %v9272_v37 = vpop.eup %8288 }
 0x789   :  { %v1223_v39 = vsel %vm407_vm4, %v9272_v37, 0.0 }
 0x78b   :  { %1221 = vadd.xlane.f32.xlu0 %v1220_v17 }
 0x794   :  { %1256 = vrot.lane.b32.xlu1 %v8958_v53, %s8771_s26 }
 0x798   :  { %1254 = vrot.lane.b32.xlu1 %v8960_v54, %s8771_s26 }
 0x7a1   :  { %1258 = vrot.lane.b32.xlu0 %v8966_v57, %s8771_s26 }
 0x7a5   :  { %1829 = vrot.lane.b32.xlu0 %v8934_v32, %s8772_s27 }
 0x7a9   :  { %1825 = vrot.lane.b32.xlu0 %v8944_v38, %s8772_s27 }
 0x7ad   :  { %1815 = vrot.lane.b32.xlu0 %v8930_v27, %s8772_s27 }
 0x7b1   :  { %1819 = vrot.lane.b32.xlu0 %v8958_v53, %s8772_s27 }
 0x7bc   :  { %1230 = vadd.xlane.f32.xlu1 %v1229_v36 }
 0x7c0   :  { %1224 = vadd.xlane.f32.xlu1 %v1223_v39 }
 0x7d0   :  { %1541 = vmax.xlane.f32.xlu0 %v1540_v56 }
 0x7d1   :  { %1252 = vrot.lane.b32.xlu1 %v8930_v27, %s8771_s26 }
 0x7d4   :  { %1547 = vmax.xlane.f32.xlu0 %v1546_v43 }
 0x7d5   :  { %1827 = vrot.lane.b32.xlu1 %v8936_v34, %s8772_s27 }
 0x7d8   :  { %1550 = vmax.xlane.f32.xlu0 %v1549_v59 }
 0x7d9   :  { %1823 = vrot.lane.b32.xlu1 %v8950_v44, %s8772_s27 }
 0x7dc   :  { %1553 = vmax.xlane.f32.xlu0 %v1552_v61 }
 0x7dd   :  { %1817 = vrot.lane.b32.xlu1 %v8960_v54, %s8772_s27 }
 0x7e0   :  { %1559 = vmax.xlane.f32.xlu0 %v1558_v62 }
 0x7e1   :  { %1821 = vrot.lane.b32.xlu1 %v8966_v57, %s8772_s27 }
 0x804   :  { %v1216_v42 = vpop.xlane.xlu0 %1215 }
 0x805   :  { %1544 = vmax.xlane.f32.xlu1 %v1543_v45 }
 0x808   :  { %v1210_v48 = vpop.xlane.xlu0 %1209  ;;  %v1219_v50 = vpop.xlane.xlu1 %1218 }
 0x809   :  { %1556 = vmax.xlane.f32.xlu1 %v1555_v51  ;;  %8290 = vrcp.f32 %v1210_v48 }
 0x80c   :  { %v1213_v52 = vpop.xlane.xlu1 %1212 }
 0x80d   :  { %8292 = vrcp.f32 %v1213_v52  ;;  %1562 = vmax.xlane.f32.xlu1 %v1561_v63 }
 0x80e   :  { %8294 = vrcp.f32 %v1219_v50 }
 0x80f   :  { %8296 = vrcp.f32 %v1216_v42 }
 0x810   :  { %v1228_v0 = vpop.xlane.xlu0 %1227  ;;  %v1257_v3 = vpop.permute.xlu1 %1256 }
 0x814   :  { %v1222_v1 = vpop.xlane.xlu0 %1221  ;;  %v1255_v17 = vpop.permute.xlu1 %1254 }
 0x816   :  { %v8291_v2 = vpop.eup %8290 }
 0x817   :  { %v1240_v7 = vmul.f32 %v8291_v2, %v9233_v8 }
 0x818   :  { %v1259_v4 = vpop.permute.xlu0 %1258 }
 0x819   :  { %7469 = vmatprep.subr.bf16.mxu1 %v1259_v4 }
 0x81a   :  { %v8293_v5 = vpop.eup %8292  ;;  %7470 = vmatpush3.bf16.msra.mxu1 %v1259_v4 }
 0x81b   :  { %7471 = vmatprep.subr.bf16.mxu1 %v1257_v3  ;;  %v1241_v10 = vmul.f32 %v8293_v5, %v9241_v12  ;;  %v8295_v12 = vpop.eup %8294 }
 0x81c   :  { %v1830_v11 = vpop.permute.xlu0 %1829  ;;  %v8297_v30 = vpop.eup %8296  ;;  %v1243_v31 = vmul.f32 %v8295_v12, %v9235_v9 }
 0x81d   :  { %8106 = vmatprep.subr.msk.bf16.mxu0 %vm317_vm3, %v1830_v11  ;;  %v1853_v13 = vsel %vm317_vm3, %v1830_v11, 0  ;;  %v1248_v15 = vpack.c.bf16 %v1241_v10, %v1240_v7  ;;  %v1242_v36 = vmul.f32 %v8297_v30, %v9229_v6 }
 0x81e   :  { %7472 = vmatpush3.bf16.msra.mxu1 %v1257_v3  ;;  %7538 = vmatpush3.bf16.xpose.msra.mxu0 %v1853_v13 }
 0x81f   :  { %7473 = vmatprep.subr.bf16.mxu1 %v1255_v17  ;;  %7477 = vmatprep.mubr.msk.bf16.mxu1 %vm407_vm4, %v1248_v15  ;;  %v1249_v39 = vpack.c.bf16 %v1243_v31, %v1242_v36  ;;  %v6786_v36 = vld [vmem:[%s11185_s6 + $0x4] sm:$0x3] }
 0x820   :  { %v1826_v18 = vpop.permute.xlu0 %1825 }
 0x821   :  { %v1847_v52 = vsel %vm317_vm3, %v1826_v18, 0 }
 0x822   :  { %7474 = vmatpush3.bf16.msra.mxu1 %v1255_v17 }
 0x824   :  { %v1816_v19 = vpop.permute.xlu0 %1815 }
 0x825   :  { %7545 = vmatprep.mubr.msk.bf16.mxu0 %vm317_vm3, %v1816_v19 }
 0x828   :  { %v1820_v62 = vpop.permute.xlu0 %1819 }
 0x845   :  { %v1231_v8 = vpop.xlane.xlu1 %1230 }
 0x846   :  { %8298 = vrcp.f32 %v1231_v8 }
 0x847   :  { %8300 = vrcp.f32 %v1222_v1 }
 0x848   :  { %8302 = vrcp.f32 %v1228_v0 }
 0x849   :  { %v1225_v29 = vpop.xlane.xlu1 %1224 }
 0x84a   :  { %8304 = vrcp.f32 %v1225_v29 }
 0x84d   :  { %v1253_v33 = vpop.permute.xlu1 %1252 }
 0x84e   :  { %7475 = vmatprep.subr.bf16.mxu1 %v1253_v33 }
 0x84f   :  { %7476 = vmatpush3.bf16.msra.mxu1 %v1253_v33 }
 0x850   :  { %8100 = vmatprep.subr.msk.bf16.mxu1 %vm906_vm5, %v6786_v36 }
 0x851   :  { %v1828_v56 = vpop.permute.xlu1 %1827 }
 0x852   :  { %7478 = vmatmul.mubr.msk.bf16.vlgmr.msra.gmra.mxu1 %vm407_vm4, %v1249_v39  ;;  %8107 = vmatprep.subr.msk.bf16.mxu0 %vm317_vm3, %v1828_v56  ;;  %v1850_v43 = vsel %vm317_vm3, %v1828_v56, 0  ;;  %v1360_v56 = vsel %vm906_vm5, %v6786_v36, 0 }
 0x853   :  { %7540 = vmatpush3.bf16.xpose.msra.mxu0 %v1850_v43  ;;  %v8299_v59 = vpop.eup %8298  ;;  %7486 = vmatpush3.bf16.msra.mxu1 %v1360_v56 }
 0x854   :  { %8108 = vmatprep.subr.msk.bf16.mxu0 %vm317_vm3, %v1826_v18  ;;  %v8301_v61 = vpop.eup %8300  ;;  %v1247_v6 = vmul.f32 %v8299_v59, %v9268_v35 }
 0x855   :  { %v8303_v9 = vpop.eup %8302  ;;  %v1244_v45 = vmul.f32 %v8301_v61, %v9249_v16  ;;  %v1824_v0 = vpop.permute.xlu1 %1823 }
 0x856   :  { %v1246_v51 = vmul.f32 %v8303_v9, %v9245_v14  ;;  %v1844_v5 = vsel %vm317_vm3, %v1824_v0, 0 }
 0x857   :  { %v8305_v42 = vpop.eup %8304 }
 0x858   :  { %v1245_v48 = vmul.f32 %v8305_v42, %v9272_v37  ;;  %v1251_v1 = vpack.c.bf16 %v1247_v6, %v1246_v51 }
 0x859   :  { %v1542_v50 = vpop.xlane.xlu0 %1541  ;;  %v1818_v11 = vpop.permute.xlu1 %1817 }
 0x85a   :  { %v1250_v63 = vpack.c.bf16 %v1245_v48, %v1244_v45  ;;  %v1564_v2 = vsub.f32 %v9278_v41, %v1542_v50 }
 0x85b   :  { %7542 = vmatpush3.bf16.xpose.msra.mxu0 %v1847_v52 }
 0x85c   :  { %7481 = vmatprep.mubr.msk.bf16.mxu1 %vm407_vm4, %v1250_v63  ;;  %8109 = vmatprep.subr.msk.bf16.mxu0 %vm317_vm3, %v1824_v0  ;;  %v1572_v37 = vmul.f32 1.442695, %v1564_v2 }
 0x85d   :  { %v1548_v35 = vpop.xlane.xlu0 %1547  ;;  %7482 = vmatmul.mubr.msk.bf16.gmra.mxu1 %vm407_vm4, %v1251_v1 }
 0x85e   :  { %v1566_v16 = vsub.f32 %v9276_v40, %v1548_v35 }
 0x860   :  { %v1576_v3 = vmul.f32 1.442695, %v1566_v16 }
 0x861   :  { %v1551_v14 = vpop.xlane.xlu0 %1550 }
 0x862   :  { %8306 = vpow2.f32 %v1576_v3  ;;  %v1567_v4 = vsub.f32 %v9280_v55, %v1551_v14 }
 0x863   :  { %7544 = vmatpush3.bf16.xpose.msra.mxu0 %v1844_v5  ;;  %8308 = vpow2.f32 %v1572_v37 }
 0x864   :  { %v1578_v41 = vmul.f32 1.442695, %v1567_v4 }
 0x865   :  { %v1554_v7 = vpop.xlane.xlu0 %1553 }
 0x866   :  { %8310 = vpow2.f32 %v1578_v41  ;;  %v1568_v10 = vsub.f32 %v9296_v60, %v1554_v7  ;;  %v1822_v60 = vpop.permute.xlu1 %1821 }
 0x868   :  { %v1580_v40 = vmul.f32 1.442695, %v1568_v10 }
 0x869   :  { %v1560_v13 = vpop.xlane.xlu0 %1559 }
 0x86a   :  { %v1570_v15 = vsub.f32 %v9290_v47, %v1560_v13  ;;  %7546 = vmatmul.mubr.msk.bf16.vlgmr.msra.gmra.mxu0 %vm317_vm3, %v1818_v11 }
 0x86b   :  { %7549 = vmatprep.mubr.msk.bf16.mxu0 %vm317_vm3, %v1820_v62 }
 0x86c   :  { %v1584_v17 = vmul.f32 1.442695, %v1570_v15 }
 0x86e   :  { %8312 = vpow2.f32 %v1584_v17 }
 0x86f   :  { %v9346_v55 = vpop.eup %8306  ;;  %8314 = vpow2.f32 %v1580_v40 }
 0x870   :  { %v1594_v18 = vsel %vm407_vm4, %v9346_v55, 0.0  ;;  %v9350_v19 = vpop.eup %8308 }
 0x871   :  { %1595 = vadd.xlane.f32.xlu0 %v1594_v18  ;;  %v1588_v8 = vsel %vm407_vm4, %v9350_v19, 0.0 }
 0x872   :  { %7550 = vmatmul.mubr.msk.bf16.gmra.mxu0 %vm317_vm3, %v1822_v60 }
 0x873   :  { %v9353_v47 = vpop.eup %8310 }
 0x874   :  { %v1597_v12 = vsel %vm407_vm4, %v9353_v47, 0.0 }
 0x875   :  { %1589 = vadd.xlane.f32.xlu0 %v1588_v8  ;;  %1598 = vadd.xlane.f32.xlu1 %v1597_v12 }
 0x87b   :  { %v9359_v29 = vpop.eup %8312 }
 0x87c   :  { %v1606_v30 = vsel %vm407_vm4, %v9359_v29, 0.0  ;;  %v9363_v31 = vpop.eup %8314 }
 0x87d   :  { %1607 = vadd.xlane.f32.xlu0 %v1606_v30  ;;  %v1600_v33 = vsel %vm407_vm4, %v9363_v31, 0.0 }
 0x881   :  { %1601 = vadd.xlane.f32.xlu0 %v1600_v33 }
 0x88e   :  { %v1545_v39 = vpop.xlane.xlu1 %1544 }
 0x88f   :  { %v1565_v43 = vsub.f32 %v9284_v58, %v1545_v39 }
 0x891   :  { %v1574_v59 = vmul.f32 1.442695, %v1565_v43 }
 0x892   :  { %v1557_v58 = vpop.xlane.xlu1 %1556 }
 0x893   :  { %8316 = vpow2.f32 %v1574_v59  ;;  %v1569_v6 = vsub.f32 %v9312_v46, %v1557_v58 }
 0x895   :  { %v1582_v48 = vmul.f32 1.442695, %v1569_v6 }
 0x896   :  { %v1563_v9 = vpop.xlane.xlu1 %1562 }
 0x897   :  { %1638 = vrot.lane.b32.xlu0 %v8966_v57, %s8773_s29  ;;  %v1571_v42 = vsub.f32 %v9308_v49, %v1563_v9  ;;  %v9403_v49 = vpop.f32.mrf.mxu1 }
 0x899   :  { %v1586_v45 = vmul.f32 1.442695, %v1571_v42  ;;  %v9407_v46 = vpop.f32.mrf.mxu1 }
 0x89b   :  { %2209 = vrot.lane.b32.xlu0 %v8934_v32, %s8774_s30  ;;  %8318 = vpow2.f32 %v1586_v45  ;;  %v9411_v0 = vpop.f32.mrf.mxu1 }
 0x89c   :  { %8320 = vpow2.f32 %v1582_v48 }
 0x89d   :  { %v9417_v2 = vpop.f32.mrf.mxu1 }
 0x89f   :  { %2205 = vrot.lane.b32.xlu0 %v8944_v38, %s8774_s30  ;;  %v9421_v16 = vpop.f32.mrf.mxu1 }
 0x8a0   :  { %v9379_v61 = vpop.eup %8316 }
 0x8a1   :  { %v1591_v62 = vsel %vm407_vm4, %v9379_v61, 0.0  ;;  %v9425_v3 = vpop.f32.mrf.mxu1 }
 0x8a2   :  { %1592 = vadd.xlane.f32.xlu1 %v1591_v62 }
 0x8a3   :  { %2195 = vrot.lane.b32.xlu0 %v8930_v27, %s8774_s30  ;;  %v9429_v4 = vpop.f32.mrf.mxu1 }
 0x8a5   :  { %v9431_v41 = vpop.f32.mrf.mxu1 }
 0x8a7   :  { %2199 = vrot.lane.b32.xlu0 %v8958_v53, %s8774_s30 }
 0x8a8   :  { %v9393_v50 = vpop.eup %8318 }
 0x8a9   :  { %v1609_v51 = vsel %vm407_vm4, %v9393_v50, 0.0  ;;  %v9397_v52 = vpop.eup %8320 }
 0x8aa   :  { %v1603_v63 = vsel %vm407_vm4, %v9397_v52, 0.0 }
 0x8b3   :  { %1636 = vrot.lane.b32.xlu1 %v8958_v53, %s8773_s29 }
 0x8b7   :  { %1634 = vrot.lane.b32.xlu1 %v8960_v54, %s8773_s29 }
 0x8db   :  { %1610 = vadd.xlane.f32.xlu1 %v1609_v51 }
 0x8df   :  { %1604 = vadd.xlane.f32.xlu1 %v1603_v63 }
 0x8f0   :  { %1632 = vrot.lane.b32.xlu1 %v8930_v27, %s8773_s29 }
 0x8f4   :  { %2207 = vrot.lane.b32.xlu1 %v8936_v34, %s8774_s30 }
 0x8f8   :  { %2203 = vrot.lane.b32.xlu1 %v8950_v44, %s8774_s30 }
 0x8fa   :  { %v9413_v1 = vpop.xlane.xlu0 %1595 }
 0x8fc   :  { %2197 = vrot.lane.b32.xlu1 %v8960_v54, %s8774_s30 }
 0x8fe   :  { %v1590_v35 = vpop.xlane.xlu0 %1589  ;;  %v1599_v43 = vpop.xlane.xlu1 %1598 }
 0x8ff   :  { %8322 = vrcp.f32 %v1590_v35 }
 0x900   :  { %2201 = vrot.lane.b32.xlu1 %v8966_v57, %s8774_s30 }
 0x906   :  { %v9423_v37 = vpop.xlane.xlu0 %1607 }
 0x90a   :  { %v9427_v14 = vpop.xlane.xlu0 %1601 }
 0x90e   :  { %v1639_v5 = vpop.permute.xlu0 %1638 }
 0x90f   :  { %7511 = vmatprep.subr.bf16.mxu1 %v1639_v5 }
 0x912   :  { %v2210_v7 = vpop.permute.xlu0 %2209  ;;  %v7479_v10 = vpop.f32.mrf.mxu1 }
 0x913   :  { %8111 = vmatprep.subr.msk.bf16.mxu0 %vm317_vm3, %v2210_v7  ;;  %v2233_v11 = vsel %vm317_vm3, %v2210_v7, 0 }
 0x914   :  { %v1310_v13 = vpop.f32.mrf.mxu1  ;;  %7580 = vmatpush3.bf16.xpose.msra.mxu0 %v2233_v11  ;;  %v8323_v11 = vpop.eup %8322 }
 0x916   :  { %v9435_v15 = vpop.permute.xlu0 %2205  ;;  %v7480_v40 = vpop.f32.mrf.mxu1 }
 0x917   :  { %v1342_v60 = vpack.c.bf16 %v7480_v40, %v7479_v10 }
 0x918   :  { %v1313_v17 = vpop.f32.mrf.mxu1 }
 0x919   :  { %v1341_v18 = vpack.c.bf16 %v1313_v17, %v1310_v13 }
 0x91a   :  { %v2196_v8 = vpop.permute.xlu0 %2195 }
 0x91b   :  { %7487 = vmatprep.mubr.msk.bf16.mxu1 %vm317_vm3, %v1341_v18  ;;  %7587 = vmatprep.mubr.msk.bf16.mxu0 %vm317_vm3, %v2196_v8 }
 0x91c   :  { %7488 = vmatmul.mubr.msk.bf16.vlgmr.msra.gmra.mxu1 %vm317_vm3, %v1342_v60  ;;  %v1620_v60 = vmul.f32 %v8323_v11, %v9350_v19  ;;  %v2227_v11 = vsel %vm317_vm3, %v9435_v15, 0 }
 0x91d   :  { %7512 = vmatpush3.bf16.msra.mxu1 %v1639_v5  ;;  %v7483_v12 = vpop.f32.mrf.mxu1 }
 0x91f   :  { %v1326_v30 = vpop.f32.mrf.mxu1 }
 0x921   :  { %v7484_v33 = vpop.f32.mrf.mxu1 }
 0x922   :  { %v1344_v56 = vpack.c.bf16 %v7484_v33, %v7483_v12 }
 0x923   :  { %v1329_v36 = vpop.f32.mrf.mxu1 }
 0x924   :  { %v1343_v39 = vpack.c.bf16 %v1329_v36, %v1326_v30 }
 0x926   :  { %7491 = vmatprep.mubr.msk.bf16.mxu1 %vm317_vm3, %v1343_v39 }
 0x927   :  { %7492 = vmatmul.mubr.msk.bf16.gmra.mxu1 %vm317_vm3, %v1344_v56 }
 0x92a   :  { %v9442_v59 = vpop.f32.mrf.mxu0 }
 0x92b   :  { %v1593_v62 = vpop.xlane.xlu1 %1592  ;;  %v1926_v48 = vsel %vm407_vm4, %v9442_v59, -inf }
 0x92c   :  { %8324 = vrcp.f32 %v1593_v62  ;;  %v9444_v58 = vpop.f32.mrf.mxu0 }
 0x92d   :  { %v1920_v9 = vsel %vm407_vm4, %v9444_v58, -inf  ;;  %8326 = vrcp.f32 %v1599_v43 }
 0x92e   :  { %1921 = vmax.xlane.f32.xlu0 %v1920_v9  ;;  %v9448_v42 = vpop.f32.mrf.mxu0  ;;  %8328 = vrcp.f32 %v9413_v1 }
 0x92f   :  { %v1637_v6 = vpop.permute.xlu1 %1636  ;;  %v1929_v7 = vsel %vm407_vm4, %v9448_v42, -inf }
 0x930   :  { %7513 = vmatprep.subr.bf16.mxu1 %v1637_v6  ;;  %v9450_v45 = vpop.f32.mrf.mxu0 }
 0x931   :  { %7514 = vmatpush3.bf16.msra.mxu1 %v1637_v6  ;;  %v1923_v51 = vsel %vm407_vm4, %v9450_v45, -inf }
 0x932   :  { %1927 = vmax.xlane.f32.xlu0 %v1926_v48  ;;  %v9456_v63 = vpop.f32.mrf.mxu0  ;;  %1924 = vmax.xlane.f32.xlu1 %v1923_v51 }
 0x933   :  { %v1635_v35 = vpop.permute.xlu1 %1634  ;;  %v1938_v30 = vsel %vm407_vm4, %v9456_v63, -inf }
 0x934   :  { %7515 = vmatprep.subr.bf16.mxu1 %v1635_v35  ;;  %v9458_v5 = vpop.f32.mrf.mxu0 }
 0x935   :  { %7516 = vmatpush3.bf16.msra.mxu1 %v1635_v35  ;;  %v1932_v17 = vsel %vm407_vm4, %v9458_v5, -inf }
 0x936   :  { %1930 = vmax.xlane.f32.xlu0 %v1929_v7  ;;  %v9462_v10 = vpop.f32.mrf.mxu0 }
 0x937   :  { %v1941_v33 = vsel %vm407_vm4, %v9462_v10, -inf }
 0x938   :  { %v9464_v13 = vpop.f32.mrf.mxu0 }
 0x939   :  { %v8325_v40 = vpop.eup %8324  ;;  %v1935_v18 = vsel %vm407_vm4, %v9464_v13, -inf }
 0x93a   :  { %1933 = vmax.xlane.f32.xlu0 %v1932_v17  ;;  %1936 = vmax.xlane.f32.xlu1 %v1935_v18  ;;  %v1621_v8 = vmul.f32 %v8325_v40, %v9379_v61  ;;  %v8327_v19 = vpop.eup %8326 }
 0x93b   :  { %v8329_v39 = vpop.eup %8328  ;;  %v1623_v56 = vmul.f32 %v8327_v19, %v9353_v47 }
 0x93c   :  { %v1628_v12 = vpack.c.bf16 %v1621_v8, %v1620_v60  ;;  %v1622_v9 = vmul.f32 %v8329_v39, %v9346_v55  ;;  %v6799_v60 = vld [vmem:[%s11185_s6 + $0x6] sm:$0x3] }
 0x93d   :  { %v1740_v8 = vsel %vm906_vm5, %v6799_v60, 0 }
 0x93e   :  { %1939 = vmax.xlane.f32.xlu0 %v1938_v30  ;;  %1942 = vmax.xlane.f32.xlu1 %v1941_v33  ;;  %v1629_v43 = vpack.c.bf16 %v1623_v56, %v1622_v9 }
 0x93f   :  { %7519 = vmatprep.mubr.msk.bf16.mxu1 %vm407_vm4, %v1628_v12 }
 0x964   :  { %v1611_v36 = vpop.xlane.xlu1 %1610 }
 0x965   :  { %8330 = vrcp.f32 %v1611_v36 }
 0x966   :  { %8332 = vrcp.f32 %v9427_v14 }
 0x967   :  { %8334 = vrcp.f32 %v9423_v37 }
 0x968   :  { %v1605_v61 = vpop.xlane.xlu1 %1604 }
 0x969   :  { %8336 = vrcp.f32 %v1605_v61 }
 0x96c   :  { %v1633_v62 = vpop.permute.xlu1 %1632 }
 0x96d   :  { %7517 = vmatprep.subr.bf16.mxu1 %v1633_v62 }
 0x96e   :  { %7518 = vmatpush3.bf16.msra.mxu1 %v1633_v62 }
 0x96f   :  { %8105 = vmatprep.subr.msk.bf16.mxu1 %vm906_vm5, %v6799_v60 }
 0x970   :  { %v2208_v6 = vpop.permute.xlu1 %2207 }
 0x971   :  { %7520 = vmatmul.mubr.msk.bf16.vlgmr.msra.gmra.mxu1 %vm407_vm4, %v1629_v43  ;;  %8112 = vmatprep.subr.msk.bf16.mxu0 %vm317_vm3, %v2208_v6  ;;  %v2230_v1 = vsel %vm317_vm3, %v2208_v6, 0 }
 0x972   :  { %7582 = vmatpush3.bf16.xpose.msra.mxu0 %v2230_v1  ;;  %v8331_v37 = vpop.eup %8330  ;;  %7528 = vmatpush3.bf16.msra.mxu1 %v1740_v8 }
 0x973   :  { %8113 = vmatprep.subr.msk.bf16.mxu0 %vm317_vm3, %v9435_v15  ;;  %v8333_v14 = vpop.eup %8332  ;;  %v1627_v55 = vmul.f32 %v8331_v37, %v9393_v50 }
 0x974   :  { %v8335_v47 = vpop.eup %8334  ;;  %v1624_v51 = vmul.f32 %v8333_v14, %v9363_v31  ;;  %v2204_v17 = vpop.permute.xlu1 %2203 }
 0x975   :  { %v1626_v7 = vmul.f32 %v8335_v47, %v9359_v29  ;;  %v2224_v50 = vsel %vm317_vm3, %v2204_v17, 0 }
 0x976   :  { %v8337_v48 = vpop.eup %8336 }
 0x977   :  { %v1625_v35 = vmul.f32 %v8337_v48, %v9397_v52  ;;  %v1631_v18 = vpack.c.bf16 %v1627_v55, %v1626_v7  ;;  %v2200_v52 = vpop.permute.xlu0 %2199 }
 0x978   :  { %v2198_v31 = vpop.permute.xlu1 %2197 }
 0x979   :  { %v1630_v40 = vpack.c.bf16 %v1625_v35, %v1624_v51 }
 0x97a   :  { %7584 = vmatpush3.bf16.xpose.msra.mxu0 %v2227_v11 }
 0x97b   :  { %7523 = vmatprep.mubr.msk.bf16.mxu1 %vm407_vm4, %v1630_v40  ;;  %8114 = vmatprep.subr.msk.bf16.mxu0 %vm317_vm3, %v2204_v17  ;;  %v1033_v40 = vadd.f32 %v9403_v49, %v9202_v20 }
 0x97c   :  { %7524 = vmatmul.mubr.msk.bf16.gmra.mxu1 %vm407_vm4, %v1631_v18  ;;  %v2202_v29 = vpop.permute.xlu1 %2201  ;;  %v1025_v18 = vadd.f32 %v9407_v46, %v9204_v21  ;;  %v1049_v21 = vadd.f32 %v9421_v16, %v9210_v24  ;;  %v1041_v46 = vadd.f32 %v9425_v3, %v9212_v25 }
 0x982   :  { %7586 = vmatpush3.bf16.xpose.msra.mxu0 %v2224_v50 }
 0x989   :  { %7588 = vmatmul.mubr.msk.bf16.vlgmr.msra.gmra.mxu0 %vm317_vm3, %v2198_v31 }
 0x98a   :  { %7591 = vmatprep.mubr.msk.bf16.mxu0 %vm317_vm3, %v2200_v52 }
 0x991   :  { %7592 = vmatmul.mubr.msk.bf16.gmra.mxu0 %vm317_vm3, %v2202_v29  ;;  %v1036_v29 = vadd.f32 %v9411_v0, %v9206_v22  ;;  %v1052_v0 = vadd.f32 %v9429_v4, %v9214_v26 }
 0x9b7   :  { %v1922_v15 = vpop.xlane.xlu0 %1921 }
 0x9b8   :  { %v1944_v12 = vsub.f32 %v9444_v58, %v1922_v15 }
 0x9ba   :  { %v1952_v19 = vmul.f32 1.442695, %v1944_v12 }
 0x9bb   :  { %v1928_v30 = vpop.xlane.xlu0 %1927  ;;  %v1925_v33 = vpop.xlane.xlu1 %1924 }
 0x9bc   :  { %v1946_v36 = vsub.f32 %v9442_v59, %v1928_v30  ;;  %v1945_v39 = vsub.f32 %v9450_v45, %v1925_v33 }
 0x9be   :  { %v1956_v61 = vmul.f32 1.442695, %v1946_v36  ;;  %v1954_v9 = vmul.f32 1.442695, %v1945_v39 }
 0x9bf   :  { %v1931_v56 = vpop.xlane.xlu0 %1930 }
 0x9c0   :  { %8338 = vpow2.f32 %v1956_v61  ;;  %v1947_v62 = vsub.f32 %v9448_v42, %v1931_v56 }
 0x9c1   :  { %8340 = vpow2.f32 %v1952_v19 }
 0x9c2   :  { %v1958_v43 = vmul.f32 1.442695, %v1947_v62 }
 0x9c3   :  { %v1934_v6 = vpop.xlane.xlu0 %1933  ;;  %v1937_v24 = vpop.xlane.xlu1 %1936 }
 0x9c4   :  { %8342 = vpow2.f32 %v1958_v43  ;;  %v1948_v58 = vsub.f32 %v9458_v5, %v1934_v6  ;;  %v1949_v26 = vsub.f32 %v9464_v13, %v1937_v24 }
 0x9c5   :  { %8344 = vpow2.f32 %v1954_v9 }
 0x9c6   :  { %v1960_v59 = vmul.f32 1.442695, %v1948_v58  ;;  %v1962_v4 = vmul.f32 1.442695, %v1949_v26 }
 0x9c7   :  { %v1940_v1 = vpop.xlane.xlu0 %1939  ;;  %v1943_v25 = vpop.xlane.xlu1 %1942 }
 0x9c8   :  { %v1950_v37 = vsub.f32 %v9456_v63, %v1940_v1  ;;  %v1951_v16 = vsub.f32 %v9462_v10, %v1943_v25 }
 0x9ca   :  { %v1964_v14 = vmul.f32 1.442695, %v1950_v37  ;;  %v1966_v3 = vmul.f32 1.442695, %v1951_v16 }
 0x9cc   :  { %8346 = vpow2.f32 %v1964_v14 }
 0x9cd   :  { %v9511_v47 = vpop.eup %8338  ;;  %8348 = vpow2.f32 %v1960_v59 }
 0x9ce   :  { %v1974_v42 = vsel %vm407_vm4, %v9511_v47, 0.0  ;;  %v9515_v45 = vpop.eup %8340  ;;  %8350 = vpow2.f32 %v1966_v3 }
 0x9cf   :  { %1975 = vadd.xlane.f32.xlu0 %v1974_v42  ;;  %v1968_v5 = vsel %vm407_vm4, %v9515_v45, 0.0  ;;  %8352 = vpow2.f32 %v1962_v4 }
 0x9d1   :  { %v9517_v48 = vpop.eup %8342 }
 0x9d2   :  { %v1977_v63 = vsel %vm407_vm4, %v9517_v48, 0.0  ;;  %v9523_v55 = vpop.eup %8344 }
 0x9d3   :  { %1969 = vadd.xlane.f32.xlu0 %v1968_v5  ;;  %1978 = vadd.xlane.f32.xlu1 %v1977_v63  ;;  %v1971_v51 = vsel %vm407_vm4, %v9523_v55, 0.0 }
 0x9d7   :  { %1972 = vadd.xlane.f32.xlu1 %v1971_v51 }
 0x9d9   :  { %v9527_v35 = vpop.eup %8346 }
 0x9da   :  { %v1986_v7 = vsel %vm407_vm4, %v9527_v35, 0.0  ;;  %v9531_v11 = vpop.eup %8348 }
 0x9db   :  { %1987 = vadd.xlane.f32.xlu0 %v1986_v7  ;;  %v1980_v52 = vsel %vm407_vm4, %v9531_v11, 0.0  ;;  %v9577_v10 = vpop.eup %8350 }
 0x9dc   :  { %v7489_v17 = vpop.f32.mrf.mxu1  ;;  %v1989_v19 = vsel %vm407_vm4, %v9577_v10, 0.0  ;;  %v9581_v61 = vpop.eup %8352 }
 0x9dd   :  { %v9537_v50 = vadd.f32 %v7489_v17, %v1033_v40  ;;  %v1983_v13 = vsel %vm407_vm4, %v9581_v61, 0.0 }
 0x9de   :  { %v1396_v31 = vpop.f32.mrf.mxu1 }
 0x9df   :  { %v9543_v15 = vadd.f32 %v1396_v31, %v1025_v18  ;;  %1981 = vadd.xlane.f32.xlu0 %v1980_v52 }
 0x9e0   :  { %v7490_v60 = vpop.f32.mrf.mxu1 }
 0x9e1   :  { %v9545_v8 = vadd.f32 %v7490_v60, %v1036_v29 }
 0x9e2   :  { %v9547_v20 = vpop.f32.mrf.mxu1 }
 0x9e7   :  { %v7493_v49 = vpop.f32.mrf.mxu1 }
 0x9e8   :  { %v9553_v12 = vadd.f32 %v7493_v49, %v1049_v21  ;;  %2016 = vrot.lane.b32.xlu1 %v8958_v53, %s8775_s19 }
 0x9e9   :  { %v1412_v22 = vpop.f32.mrf.mxu1 }
 0x9ea   :  { %v9559_v30 = vadd.f32 %v1412_v22, %v1041_v46 }
 0x9eb   :  { %v7494_v33 = vpop.f32.mrf.mxu1 }
 0x9ec   :  { %v9561_v36 = vadd.f32 %v7494_v33, %v1052_v0  ;;  %2014 = vrot.lane.b32.xlu1 %v8960_v54, %s8775_s19 }
 0x9ed   :  { %v9591_v39 = vpop.f32.mrf.mxu1 }
 0x9f5   :  { %2018 = vrot.lane.b32.xlu0 %v8966_v57, %s8775_s19 }
 0x9f9   :  { %2589 = vrot.lane.b32.xlu0 %v8934_v32, %s8776_s1 }
 0x9fd   :  { %2585 = vrot.lane.b32.xlu0 %v8944_v38, %s8776_s1 }
 0xa01   :  { %2575 = vrot.lane.b32.xlu0 %v8930_v27, %s8776_s1 }
 0xa05   :  { %2579 = vrot.lane.b32.xlu0 %v8958_v53, %s8776_s1 }
 0xa10   :  { %1990 = vadd.xlane.f32.xlu1 %v1989_v19 }
 0xa14   :  { %1984 = vadd.xlane.f32.xlu1 %v1983_v13 }
 0xa25   :  { %2012 = vrot.lane.b32.xlu1 %v8930_v27, %s8775_s19 }
 0xa29   :  { %2587 = vrot.lane.b32.xlu1 %v8936_v34, %s8776_s1 }
 0xa2d   :  { %2583 = vrot.lane.b32.xlu1 %v8950_v44, %s8776_s1 }
 0xa31   :  { %v7521_v56 = vpop.f32.mrf.mxu1  ;;  %2577 = vrot.lane.b32.xlu1 %v8960_v54, %s8776_s1 }
 0xa33   :  { %v1690_v62 = vpop.f32.mrf.mxu1 }
 0xa35   :  { %v7522_v9 = vpop.f32.mrf.mxu1  ;;  %2581 = vrot.lane.b32.xlu1 %v8966_v57, %s8776_s1 }
 0xa36   :  { %v1722_v58 = vpack.c.bf16 %v7522_v9, %v7521_v56 }
 0xa37   :  { %v1693_v43 = vpop.f32.mrf.mxu1 }
 0xa38   :  { %v1721_v6 = vpack.c.bf16 %v1693_v43, %v1690_v62 }
 0xa3a   :  { %7529 = vmatprep.mubr.msk.bf16.mxu1 %vm317_vm3, %v1721_v6 }
 0xa3b   :  { %7530 = vmatmul.mubr.msk.bf16.vlgmr.msra.gmra.mxu1 %vm317_vm3, %v1722_v58 }
 0xa3c   :  { %v7525_v1 = vpop.f32.mrf.mxu1 }
 0xa3e   :  { %v1706_v37 = vpop.f32.mrf.mxu1 }
 0xa40   :  { %v7526_v59 = vpop.f32.mrf.mxu1 }
 0xa41   :  { %v1724_v5 = vpack.c.bf16 %v7526_v59, %v7525_v1 }
 0xa42   :  { %v1709_v14 = vpop.f32.mrf.mxu1 }
 0xa43   :  { %v1723_v42 = vpack.c.bf16 %v1709_v14, %v1706_v37 }
 0xa45   :  { %7533 = vmatprep.mubr.msk.bf16.mxu1 %vm317_vm3, %v1723_v42 }
 0xa46   :  { %7534 = vmatmul.mubr.msk.bf16.gmra.mxu1 %vm317_vm3, %v1724_v5 }
 0xa49   :  { %v9601_v63 = vpop.f32.mrf.mxu0 }
 0xa4a   :  { %v2306_v18 = vsel %vm407_vm4, %v9601_v63, -inf }
 0xa4b   :  { %v9603_v51 = vpop.f32.mrf.mxu0 }
 0xa4c   :  { %v2300_v7 = vsel %vm407_vm4, %v9603_v51, -inf }
 0xa4d   :  { %2301 = vmax.xlane.f32.xlu0 %v2300_v7  ;;  %v9607_v40 = vpop.f32.mrf.mxu0 }
 0xa4e   :  { %v2309_v29 = vsel %vm407_vm4, %v9607_v40, -inf }
 0xa4f   :  { %v9609_v17 = vpop.f32.mrf.mxu0 }
 0xa50   :  { %v2303_v46 = vsel %vm407_vm4, %v9609_v17, -inf }
 0xa51   :  { %2307 = vmax.xlane.f32.xlu0 %v2306_v18  ;;  %v9613_v31 = vpop.f32.mrf.mxu0 }
 0xa52   :  { %v2318_v24 = vsel %vm407_vm4, %v9613_v31, -inf }
 0xa53   :  { %v9615_v52 = vpop.f32.mrf.mxu0 }
 0xa54   :  { %v2312_v49 = vsel %vm407_vm4, %v9615_v52, -inf }
 0xa55   :  { %2310 = vmax.xlane.f32.xlu0 %v2309_v29  ;;  %v9619_v60 = vpop.f32.mrf.mxu0 }
 0xa56   :  { %v2321_v26 = vsel %vm407_vm4, %v9619_v60, -inf }
 0xa57   :  { %v9625_v22 = vpop.f32.mrf.mxu0 }
 0xa58   :  { %v1976_v21 = vpop.xlane.xlu0 %1975  ;;  %v2315_v25 = vsel %vm407_vm4, %v9625_v22, -inf }
 0xa59   :  { %2313 = vmax.xlane.f32.xlu0 %v2312_v49  ;;  %2304 = vmax.xlane.f32.xlu1 %v2303_v46 }
 0xa5c   :  { %v1970_v0 = vpop.xlane.xlu0 %1969  ;;  %v1979_v33 = vpop.xlane.xlu1 %1978 }
 0xa5d   :  { %2319 = vmax.xlane.f32.xlu0 %v2318_v24  ;;  %2316 = vmax.xlane.f32.xlu1 %v2315_v25  ;;  %8354 = vrcp.f32 %v1970_v0 }
 0xa60   :  { %v1973_v16 = vpop.xlane.xlu1 %1972 }
 0xa61   :  { %8356 = vrcp.f32 %v1973_v16  ;;  %2322 = vmax.xlane.f32.xlu1 %v2321_v26 }
 0xa62   :  { %8358 = vrcp.f32 %v1979_v33 }
 0xa63   :  { %8360 = vrcp.f32 %v1976_v21 }
 0xa64   :  { %v1988_v3 = vpop.xlane.xlu0 %1987  ;;  %v2017_v13 = vpop.permute.xlu1 %2016 }
 0xa68   :  { %v1982_v4 = vpop.xlane.xlu0 %1981  ;;  %v2015_v37 = vpop.permute.xlu1 %2014 }
 0xa6a   :  { %v8355_v19 = vpop.eup %8354 }
 0xa6b   :  { %v2000_v9 = vmul.f32 %v8355_v19, %v9515_v45 }
 0xa6c   :  { %v2019_v56 = vpop.permute.xlu0 %2018 }
 0xa6d   :  { %7553 = vmatprep.subr.bf16.mxu1 %v2019_v56 }
 0xa6e   :  { %v8357_v62 = vpop.eup %8356  ;;  %7554 = vmatpush3.bf16.msra.mxu1 %v2019_v56 }
 0xa6f   :  { %7555 = vmatprep.subr.bf16.mxu1 %v2017_v13  ;;  %v2001_v43 = vmul.f32 %v8357_v62, %v9523_v55  ;;  %v8359_v55 = vpop.eup %8358 }
 0xa70   :  { %v2590_v6 = vpop.permute.xlu0 %2589  ;;  %v8361_v5 = vpop.eup %8360  ;;  %v2003_v7 = vmul.f32 %v8359_v55, %v9517_v48 }
 0xa71   :  { %8116 = vmatprep.subr.msk.bf16.mxu0 %vm317_vm3, %v2590_v6  ;;  %v2613_v58 = vsel %vm317_vm3, %v2590_v6, 0  ;;  %v2008_v1 = vpack.c.bf16 %v2001_v43, %v2000_v9  ;;  %v2002_v29 = vmul.f32 %v8361_v5, %v9511_v47 }
 0xa72   :  { %7556 = vmatpush3.bf16.msra.mxu1 %v2017_v13  ;;  %7622 = vmatpush3.bf16.xpose.msra.mxu0 %v2613_v58 }
 0xa73   :  { %7557 = vmatprep.subr.bf16.mxu1 %v2015_v37  ;;  %7561 = vmatprep.mubr.msk.bf16.mxu1 %vm407_vm4, %v2008_v1  ;;  %v2009_v49 = vpack.c.bf16 %v2003_v7, %v2002_v29 }
 0xa74   :  { %v2586_v59 = vpop.permute.xlu0 %2585 }
 0xa76   :  { %7558 = vmatpush3.bf16.msra.mxu1 %v2015_v37 }
 0xa78   :  { %v2576_v14 = vpop.permute.xlu0 %2575 }
 0xa79   :  { %7629 = vmatprep.mubr.msk.bf16.mxu0 %vm317_vm3, %v2576_v14 }
 0xa7c   :  { %v2580_v56 = vpop.permute.xlu0 %2579 }
 0xa99   :  { %v1991_v45 = vpop.xlane.xlu1 %1990 }
 0xa9a   :  { %8362 = vrcp.f32 %v1991_v45 }
 0xa9b   :  { %8364 = vrcp.f32 %v1982_v4 }
 0xa9c   :  { %8366 = vrcp.f32 %v1988_v3  ;;  %v2607_v3 = vsel %vm317_vm3, %v2586_v59, 0 }
 0xa9d   :  { %v1985_v42 = vpop.xlane.xlu1 %1984 }
 0xa9e   :  { %8368 = vrcp.f32 %v1985_v42 }
 0xaa1   :  { %v2013_v18 = vpop.permute.xlu1 %2012 }
 0xaa2   :  { %7559 = vmatprep.subr.bf16.mxu1 %v2013_v18 }
 0xaa3   :  { %7560 = vmatpush3.bf16.msra.mxu1 %v2013_v18 }
 0xaa5   :  { %v2588_v46 = vpop.permute.xlu1 %2587 }
 0xaa6   :  { %7562 = vmatmul.mubr.msk.bf16.vlgmr.msra.gmra.mxu1 %vm407_vm4, %v2009_v49  ;;  %8117 = vmatprep.subr.msk.bf16.mxu0 %vm317_vm3, %v2588_v46  ;;  %v2610_v21 = vsel %vm317_vm3, %v2588_v46, 0 }
 0xaa7   :  { %7624 = vmatpush3.bf16.xpose.msra.mxu0 %v2610_v21  ;;  %v8363_v0 = vpop.eup %8362 }
 0xaa8   :  { %8118 = vmatprep.subr.msk.bf16.mxu0 %vm317_vm3, %v2586_v59  ;;  %v8365_v33 = vpop.eup %8364  ;;  %v2007_v25 = vmul.f32 %v8363_v0, %v9577_v10 }
 0xaa9   :  { %v8367_v24 = vpop.eup %8366  ;;  %v2004_v47 = vmul.f32 %v8365_v33, %v9531_v11  ;;  %v2584_v19 = vpop.permute.xlu1 %2583 }
 0xaaa   :  { %v2006_v26 = vmul.f32 %v8367_v24, %v9527_v35  ;;  %v2604_v10 = vsel %vm317_vm3, %v2584_v19, 0 }
 0xaab   :  { %v8369_v48 = vpop.eup %8368 }
 0xaac   :  { %v2005_v16 = vmul.f32 %v8369_v48, %v9581_v61  ;;  %v2011_v13 = vpack.c.bf16 %v2007_v25, %v2006_v26 }
 0xaad   :  { %v2578_v11 = vpop.permute.xlu1 %2577 }
 0xaae   :  { %v2010_v4 = vpack.c.bf16 %v2005_v16, %v2004_v47 }
 0xaaf   :  { %7626 = vmatpush3.bf16.xpose.msra.mxu0 %v2607_v3 }
 0xab0   :  { %7565 = vmatprep.mubr.msk.bf16.mxu1 %vm407_vm4, %v2010_v4  ;;  %8119 = vmatprep.subr.msk.bf16.mxu0 %vm317_vm3, %v2584_v19 }
 0xab1   :  { %7566 = vmatmul.mubr.msk.bf16.gmra.mxu1 %vm407_vm4, %v2011_v13  ;;  %v2582_v35 = vpop.permute.xlu1 %2581 }
 0xab7   :  { %7628 = vmatpush3.bf16.xpose.msra.mxu0 %v2604_v10 }
 0xabe   :  { %7630 = vmatmul.mubr.msk.bf16.vlgmr.msra.gmra.mxu0 %vm317_vm3, %v2578_v11 }
 0xabf   :  { %7633 = vmatprep.mubr.msk.bf16.mxu0 %vm317_vm3, %v2580_v56 }
 0xac6   :  { %7634 = vmatmul.mubr.msk.bf16.gmra.mxu0 %vm317_vm3, %v2582_v35 }
 0xad6   :  { %v2302_v61 = vpop.xlane.xlu0 %2301 }
 0xad7   :  { %v2324_v62 = vsub.f32 %v9603_v51, %v2302_v61 }
 0xad9   :  { %v2332_v6 = vmul.f32 1.442695, %v2324_v62 }
 0xada   :  { %v2308_v9 = vpop.xlane.xlu0 %2307 }
 0xadb   :  { %v2326_v43 = vsub.f32 %v9601_v63, %v2308_v9 }
 0xadd   :  { %v2336_v58 = vmul.f32 1.442695, %v2326_v43 }
 0xade   :  { %v2311_v1 = vpop.xlane.xlu0 %2310 }
 0xadf   :  { %8370 = vpow2.f32 %v2336_v58  ;;  %v2327_v37 = vsub.f32 %v9607_v40, %v2311_v1  ;;  %v6812_v40 = vld [vmem:[%s11185_s6 + $0x8] sm:$0x3] }
 0xae0   :  { %8372 = vpow2.f32 %v2332_v6  ;;  %8110 = vmatprep.subr.msk.bf16.mxu1 %vm906_vm5, %v6812_v40 }
 0xae1   :  { %v2338_v59 = vmul.f32 1.442695, %v2327_v37 }
 0xae2   :  { %v2314_v14 = vpop.xlane.xlu0 %2313  ;;  %v2305_v45 = vpop.xlane.xlu1 %2304 }
 0xae3   :  { %8374 = vpow2.f32 %v2338_v59  ;;  %v2325_v55 = vsub.f32 %v9609_v17, %v2305_v45  ;;  %v2328_v42 = vsub.f32 %v9615_v52, %v2314_v14  ;;  %v2120_v52 = vsel %vm906_vm5, %v6812_v40, 0 }
 0xae4   :  { %7570 = vmatpush3.bf16.msra.mxu1 %v2120_v52 }
 0xae5   :  { %v2334_v5 = vmul.f32 1.442695, %v2325_v55  ;;  %v2340_v63 = vmul.f32 1.442695, %v2328_v42 }
 0xae6   :  { %v2320_v51 = vpop.xlane.xlu0 %2319 }
 0xae7   :  { %v2330_v7 = vsub.f32 %v9613_v31, %v2320_v51  ;;  %8376 = vpow2.f32 %v2334_v5 }
 0xae9   :  { %v2344_v18 = vmul.f32 1.442695, %v2330_v7 }
 0xaeb   :  { %8378 = vpow2.f32 %v2344_v18 }
 0xaec   :  { %v9663_v29 = vpop.eup %8370  ;;  %8380 = vpow2.f32 %v2340_v63 }
 0xaed   :  { %v2354_v17 = vsel %vm407_vm4, %v9663_v29, 0.0  ;;  %v9672_v49 = vpop.eup %8372 }
 0xaee   :  { %2355 = vadd.xlane.f32.xlu0 %v2354_v17  ;;  %v2348_v46 = vsel %vm407_vm4, %v9672_v49, 0.0 }
 0xaf0   :  { %v9674_v31 = vpop.eup %8374 }
 0xaf1   :  { %v2357_v21 = vsel %vm407_vm4, %v9674_v31, 0.0 }
 0xaf2   :  { %2349 = vadd.xlane.f32.xlu0 %v2348_v46  ;;  %2358 = vadd.xlane.f32.xlu1 %v2357_v21 }
 0xaf4   :  { %v9680_v0 = vpop.eup %8376 }
 0xaf5   :  { %v2351_v33 = vsel %vm407_vm4, %v9680_v0, 0.0 }
 0xaf6   :  { %2352 = vadd.xlane.f32.xlu1 %v2351_v33 }
 0xaf8   :  { %v9684_v24 = vpop.eup %8378 }
 0xaf9   :  { %v2366_v48 = vsel %vm407_vm4, %v9684_v24, 0.0  ;;  %v9688_v25 = vpop.eup %8380 }
 0xafa   :  { %2367 = vadd.xlane.f32.xlu0 %v2366_v48  ;;  %v2360_v3 = vsel %vm407_vm4, %v9688_v25, 0.0 }
 0xafb   :  { %v7531_v47 = vpop.f32.mrf.mxu1 }
 0xafc   :  { %v9691_v16 = vadd.f32 %v7531_v47, %v9537_v50 }
 0xafd   :  { %v1776_v26 = vpop.f32.mrf.mxu1 }
 0xafe   :  { %v9696_v4 = vadd.f32 %v1776_v26, %v9543_v15  ;;  %2361 = vadd.xlane.f32.xlu0 %v2360_v3 }
 0xaff   :  { %v7532_v19 = vpop.f32.mrf.mxu1 }
 0xb00   :  { %v9699_v13 = vadd.f32 %v7532_v19, %v9545_v8  ;;  %v2317_v8 = vpop.xlane.xlu1 %2316 }
 0xb01   :  { %v9701_v10 = vpop.f32.mrf.mxu1 }
 0xb04   :  { %v2323_v62 = vpop.xlane.xlu1 %2322 }
 0xb06   :  { %v7535_v11 = vpop.f32.mrf.mxu1 }
 0xb07   :  { %v9704_v56 = vadd.f32 %v7535_v11, %v9553_v12  ;;  %2396 = vrot.lane.b32.xlu1 %v8958_v53, %s8777_s24  ;;  %v2331_v12 = vsub.f32 %v9619_v60, %v2323_v62 }
 0xb08   :  { %v1792_v50 = vpop.f32.mrf.mxu1 }
 0xb09   :  { %v9709_v35 = vadd.f32 %v1792_v50, %v9559_v30  ;;  %v2329_v30 = vsub.f32 %v9625_v22, %v2317_v8  ;;  %v2346_v9 = vmul.f32 1.442695, %v2331_v12 }
 0xb0a   :  { %v7536_v15 = vpop.f32.mrf.mxu1 }
 0xb0b   :  { %v9712_v61 = vadd.f32 %v7536_v15, %v9561_v36  ;;  %2394 = vrot.lane.b32.xlu1 %v8960_v54, %s8777_s24  ;;  %v2342_v36 = vmul.f32 1.442695, %v2329_v30  ;;  %8382 = vpow2.f32 %v2346_v9 }
 0xb0c   :  { %v9746_v58 = vpop.f32.mrf.mxu1 }
 0xb0d   :  { %8384 = vpow2.f32 %v2342_v36 }
 0xb14   :  { %2398 = vrot.lane.b32.xlu0 %v8966_v57, %s8777_s24 }
 0xb18   :  { %2969 = vrot.lane.b32.xlu0 %v8934_v32, %s11201_s25  ;;  %v9728_v60 = vpop.eup %8382 }
 0xb19   :  { %v2369_v43 = vsel %vm407_vm4, %v9728_v60, 0.0 }
 0xb1a   :  { %v9732_v6 = vpop.eup %8384 }
 0xb1b   :  { %v2363_v22 = vsel %vm407_vm4, %v9732_v6, 0.0 }
 0xb1c   :  { %2965 = vrot.lane.b32.xlu0 %v8944_v38, %s11201_s25 }
 0xb20   :  { %2955 = vrot.lane.b32.xlu0 %v8930_v27, %s11201_s25 }
 0xb24   :  { %2959 = vrot.lane.b32.xlu0 %v8958_v53, %s11201_s25 }
 0xb2f   :  { %2370 = vadd.xlane.f32.xlu1 %v2369_v43 }
 0xb33   :  { %2364 = vadd.xlane.f32.xlu1 %v2363_v22 }
 0xb44   :  { %2392 = vrot.lane.b32.xlu1 %v8930_v27, %s8777_s24 }
 0xb48   :  { %2967 = vrot.lane.b32.xlu1 %v8936_v34, %s11201_s25 }
 0xb4c   :  { %2963 = vrot.lane.b32.xlu1 %v8950_v44, %s11201_s25 }
 0xb50   :  { %2957 = vrot.lane.b32.xlu1 %v8960_v54, %s11201_s25 }
 0xb54   :  { %2961 = vrot.lane.b32.xlu1 %v8966_v57, %s11201_s25 }
 0xb66   :  { %v7563_v1 = vpop.f32.mrf.mxu1 }
 0xb68   :  { %v2070_v37 = vpop.f32.mrf.mxu1 }
 0xb6a   :  { %v7564_v59 = vpop.f32.mrf.mxu1 }
 0xb6b   :  { %v2102_v55 = vpack.c.bf16 %v7564_v59, %v7563_v1 }
 0xb6c   :  { %v2073_v14 = vpop.f32.mrf.mxu1 }
 0xb6d   :  { %v2101_v45 = vpack.c.bf16 %v2073_v14, %v2070_v37 }
 0xb6f   :  { %7571 = vmatprep.mubr.msk.bf16.mxu1 %vm317_vm3, %v2101_v45 }
 0xb70   :  { %7572 = vmatmul.mubr.msk.bf16.vlgmr.msra.gmra.mxu1 %vm317_vm3, %v2102_v55 }
 0xb71   :  { %v7567_v42 = vpop.f32.mrf.mxu1 }
 0xb73   :  { %v2086_v5 = vpop.f32.mrf.mxu1 }
 0xb75   :  { %v7568_v51 = vpop.f32.mrf.mxu1 }
 0xb76   :  { %v2104_v40 = vpack.c.bf16 %v7568_v51, %v7567_v42 }
 0xb77   :  { %v2356_v7 = vpop.xlane.xlu0 %2355  ;;  %v2089_v63 = vpop.f32.mrf.mxu1 }
 0xb78   :  { %v2103_v18 = vpack.c.bf16 %v2089_v63, %v2086_v5 }
 0xb7a   :  { %7575 = vmatprep.mubr.msk.bf16.mxu1 %vm317_vm3, %v2103_v18 }
 0xb7b   :  { %7576 = vmatmul.mubr.msk.bf16.gmra.mxu1 %vm317_vm3, %v2104_v40  ;;  %v2359_v17 = vpop.xlane.xlu1 %2358  ;;  %v2350_v52 = vpop.xlane.xlu0 %2349 }
 0xb7c   :  { %8386 = vrcp.f32 %v2350_v52 }
 0xb7e   :  { %v9752_v46 = vpop.f32.mrf.mxu0 }
 0xb7f   :  { %v2353_v21 = vpop.xlane.xlu1 %2352  ;;  %v2686_v19 = vsel %vm407_vm4, %v9752_v46, -inf }
 0xb80   :  { %v9754_v33 = vpop.f32.mrf.mxu0  ;;  %8388 = vrcp.f32 %v2353_v21 }
 0xb81   :  { %v2680_v48 = vsel %vm407_vm4, %v9754_v33, -inf  ;;  %8390 = vrcp.f32 %v2359_v17 }
 0xb82   :  { %2681 = vmax.xlane.f32.xlu0 %v2680_v48  ;;  %v9758_v47 = vpop.f32.mrf.mxu0  ;;  %8392 = vrcp.f32 %v2356_v7 }
 0xb83   :  { %v2368_v26 = vpop.xlane.xlu0 %2367  ;;  %v2689_v62 = vsel %vm407_vm4, %v9758_v47, -inf  ;;  %v2397_v36 = vpop.permute.xlu1 %2396 }
 0xb84   :  { %v9760_v3 = vpop.f32.mrf.mxu0 }
 0xb85   :  { %v2683_v11 = vsel %vm407_vm4, %v9760_v3, -inf }
 0xb86   :  { %2687 = vmax.xlane.f32.xlu0 %v2686_v19  ;;  %v9766_v50 = vpop.f32.mrf.mxu0  ;;  %2684 = vmax.xlane.f32.xlu1 %v2683_v11 }
 0xb87   :  { %v2362_v15 = vpop.xlane.xlu0 %2361  ;;  %v2698_v42 = vsel %vm407_vm4, %v9766_v50, -inf  ;;  %v2395_v63 = vpop.permute.xlu1 %2394 }
 0xb88   :  { %v9768_v8 = vpop.f32.mrf.mxu0 }
 0xb89   :  { %v8387_v9 = vpop.eup %8386  ;;  %v2692_v22 = vsel %vm407_vm4, %v9768_v8, -inf }
 0xb8a   :  { %2690 = vmax.xlane.f32.xlu0 %v2689_v62  ;;  %v9772_v12 = vpop.f32.mrf.mxu0  ;;  %v2380_v14 = vmul.f32 %v8387_v9, %v9672_v49 }
 0xb8b   :  { %v2399_v30 = vpop.permute.xlu0 %2398  ;;  %v2701_v5 = vsel %vm407_vm4, %v9772_v12, -inf }
 0xb8c   :  { %7595 = vmatprep.subr.bf16.mxu1 %v2399_v30  ;;  %v9774_v43 = vpop.f32.mrf.mxu0 }
 0xb8d   :  { %7596 = vmatpush3.bf16.msra.mxu1 %v2399_v30  ;;  %v2695_v1 = vsel %vm407_vm4, %v9774_v43, -inf  ;;  %v8389_v37 = vpop.eup %8388 }
 0xb8e   :  { %2693 = vmax.xlane.f32.xlu0 %v2692_v22  ;;  %2696 = vmax.xlane.f32.xlu1 %v2695_v1  ;;  %v2381_v45 = vmul.f32 %v8389_v37, %v9680_v0  ;;  %v8391_v40 = vpop.eup %8390 }
 0xb8f   :  { %7597 = vmatprep.subr.bf16.mxu1 %v2397_v36  ;;  %v2970_v59 = vpop.permute.xlu0 %2969  ;;  %v8393_v21 = vpop.eup %8392  ;;  %v2383_v48 = vmul.f32 %v8391_v40, %v9674_v31 }
 0xb90   :  { %8121 = vmatprep.subr.msk.bf16.mxu0 %vm317_vm3, %v2970_v59  ;;  %v2993_v55 = vsel %vm317_vm3, %v2970_v59, 0  ;;  %v2388_v51 = vpack.c.bf16 %v2381_v45, %v2380_v14  ;;  %v2382_v11 = vmul.f32 %v8393_v21, %v9663_v29 }
 0xb91   :  { %7598 = vmatpush3.bf16.msra.mxu1 %v2397_v36  ;;  %7664 = vmatpush3.bf16.xpose.msra.mxu0 %v2993_v55  ;;  %v6825_v55 = vld [vmem:[%s11185_s6 + $0xa] sm:$0x3] }
 0xb92   :  { %2699 = vmax.xlane.f32.xlu0 %v2698_v42  ;;  %2702 = vmax.xlane.f32.xlu1 %v2701_v5  ;;  %v2389_v62 = vpack.c.bf16 %v2383_v48, %v2382_v11  ;;  %v2500_v42 = vsel %vm906_vm5, %v6825_v55, 0 }
 0xb93   :  { %7599 = vmatprep.subr.bf16.mxu1 %v2395_v63  ;;  %7603 = vmatprep.mubr.msk.bf16.mxu1 %vm407_vm4, %v2388_v51  ;;  %v2966_v49 = vpop.permute.xlu0 %2965 }
 0xb94   :  { %v2987_v1 = vsel %vm317_vm3, %v2966_v49, 0 }
 0xb95   :  { %7600 = vmatpush3.bf16.msra.mxu1 %v2395_v63 }
 0xb97   :  { %v2956_v0 = vpop.permute.xlu0 %2955 }
 0xb98   :  { %7671 = vmatprep.mubr.msk.bf16.mxu0 %vm317_vm3, %v2956_v0 }
 0xb9b   :  { %v2960_v45 = vpop.permute.xlu0 %2959 }
 0xbb8   :  { %v2371_v18 = vpop.xlane.xlu1 %2370 }
 0xbb9   :  { %8394 = vrcp.f32 %v2371_v18 }
 0xbba   :  { %8396 = vrcp.f32 %v2362_v15 }
 0xbbb   :  { %8398 = vrcp.f32 %v2368_v26 }
 0xbbc   :  { %v2365_v52 = vpop.xlane.xlu1 %2364 }
 0xbbd   :  { %8400 = vrcp.f32 %v2365_v52 }
 0xbc0   :  { %v2393_v19 = vpop.permute.xlu1 %2392 }
 0xbc1   :  { %7601 = vmatprep.subr.bf16.mxu1 %v2393_v19 }
 0xbc2   :  { %7602 = vmatpush3.bf16.msra.mxu1 %v2393_v19 }
 0xbc3   :  { %8115 = vmatprep.subr.msk.bf16.mxu1 %vm906_vm5, %v6825_v55 }
 0xbc4   :  { %v2968_v30 = vpop.permute.xlu1 %2967 }
 0xbc5   :  { %7604 = vmatmul.mubr.msk.bf16.vlgmr.msra.gmra.mxu1 %vm407_vm4, %v2389_v62  ;;  %8122 = vmatprep.subr.msk.bf16.mxu0 %vm317_vm3, %v2968_v30  ;;  %v2990_v7 = vsel %vm317_vm3, %v2968_v30, 0 }
 0xbc6   :  { %7666 = vmatpush3.bf16.xpose.msra.mxu0 %v2990_v7  ;;  %v8395_v17 = vpop.eup %8394  ;;  %7612 = vmatpush3.bf16.msra.mxu1 %v2500_v42 }
 0xbc7   :  { %8123 = vmatprep.subr.msk.bf16.mxu0 %vm317_vm3, %v2966_v49  ;;  %v8397_v26 = vpop.eup %8396  ;;  %v2387_v9 = vmul.f32 %v8395_v17, %v9728_v60 }
 0xbc8   :  { %v8399_v15 = vpop.eup %8398  ;;  %v2384_v29 = vmul.f32 %v8397_v26, %v9688_v25  ;;  %v2964_v59 = vpop.permute.xlu1 %2963 }
 0xbc9   :  { %v2386_v22 = vmul.f32 %v8399_v15, %v9684_v24  ;;  %v2984_v60 = vsel %vm317_vm3, %v2964_v59, 0 }
 0xbca   :  { %v8401_v31 = vpop.eup %8400 }
 0xbcb   :  { %v2385_v36 = vmul.f32 %v8401_v31, %v9732_v6  ;;  %v2391_v14 = vpack.c.bf16 %v2387_v9, %v2386_v22 }
 0xbcc   :  { %v2958_v25 = vpop.permute.xlu1 %2957 }
 0xbcd   :  { %v2390_v37 = vpack.c.bf16 %v2385_v36, %v2384_v29 }
 0xbce   :  { %7668 = vmatpush3.bf16.xpose.msra.mxu0 %v2987_v1 }
 0xbcf   :  { %7607 = vmatprep.mubr.msk.bf16.mxu1 %vm407_vm4, %v2390_v37  ;;  %8124 = vmatprep.subr.msk.bf16.mxu0 %vm317_vm3, %v2964_v59 }
 0xbd0   :  { %7608 = vmatmul.mubr.msk.bf16.gmra.mxu1 %vm407_vm4, %v2391_v14  ;;  %v2962_v24 = vpop.permute.xlu1 %2961 }
 0xbd6   :  { %7670 = vmatpush3.bf16.xpose.msra.mxu0 %v2984_v60 }
 0xbdd   :  { %7672 = vmatmul.mubr.msk.bf16.vlgmr.msra.gmra.mxu0 %vm317_vm3, %v2958_v25 }
 0xbde   :  { %7675 = vmatprep.mubr.msk.bf16.mxu0 %vm317_vm3, %v2960_v45 }
 0xbe5   :  { %7676 = vmatmul.mubr.msk.bf16.gmra.mxu0 %vm317_vm3, %v2962_v24 }
 0xc0b   :  { %v2682_v6 = vpop.xlane.xlu0 %2681 }
 0xc0c   :  { %v2704_v5 = vsub.f32 %v9754_v33, %v2682_v6 }
 0xc0e   :  { %v2712_v0 = vmul.f32 1.442695, %v2704_v5 }
 0xc0f   :  { %v2688_v51 = vpop.xlane.xlu0 %2687  ;;  %v2685_v63 = vpop.xlane.xlu1 %2684 }
 0xc10   :  { %v2706_v49 = vsub.f32 %v9752_v46, %v2688_v51  ;;  %v2705_v40 = vsub.f32 %v9760_v3, %v2685_v63 }
 0xc12   :  { %v2716_v18 = vmul.f32 1.442695, %v2706_v49  ;;  %v2714_v48 = vmul.f32 1.442695, %v2705_v40 }
 0xc13   :  { %v2691_v52 = vpop.xlane.xlu0 %2690 }
 0xc14   :  { %8402 = vpow2.f32 %v2716_v18  ;;  %v2707_v21 = vsub.f32 %v9758_v47, %v2691_v52 }
 0xc15   :  { %8404 = vpow2.f32 %v2712_v0 }
 0xc16   :  { %v2718_v19 = vmul.f32 1.442695, %v2707_v21 }
 0xc17   :  { %v2694_v11 = vpop.xlane.xlu0 %2693 }
 0xc18   :  { %8406 = vpow2.f32 %v2718_v19  ;;  %v2708_v33 = vsub.f32 %v9768_v8, %v2694_v11 }
 0xc19   :  { %8408 = vpow2.f32 %v2714_v48 }
 0xc1a   :  { %v2720_v46 = vmul.f32 1.442695, %v2708_v33 }
 0xc1b   :  { %v2700_v62 = vpop.xlane.xlu0 %2699 }
 0xc1c   :  { %v2710_v30 = vsub.f32 %v9766_v50, %v2700_v62 }
 0xc1e   :  { %v2724_v7 = vmul.f32 1.442695, %v2710_v30 }
 0xc20   :  { %8410 = vpow2.f32 %v2724_v7 }
 0xc21   :  { %v9819_v17 = vpop.eup %8402  ;;  %8412 = vpow2.f32 %v2720_v46 }
 0xc22   :  { %v2734_v47 = vsel %vm407_vm4, %v9819_v17, 0.0  ;;  %v9823_v3 = vpop.eup %8404 }
 0xc23   :  { %2735 = vadd.xlane.f32.xlu0 %v2734_v47  ;;  %v2728_v8 = vsel %vm407_vm4, %v9823_v3, 0.0 }
 0xc25   :  { %v9825_v26 = vpop.eup %8406 }
 0xc26   :  { %v2737_v50 = vsel %vm407_vm4, %v9825_v26, 0.0  ;;  %v9831_v15 = vpop.eup %8408 }
 0xc27   :  { %2729 = vadd.xlane.f32.xlu0 %v2728_v8  ;;  %2738 = vadd.xlane.f32.xlu1 %v2737_v50  ;;  %v2731_v31 = vsel %vm407_vm4, %v9831_v15, 0.0 }
 0xc2b   :  { %2732 = vadd.xlane.f32.xlu1 %v2731_v31 }
 0xc2d   :  { %v9835_v9 = vpop.eup %8410 }
 0xc2e   :  { %v2746_v29 = vsel %vm407_vm4, %v9835_v9, 0.0  ;;  %v9839_v36 = vpop.eup %8412 }
 0xc2f   :  { %2747 = vadd.xlane.f32.xlu0 %v2746_v29  ;;  %v2740_v59 = vsel %vm407_vm4, %v9839_v36, 0.0 }
 0xc30   :  { %v7573_v22 = vpop.f32.mrf.mxu1 }
 0xc31   :  { %v9842_v1 = vadd.f32 %v7573_v22, %v9691_v16 }
 0xc32   :  { %v2156_v37 = vpop.f32.mrf.mxu1 }
 0xc33   :  { %v9847_v14 = vadd.f32 %v2156_v37, %v9696_v4  ;;  %2741 = vadd.xlane.f32.xlu0 %v2740_v59 }
 0xc34   :  { %v7574_v60 = vpop.f32.mrf.mxu1 }
 0xc35   :  { %v9850_v25 = vadd.f32 %v7574_v60, %v9699_v13  ;;  %v2697_v13 = vpop.xlane.xlu1 %2696 }
 0xc36   :  { %v9852_v45 = vpop.f32.mrf.mxu1  ;;  %v2709_v51 = vsub.f32 %v9774_v43, %v2697_v13 }
 0xc38   :  { %v2722_v49 = vmul.f32 1.442695, %v2709_v51 }
 0xc39   :  { %v2703_v5 = vpop.xlane.xlu1 %2702 }
 0xc3b   :  { %v7577_v24 = vpop.f32.mrf.mxu1 }
 0xc3c   :  { %v9855_v6 = vadd.f32 %v7577_v24, %v9704_v56  ;;  %2776 = vrot.lane.b32.xlu1 %v8958_v53, %s8779_s18  ;;  %v2711_v56 = vsub.f32 %v9772_v12, %v2703_v5 }
 0xc3d   :  { %v2172_v16 = vpop.f32.mrf.mxu1 }
 0xc3e   :  { %v9860_v55 = vadd.f32 %v2172_v16, %v9709_v35  ;;  %v2726_v63 = vmul.f32 1.442695, %v2711_v56 }
 0xc3f   :  { %v7578_v4 = vpop.f32.mrf.mxu1 }
 0xc40   :  { %v9863_v42 = vadd.f32 %v7578_v4, %v9712_v61  ;;  %2774 = vrot.lane.b32.xlu1 %v8960_v54, %s8779_s18  ;;  %8414 = vpow2.f32 %v2726_v63 }
 0xc41   :  { %8416 = vpow2.f32 %v2722_v49  ;;  %v9881_v12 = vpop.f32.mrf.mxu1 }
 0xc49   :  { %2778 = vrot.lane.b32.xlu0 %v8966_v57, %s8779_s18 }
 0xc4d   :  { %v9871_v35 = vpop.eup %8414 }
 0xc4e   :  { %v2749_v61 = vsel %vm407_vm4, %v9871_v35, 0.0  ;;  %v9875_v0 = vpop.eup %8416 }
 0xc4f   :  { %v2743_v18 = vsel %vm407_vm4, %v9875_v0, 0.0 }
 0xc64   :  { %2750 = vadd.xlane.f32.xlu1 %v2749_v61 }
 0xc68   :  { %2744 = vadd.xlane.f32.xlu1 %v2743_v18 }
 0xc79   :  { %2772 = vrot.lane.b32.xlu1 %v8930_v27, %s8779_s18 }
 0xc85   :  { %v7605_v43 = vpop.f32.mrf.mxu1 }
 0xc87   :  { %v2450_v40 = vpop.f32.mrf.mxu1 }
 0xc89   :  { %v7606_v52 = vpop.f32.mrf.mxu1 }
 0xc8a   :  { %v2482_v19 = vpack.c.bf16 %v7606_v52, %v7605_v43 }
 0xc8b   :  { %v2453_v21 = vpop.f32.mrf.mxu1 }
 0xc8c   :  { %v2481_v48 = vpack.c.bf16 %v2453_v21, %v2450_v40 }
 0xc8e   :  { %7613 = vmatprep.mubr.msk.bf16.mxu1 %vm317_vm3, %v2481_v48 }
 0xc8f   :  { %7614 = vmatmul.mubr.msk.bf16.vlgmr.msra.gmra.mxu1 %vm317_vm3, %v2482_v19 }
 0xc90   :  { %v7609_v11 = vpop.f32.mrf.mxu1 }
 0xc92   :  { %v2466_v33 = vpop.f32.mrf.mxu1 }
 0xc94   :  { %v7610_v62 = vpop.f32.mrf.mxu1 }
 0xc95   :  { %v2484_v7 = vpack.c.bf16 %v7610_v62, %v7609_v11 }
 0xc96   :  { %v2469_v30 = vpop.f32.mrf.mxu1 }
 0xc97   :  { %v2483_v46 = vpack.c.bf16 %v2469_v30, %v2466_v33 }
 0xc99   :  { %7617 = vmatprep.mubr.msk.bf16.mxu1 %vm317_vm3, %v2483_v46 }
 0xc9a   :  { %7618 = vmatmul.mubr.msk.bf16.gmra.mxu1 %vm317_vm3, %v2484_v7 }
 0xc9d   :  { %v9887_v47 = vpop.f32.mrf.mxu0 }
 0xc9e   :  { %v3066_v22 = vsel %vm407_vm4, %v9887_v47, -inf }
 0xc9f   :  { %v9889_v8 = vpop.f32.mrf.mxu0 }
 0xca0   :  { %v3060_v50 = vsel %vm407_vm4, %v9889_v8, -inf }
 0xca1   :  { %3061 = vmax.xlane.f32.xlu0 %v3060_v50  ;;  %v9893_v31 = vpop.f32.mrf.mxu0 }
 0xca2   :  { %v3069_v24 = vsel %vm407_vm4, %v9893_v31, -inf }
 0xca3   :  { %v9895_v29 = vpop.f32.mrf.mxu0 }
 0xca4   :  { %v3063_v37 = vsel %vm407_vm4, %v9895_v29, -inf }
 0xca5   :  { %3067 = vmax.xlane.f32.xlu0 %v3066_v22  ;;  %v9901_v59 = vpop.f32.mrf.mxu0  ;;  %3064 = vmax.xlane.f32.xlu1 %v3063_v37 }
 0xca6   :  { %v3078_v49 = vsel %vm407_vm4, %v9901_v59, -inf }
 0xca7   :  { %v9903_v60 = vpop.f32.mrf.mxu0 }
 0xca8   :  { %v3072_v5 = vsel %vm407_vm4, %v9903_v60, -inf }
 0xca9   :  { %3070 = vmax.xlane.f32.xlu0 %v3069_v24  ;;  %v9907_v16 = vpop.f32.mrf.mxu0 }
 0xcaa   :  { %v3081_v61 = vsel %vm407_vm4, %v9907_v16, -inf }
 0xcab   :  { %v9909_v4 = vpop.f32.mrf.mxu0 }
 0xcac   :  { %v2736_v13 = vpop.xlane.xlu0 %2735  ;;  %v3075_v56 = vsel %vm407_vm4, %v9909_v4, -inf }
 0xcad   :  { %3073 = vmax.xlane.f32.xlu0 %v3072_v5  ;;  %3076 = vmax.xlane.f32.xlu1 %v3075_v56 }
 0xcb0   :  { %v2730_v51 = vpop.xlane.xlu0 %2729  ;;  %v2739_v63 = vpop.xlane.xlu1 %2738 }
 0xcb1   :  { %3079 = vmax.xlane.f32.xlu0 %v3078_v49  ;;  %3082 = vmax.xlane.f32.xlu1 %v3081_v61  ;;  %8418 = vrcp.f32 %v2730_v51 }
 0xcb4   :  { %v2733_v18 = vpop.xlane.xlu1 %2732 }
 0xcb5   :  { %8420 = vrcp.f32 %v2733_v18 }
 0xcb6   :  { %8422 = vrcp.f32 %v2739_v63 }
 0xcb7   :  { %8424 = vrcp.f32 %v2736_v13 }
 0xcb8   :  { %v2748_v43 = vpop.xlane.xlu0 %2747  ;;  %v2777_v21 = vpop.permute.xlu1 %2776 }
 0xcbc   :  { %v2742_v40 = vpop.xlane.xlu0 %2741  ;;  %v2775_v30 = vpop.permute.xlu1 %2774 }
 0xcbe   :  { %v8419_v52 = vpop.eup %8418 }
 0xcbf   :  { %v2760_v11 = vmul.f32 %v8419_v52, %v9823_v3 }
 0xcc0   :  { %v2779_v48 = vpop.permute.xlu0 %2778 }
 0xcc1   :  { %7637 = vmatprep.subr.bf16.mxu1 %v2779_v48 }
 0xcc2   :  { %v8421_v19 = vpop.eup %8420  ;;  %7638 = vmatpush3.bf16.msra.mxu1 %v2779_v48 }
 0xcc3   :  { %7639 = vmatprep.subr.bf16.mxu1 %v2777_v21  ;;  %v2761_v33 = vmul.f32 %v8421_v19, %v9831_v15  ;;  %v8423_v7 = vpop.eup %8422 }
 0xcc4   :  { %v8425_v22 = vpop.eup %8424  ;;  %v2763_v3 = vmul.f32 %v8423_v7, %v9825_v26 }
 0xcc5   :  { %v2768_v62 = vpack.c.bf16 %v2761_v33, %v2760_v11  ;;  %v2762_v37 = vmul.f32 %v8425_v22, %v9819_v17 }
 0xcc6   :  { %7640 = vmatpush3.bf16.msra.mxu1 %v2777_v21 }
 0xcc7   :  { %7641 = vmatprep.subr.bf16.mxu1 %v2775_v30  ;;  %7645 = vmatprep.mubr.msk.bf16.mxu1 %vm407_vm4, %v2768_v62  ;;  %v2769_v24 = vpack.c.bf16 %v2763_v3, %v2762_v37 }
 0xcca   :  { %7642 = vmatpush3.bf16.msra.mxu1 %v2775_v30 }
 0xced   :  { %v2751_v46 = vpop.xlane.xlu1 %2750 }
 0xcee   :  { %8426 = vrcp.f32 %v2751_v46 }
 0xcef   :  { %8428 = vrcp.f32 %v2742_v40 }
 0xcf0   :  { %8430 = vrcp.f32 %v2748_v43 }
 0xcf1   :  { %v2745_v50 = vpop.xlane.xlu1 %2744 }
 0xcf2   :  { %8432 = vrcp.f32 %v2745_v50 }
 0xcf5   :  { %v2773_v15 = vpop.permute.xlu1 %2772 }
 0xcf6   :  { %7643 = vmatprep.subr.bf16.mxu1 %v2773_v15 }
 0xcf7   :  { %7644 = vmatpush3.bf16.msra.mxu1 %v2773_v15 }
 0xcfa   :  { %7646 = vmatmul.mubr.msk.bf16.vlgmr.msra.gmra.mxu1 %vm407_vm4, %v2769_v24 }
 0xcfb   :  { %v8427_v5 = vpop.eup %8426 }
 0xcfc   :  { %v8429_v13 = vpop.eup %8428  ;;  %v2767_v63 = vmul.f32 %v8427_v5, %v9871_v35 }
 0xcfd   :  { %v8431_v56 = vpop.eup %8430  ;;  %v2764_v49 = vmul.f32 %v8429_v13, %v9839_v36 }
 0xcfe   :  { %v2766_v26 = vmul.f32 %v8431_v56, %v9835_v9 }
 0xcff   :  { %v8433_v51 = vpop.eup %8432 }
 0xd00   :  { %v2765_v61 = vmul.f32 %v8433_v51, %v9875_v0  ;;  %v2771_v43 = vpack.c.bf16 %v2767_v63, %v2766_v26 }
 0xd02   :  { %v2770_v18 = vpack.c.bf16 %v2765_v61, %v2764_v49 }
 0xd04   :  { %7649 = vmatprep.mubr.msk.bf16.mxu1 %vm407_vm4, %v2770_v18 }
 0xd05   :  { %7650 = vmatmul.mubr.msk.bf16.gmra.mxu1 %vm407_vm4, %v2771_v43 }
 0xd2a   :  { %v3062_v17 = vpop.xlane.xlu0 %3061 }
 0xd2b   :  { %v3084_v40 = vsub.f32 %v9889_v8, %v3062_v17 }
 0xd2d   :  { %v3092_v35 = vmul.f32 1.442695, %v3084_v40 }
 0xd2e   :  { %v3068_v52 = vpop.xlane.xlu0 %3067  ;;  %v3065_v21 = vpop.xlane.xlu1 %3064 }
 0xd2f   :  { %v3086_v48 = vsub.f32 %v9887_v47, %v3068_v52  ;;  %v3085_v36 = vsub.f32 %v9895_v29, %v3065_v21 }
 0xd31   :  { %v3096_v19 = vmul.f32 1.442695, %v3086_v48  ;;  %v3094_v11 = vmul.f32 1.442695, %v3085_v36 }
 0xd32   :  { %v3071_v0 = vpop.xlane.xlu0 %3070 }
 0xd33   :  { %8434 = vpow2.f32 %v3096_v19  ;;  %v3087_v9 = vsub.f32 %v9893_v31, %v3071_v0  ;;  %v6838_v31 = vld [vmem:[%s11185_s6 + $0xc] sm:$0x3] }
 0xd34   :  { %8436 = vpow2.f32 %v3092_v35  ;;  %8120 = vmatprep.subr.msk.bf16.mxu1 %vm906_vm5, %v6838_v31 }
 0xd35   :  { %v3098_v33 = vmul.f32 1.442695, %v3087_v9 }
 0xd36   :  { %v3074_v62 = vpop.xlane.xlu0 %3073 }
 0xd37   :  { %8438 = vpow2.f32 %v3098_v33  ;;  %v3088_v8 = vsub.f32 %v9903_v60, %v3074_v62  ;;  %v2880_v60 = vsel %vm906_vm5, %v6838_v31, 0 }
 0xd38   :  { %8440 = vpow2.f32 %v3094_v11  ;;  %7654 = vmatpush3.bf16.msra.mxu1 %v2880_v60 }
 0xd39   :  { %v3100_v47 = vmul.f32 1.442695, %v3088_v8 }
 0xd3a   :  { %v3080_v30 = vpop.xlane.xlu0 %3079 }
 0xd3b   :  { %v3090_v46 = vsub.f32 %v9901_v59, %v3080_v30 }
 0xd3d   :  { %v3104_v7 = vmul.f32 1.442695, %v3090_v46 }
 0xd3f   :  { %8442 = vpow2.f32 %v3104_v7 }
 0xd40   :  { %v9937_v50 = vpop.eup %8434  ;;  %8444 = vpow2.f32 %v3100_v47 }
 0xd41   :  { %v3114_v29 = vsel %vm407_vm4, %v9937_v50, 0.0  ;;  %v9946_v22 = vpop.eup %8436 }
 0xd42   :  { %3115 = vadd.xlane.f32.xlu0 %v3114_v29  ;;  %v3108_v3 = vsel %vm407_vm4, %v9946_v22, 0.0 }
 0xd44   :  { %v9948_v59 = vpop.eup %8438 }
 0xd45   :  { %v3117_v15 = vsel %vm407_vm4, %v9948_v59, 0.0  ;;  %v9954_v37 = vpop.eup %8440 }
 0xd46   :  { %3109 = vadd.xlane.f32.xlu0 %v3108_v3  ;;  %3118 = vadd.xlane.f32.xlu1 %v3117_v15  ;;  %v3111_v24 = vsel %vm407_vm4, %v9954_v37, 0.0 }
 0xd4a   :  { %3112 = vadd.xlane.f32.xlu1 %v3111_v24 }
 0xd4c   :  { %v9958_v5 = vpop.eup %8442 }
 0xd4d   :  { %v3126_v13 = vsel %vm407_vm4, %v9958_v5, 0.0  ;;  %v9962_v56 = vpop.eup %8444 }
 0xd4e   :  { %3127 = vadd.xlane.f32.xlu0 %v3126_v13  ;;  %v3120_v61 = vsel %vm407_vm4, %v9962_v56, 0.0 }
 0xd4f   :  { %v7615_v51 = vpop.f32.mrf.mxu1 }
 0xd50   :  { %v9965_v63 = vadd.f32 %v7615_v51, %v9842_v1 }
 0xd51   :  { %v2536_v49 = vpop.f32.mrf.mxu1 }
 0xd52   :  { %v9970_v26 = vadd.f32 %v2536_v49, %v9847_v14  ;;  %3121 = vadd.xlane.f32.xlu0 %v3120_v61 }
 0xd53   :  { %v7616_v18 = vpop.f32.mrf.mxu1 }
 0xd54   :  { %v9973_v43 = vadd.f32 %v7616_v18, %v9850_v25  ;;  %v3077_v25 = vpop.xlane.xlu1 %3076 }
 0xd55   :  { %v9975_v17 = vpop.f32.mrf.mxu1 }
 0xd58   :  { %v3083_v35 = vpop.xlane.xlu1 %3082 }
 0xd5a   :  { %v7619_v40 = vpop.f32.mrf.mxu1 }
 0xd5b   :  { %v9978_v52 = vadd.f32 %v7619_v40, %v9855_v6  ;;  %3156 = vrot.lane.b32.xlu1 %v8958_v53, %s11199_s23  ;;  %v3091_v6 = vsub.f32 %v9907_v16, %v3083_v35  ;;  %v3089_v53 = vsub.f32 %v9909_v4, %v3077_v25 }
 0xd5c   :  { %v2552_v1 = vpop.f32.mrf.mxu1 }
 0xd5d   :  { %v9983_v21 = vadd.f32 %v2552_v1, %v9860_v55  ;;  %v3106_v55 = vmul.f32 1.442695, %v3091_v6 }
 0xd5e   :  { %v7620_v14 = vpop.f32.mrf.mxu1 }
 0xd5f   :  { %v9986_v48 = vadd.f32 %v7620_v14, %v9863_v42  ;;  %3154 = vrot.lane.b32.xlu1 %v8960_v54, %s11199_s23  ;;  %v3102_v42 = vmul.f32 1.442695, %v3089_v53  ;;  %8446 = vpow2.f32 %v3106_v55 }
 0xd60   :  { %v10012_v4 = vpop.f32.mrf.mxu1 }
 0xd61   :  { %8448 = vpow2.f32 %v3102_v42  ;;  %v6851_v42 = vld [vmem:[%s11185_s6 + $0xe] sm:$0x3]  ;;  %s8782_s6 = smov 60  }
 0xd68   :  { %3158 = vrot.lane.b32.xlu0 %v8966_v57, %s11199_s23 }
 0xd6c   :  { %3555 = vrot.lane.b32.xlu0 %v8950_v44, %s8766_s3  ;;  %v9998_v54 = vpop.eup %8446 }
 0xd6d   :  { %v3129_v19 = vsel %vm407_vm4, %v9998_v54, 0.0 }
 0xd6e   :  { %v10002_v57 = vpop.eup %8448 }
 0xd6f   :  { %v3123_v16 = vsel %vm407_vm4, %v10002_v57, 0.0 }
 0xd70   :  { %3559 = vrot.lane.b32.xlu0 %v8936_v34, %s8766_s3 }
 0xd83   :  { %3130 = vadd.xlane.f32.xlu1 %v3129_v19 }
 0xd87   :  { %3124 = vadd.xlane.f32.xlu1 %v3123_v16  ;;  %v3260_v16 = vsel %vm906_vm5, %v6851_v42, 0 }
 0xd98   :  { %3152 = vrot.lane.b32.xlu1 %v8930_v27, %s11199_s23 }
 0xd9c   :  { %3557 = vrot.lane.b32.xlu1 %v8944_v38, %s8766_s3 }
 0xda0   :  { %3561 = vrot.lane.b32.xlu1 %v8934_v32, %s8766_s3  ;;  %s11208_s3 = smov 68  }
 0xdba   :  { %v7647_v36 = vpop.f32.mrf.mxu1 }
 0xdbc   :  { %v2830_v0 = vpop.f32.mrf.mxu1 }
 0xdbe   :  { %v7648_v9 = vpop.f32.mrf.mxu1 }
 0xdbf   :  { %v2862_v62 = vpack.c.bf16 %v7648_v9, %v7647_v36 }
 0xdc0   :  { %v2833_v11 = vpop.f32.mrf.mxu1 }
 0xdc1   :  { %v2861_v33 = vpack.c.bf16 %v2833_v11, %v2830_v0 }
 0xdc3   :  { %7655 = vmatprep.mubr.msk.bf16.mxu1 %vm317_vm3, %v2861_v33 }
 0xdc4   :  { %7656 = vmatmul.mubr.msk.bf16.vlgmr.msra.gmra.mxu1 %vm317_vm3, %v2862_v62 }
 0xdc5   :  { %v7651_v8 = vpop.f32.mrf.mxu1 }
 0xdc7   :  { %v2846_v27 = vpop.f32.mrf.mxu1 }
 0xdc9   :  { %v7652_v30 = vpop.f32.mrf.mxu1 }
 0xdca   :  { %v2864_v31 = vpack.c.bf16 %v7652_v30, %v7651_v8 }
 0xdcb   :  { %v2849_v46 = vpop.f32.mrf.mxu1  ;;  %v3116_v47 = vpop.xlane.xlu0 %3115 }
 0xdcc   :  { %v2863_v7 = vpack.c.bf16 %v2849_v46, %v2846_v27 }
 0xdce   :  { %7659 = vmatprep.mubr.msk.bf16.mxu1 %vm317_vm3, %v2863_v7 }
 0xdcf   :  { %7660 = vmatmul.mubr.msk.bf16.gmra.mxu1 %vm317_vm3, %v2864_v31  ;;  %v3110_v29 = vpop.xlane.xlu0 %3109  ;;  %v3119_v60 = vpop.xlane.xlu1 %3118 }
 0xdd0   :  { %8450 = vrcp.f32 %v3110_v29 }
 0xdd3   :  { %v3113_v3 = vpop.xlane.xlu1 %3112 }
 0xdd4   :  { %8452 = vrcp.f32 %v3113_v3 }
 0xdd5   :  { %8454 = vrcp.f32 %v3119_v60 }
 0xdd6   :  { %8456 = vrcp.f32 %v3116_v47 }
 0xdd7   :  { %v3128_v15 = vpop.xlane.xlu0 %3127  ;;  %v3157_v51 = vpop.permute.xlu1 %3156 }
 0xddb   :  { %v3122_v24 = vpop.xlane.xlu0 %3121  ;;  %v3155_v14 = vpop.permute.xlu1 %3154 }
 0xddd   :  { %v8451_v13 = vpop.eup %8450 }
 0xdde   :  { %v3140_v18 = vmul.f32 %v8451_v13, %v9946_v22 }
 0xddf   :  { %v3159_v49 = vpop.permute.xlu0 %3158 }
 0xde0   :  { %7679 = vmatprep.subr.bf16.mxu1 %v3159_v49 }
 0xde1   :  { %v8453_v61 = vpop.eup %8452  ;;  %7680 = vmatpush3.bf16.msra.mxu1 %v3159_v49 }
 0xde2   :  { %7681 = vmatprep.subr.bf16.mxu1 %v3157_v51  ;;  %v3141_v40 = vmul.f32 %v8453_v61, %v9954_v37  ;;  %v8455_v35 = vpop.eup %8454 }
 0xde3   :  { %v8457_v53 = vpop.eup %8456  ;;  %v3143_v22 = vmul.f32 %v8455_v35, %v9948_v59  ;;  %v8207_v35 = vld [vmem:[%s11191_s12] sm:$0xff]  }
 0xde4   :  { %v3148_v1 = vpack.c.bf16 %v3141_v40, %v3140_v18  ;;  %v3142_v55 = vmul.f32 %v8457_v53, %v9937_v50 }
 0xde5   :  { %7682 = vmatpush3.bf16.msra.mxu1 %v3157_v51 }
 0xde6   :  { %7683 = vmatprep.subr.bf16.mxu1 %v3155_v14  ;;  %7687 = vmatprep.mubr.msk.bf16.mxu1 %vm407_vm4, %v3148_v1  ;;  %v3149_v19 = vpack.c.bf16 %v3143_v22, %v3142_v55 }
 0xde9   :  { %7684 = vmatpush3.bf16.msra.mxu1 %v3155_v14  ;;  %v8205_v14 = vld [vmem:[%s11191_s12 + $0x8] sm:$0xff]   ;;  %s8787_s12 = smov 40  }
 0xdea   :  { %7705 = vmatprep.subr.bf16.mxu0 %v8205_v14 }
 0xdeb   :  { %7706 = vmatpush3.bf16.msra.mxu0 %v8205_v14 }
 0xdec   :  { %7707 = vmatprep.subr.bf16.mxu0 %v8207_v35 }
 0xdef   :  { %7708 = vmatpush3.bf16.msra.mxu0 %v8207_v35 }
 0xe0c   :  { %v3131_v25 = vpop.xlane.xlu1 %3130 }
 0xe0d   :  { %8458 = vrcp.f32 %v3131_v25  ;;  %v8206_v25 = vld [vmem:[%s11187_s8] sm:$0xff]  }
 0xe0e   :  { %8460 = vrcp.f32 %v3122_v24 }
 0xe0f   :  { %8462 = vrcp.f32 %v3128_v15 }
 0xe10   :  { %v3125_v6 = vpop.xlane.xlu1 %3124 }
 0xe11   :  { %8464 = vrcp.f32 %v3125_v6  ;;  %v1028_v6 = vadd.f32 %v9417_v2, %v9208_v23  ;;  %v1044_v23 = vadd.f32 %v9431_v41, %v9216_v28 }
 0xe13   :  { %v1428_v53 = vadd.f32 %v9547_v20, %v1028_v6 }
 0xe14   :  { %v3153_v37 = vpop.permute.xlu1 %3152 }
 0xe15   :  { %7685 = vmatprep.subr.bf16.mxu1 %v3153_v37  ;;  %v1808_v22 = vadd.f32 %v9701_v10, %v1428_v53  ;;  %v6864_v53 = vld [vmem:[%s11188_s9] ss:$0 sm:$0xff]  ;;  %s8781_s9 = smov 64  }
 0xe16   :  { %7686 = vmatpush3.bf16.msra.mxu1 %v3153_v37 }
 0xe17   :  { %8125 = vmatprep.subr.msk.bf16.mxu1 %vm906_vm5, %v6851_v42  ;;  %v2188_v55 = vadd.f32 %v9852_v45, %v1808_v22  ;;  %v1432_v45 = vadd.f32 %v9591_v39, %v1044_v23 }
 0xe19   :  { %7688 = vmatmul.mubr.msk.bf16.vlgmr.msra.gmra.mxu1 %vm407_vm4, %v3149_v19  ;;  %v2568_v19 = vadd.f32 %v9975_v17, %v2188_v55 }
 0xe1a   :  { %7696 = vmatpush3.bf16.msra.mxu1 %v3260_v16  ;;  %v8459_v36 = vpop.eup %8458 }
 0xe1b   :  { %v8461_v0 = vpop.eup %8460  ;;  %v3147_v50 = vmul.f32 %v8459_v36, %v9998_v54  ;;  %v6856_v36 = vld [vmem:[%s11186_s7] ss:$0 sm:$0xff] }
 0xe1c   :  { %v8463_v59 = vpop.eup %8462  ;;  %v3144_v11 = vmul.f32 %v8461_v0, %v9962_v56 }
 0xe1d   :  { %v3146_v62 = vmul.f32 %v8463_v59, %v9958_v5 }
 0xe1e   :  { %v8465_v9 = vpop.eup %8464 }
 0xe1f   :  { %v3145_v33 = vmul.f32 %v8465_v9, %v10002_v57  ;;  %v3151_v27 = vpack.c.bf16 %v3147_v50, %v3146_v62 }
 0xe21   :  { %v3150_v8 = vpack.c.bf16 %v3145_v33, %v3144_v11 }
 0xe23   :  { %7691 = vmatprep.mubr.msk.bf16.mxu1 %vm407_vm4, %v3150_v8  ;;  %v1812_v8 = vadd.f32 %v9746_v58, %v1432_v45 }
 0xe24   :  { %7692 = vmatmul.mubr.msk.bf16.gmra.mxu1 %vm407_vm4, %v3151_v27 }
 0xe84   :  { %v7657_v30 = vpop.f32.mrf.mxu1 }
 0xe85   :  { %v2949_v46 = vadd.f32 %v7657_v30, %v9965_v63 }
 0xe86   :  { %v2916_v47 = vpop.f32.mrf.mxu1 }
 0xe87   :  { %v2947_v7 = vadd.f32 %v2916_v47, %v9970_v26 }
 0xe88   :  { %v7658_v31 = vpop.f32.mrf.mxu1 }
 0xe89   :  { %v2950_v54 = vadd.f32 %v7658_v31, %v9973_v43 }
 0xe8a   :  { %v2919_v56 = vpop.f32.mrf.mxu1 }
 0xe8b   :  { %v2948_v59 = vadd.f32 %v2919_v56, %v2568_v19 }
 0xe8f   :  { %v7661_v29 = vpop.f32.mrf.mxu1 }
 0xe90   :  { %v10039_v57 = vadd.f32 %v7661_v29, %v9978_v52 }
 0xe91   :  { %v2932_v5 = vpop.f32.mrf.mxu1 }
 0xe92   :  { %v10042_v60 = vadd.f32 %v2932_v5, %v9983_v21 }
 0xe93   :  { %v7662_v3 = vpop.f32.mrf.mxu1 }
 0xe94   :  { %v10045_v15 = vadd.f32 %v7662_v3, %v9986_v48  ;;  %v8204_v48 = vld [vmem:[%s11187_s8 + $0x8] sm:$0xff]  }
 0xe95   :  { %v10047_v63 = vpop.f32.mrf.mxu1  ;;  %7717 = vmatprep.subr.bf16.mxu1 %v8204_v48 }
 0xed9   :  { %v7689_v24 = vpop.f32.mrf.mxu1 }
 0xedb   :  { %v3210_v26 = vpop.f32.mrf.mxu1 }
 0xedd   :  { %v7690_v13 = vpop.f32.mrf.mxu1 }
 0xede   :  { %v3242_v49 = vpack.c.bf16 %v7690_v13, %v7689_v24 }
 0xedf   :  { %v3213_v51 = vpop.f32.mrf.mxu1 }
 0xee0   :  { %v3241_v43 = vpack.c.bf16 %v3213_v51, %v3210_v26 }
 0xee2   :  { %7697 = vmatprep.mubr.msk.bf16.mxu1 %vm317_vm3, %v3241_v43 }
 0xee3   :  { %7698 = vmatmul.mubr.msk.bf16.vlgmr.msra.gmra.mxu1 %vm317_vm3, %v3242_v49 }
 0xee4   :  { %v7693_v52 = vpop.f32.mrf.mxu1  ;;  %7718 = vmatpush3.bf16.msra.mxu1 %v8204_v48 }
 0xee5   :  { %7719 = vmatprep.subr.bf16.mxu1 %v8206_v25 }
 0xee6   :  { %v3226_v61 = vpop.f32.mrf.mxu1 }
 0xee8   :  { %v7694_v21 = vpop.f32.mrf.mxu1  ;;  %7720 = vmatpush3.bf16.msra.mxu1 %v8206_v25 }
 0xee9   :  { %v3244_v1 = vpack.c.bf16 %v7694_v21, %v7693_v52 }
 0xeea   :  { %v3229_v18 = vpop.f32.mrf.mxu1 }
 0xeeb   :  { %v3243_v40 = vpack.c.bf16 %v3229_v18, %v3226_v61 }
 0xeed   :  { %7701 = vmatprep.mubr.msk.bf16.mxu1 %vm317_vm3, %v3243_v40 }
 0xeee   :  { %7702 = vmatmul.mubr.msk.bf16.gmra.mxu1 %vm317_vm3, %v3244_v1 }
 0xfa3   :  { %v7699_v37 = vpop.f32.mrf.mxu1 }
 0xfa4   :  { %v3329_v16 = vadd.f32 %v7699_v37, %v2949_v46  ;;  %v2192_v46 = vadd.f32 %v9881_v12, %v1812_v8 }
 0xfa5   :  { %v3296_v42 = vpop.f32.mrf.mxu1 }
 0xfa6   :  { %v3327_v9 = vadd.f32 %v3296_v42, %v2947_v7  ;;  %v3343_v20 = vadd.f32 %v6856_v36, %v3329_v16  ;;  %v2572_v28 = vadd.f32 %v10012_v4, %v2192_v46 }
 0xfa7   :  { %v7700_v0 = vpop.f32.mrf.mxu1 }
 0xfa8   :  { %v3330_v50 = vadd.f32 %v7700_v0, %v2950_v54  ;;  %v3341_v33 = vadd.f32 %v6856_v36, %v3327_v9  ;;  %v2952_v58 = vadd.f32 %v10047_v63, %v2572_v28 }
 0xfa9   :  { %v3299_v2 = vpop.f32.mrf.mxu1 }
 0xfaa   :  { %v3344_v10 = vadd.f32 %v6856_v36, %v3330_v50  ;;  %v3328_v11 = vadd.f32 %v3299_v2, %v2948_v59 }
 0xfac   :  { %v3350_v17 = vpack.c.bf16 %v3344_v10, %v3343_v20  ;;  %v3342_v62 = vadd.f32 %v6856_v36, %v3328_v11 }
 0xfae   :  { %v3349_v27 = vpack.c.bf16 %v3342_v62, %v3341_v33  ;;  %v7703_v30 = vpop.f32.mrf.mxu1 }
 0xfaf   :  { %v3333_v41 = vadd.f32 %v7703_v30, %v10039_v57  ;;  %v3556_v57 = vpop.permute.xlu0 %3555  ;;  %v3558_v30 = vpop.permute.xlu1 %3557 }
 0xfb0   :  { %v3312_v47 = vpop.f32.mrf.mxu1  ;;  %7709 = vmatprep.mubr.msk.bf16.mxu0 %vm3376_vm6, %v3349_v27  ;;  %7721 = vmatprep.mubr.msk.bf16.mxu1 %vm3376_vm6, %v3349_v27 }
 0xfb1   :  { %7710 = vmatmul.mubr.msk.bf16.vlgmr.msra.gmra.mxu0 %vm3376_vm6, %v3350_v17  ;;  %7722 = vmatmul.mubr.msk.bf16.vlgmr.msra.gmra.mxu1 %vm3376_vm6, %v3350_v17  ;;  %v3331_v7 = vadd.f32 %v3312_v47, %v10042_v60  ;;  %v3347_v54 = vadd.f32 %v6856_v36, %v3333_v41  ;;  %v6857_v60 = vld [vmem:[%s11192_s13] ss:$0 sm:$0xff]  ;;  %s8788_s13 = smov 36  }
 0xfb2   :  { %v7704_v39 = vpop.f32.mrf.mxu1 }
 0xfb3   :  { %v3334_v12 = vadd.f32 %v7704_v39, %v10045_v15  ;;  %v3345_v5 = vadd.f32 %v6856_v36, %v3331_v7  ;;  %v3560_v46 = vpop.permute.xlu0 %3559  ;;  %v3562_v47 = vpop.permute.xlu1 %3561 }
 0xfb4   :  { %v3315_v31 = vpop.f32.mrf.mxu1 }
 0xfb5   :  { %v3348_v56 = vadd.f32 %v6856_v36, %v3334_v12  ;;  %v3332_v29 = vadd.f32 %v3315_v31, %v2952_v58 }
 0xfb7   :  { %v3352_v3 = vpack.c.bf16 %v3348_v56, %v3347_v54  ;;  %v3346_v4 = vadd.f32 %v6856_v36, %v3332_v29 }
 0xfb9   :  { %v3351_v24 = vpack.c.bf16 %v3346_v4, %v3345_v5 }
 0xfbb   :  { %7713 = vmatprep.mubr.msk.bf16.mxu0 %vm3376_vm6, %v3351_v24  ;;  %7725 = vmatprep.mubr.msk.bf16.mxu1 %vm3376_vm6, %v3351_v24 }
 0xfbc   :  { %7714 = vmatmul.mubr.msk.bf16.gmra.mxu0 %vm3376_vm6, %v3352_v3  ;;  %7726 = vmatmul.mubr.msk.bf16.gmra.mxu1 %vm3376_vm6, %v3352_v3 }
 0xfbd   :  { %7737 = vmatprep.mubr.msk.bf16.mxu0 %vm317_vm3, %v3556_v57 }
0x1071   :  { %v7711_v15 = vpop.f32.mrf.mxu0  ;;  %v7723_v63 = vpop.f32.mrf.mxu1 }
0x1072   :  { %v3432_v26 = vadd.f32 %v7711_v15, %v6857_v60  ;;  %v3528_v10 = vadd.f32 %v7723_v63, %v6864_v53 }
0x1073   :  { %v3423_v13 = vpop.f32.mrf.mxu0  ;;  %v3519_v51 = vpop.f32.mrf.mxu1 }
0x1074   :  { %3456 = vst.msk [vmem:[#allocation2 + $0x10] sm:$0xff] %vm101_vm2, %v3432_v26  ;;  %v3424_v43 = vadd.f32 %v6857_v60, %v3423_v13  ;;  %v3520_v17 = vadd.f32 %v6864_v53, %v3519_v51 }
0x1075   :  { %v7712_v49 = vpop.f32.mrf.mxu0  ;;  %v7724_v61 = vpop.f32.mrf.mxu1 }
0x1076   :  { %3454 = vst.msk [vmem:[#allocation2] sm:$0xff] %vm101_vm2, %v3424_v43  ;;  %v3435_v52 = vadd.f32 %v7712_v49, %v6857_v60  ;;  %v3531_v20 = vadd.f32 %v7724_v61, %v6864_v53 }
0x1077   :  { %v3426_v21 = vpop.f32.mrf.mxu0  ;;  %v3522_v40 = vpop.f32.mrf.mxu1 }
0x1078   :  { %3457 = vst.msk [vmem:[#allocation2 + $0x18] sm:$0xff] %vm101_vm2, %v3435_v52  ;;  %v3427_v18 = vadd.f32 %v6857_v60, %v3426_v21  ;;  %v10117_v11 = vpack.c.bf16 %v3531_v20, %v3528_v10  ;;  %v3523_v33 = vadd.f32 %v6864_v53, %v3522_v40 }
0x107a   :  { %3455 = vst.msk [vmem:[#allocation2 + $0x8] sm:$0xff] %vm101_vm2, %v3427_v18  ;;  %v10123_v62 = vpack.c.bf16 %v3523_v33, %v3520_v17  ;;  %v3579_v8 = vsel %vm317_vm3, %v10117_v11, 0 }
0x107c   :  { %v7715_v1 = vpop.f32.mrf.mxu0  ;;  %v7727_v48 = vpop.f32.mrf.mxu1  ;;  %v3576_v27 = vsel %vm317_vm3, %v10123_v62, 0 }
0x107d   :  { %v3448_v14 = vadd.f32 %v7715_v1, %v6857_v60  ;;  %v3544_v55 = vadd.f32 %v7727_v48, %v6864_v53 }
0x107e   :  { %v3439_v25 = vpop.f32.mrf.mxu0  ;;  %v3535_v35 = vpop.f32.mrf.mxu1 }
0x107f   :  { %3460 = vst.msk [vmem:[#allocation2 + $0x30] sm:$0xff] %vm101_vm2, %v3448_v14  ;;  %v3440_v6 = vadd.f32 %v6857_v60, %v3439_v25  ;;  %v3536_v0 = vadd.f32 %v6864_v53, %v3535_v35 }
0x1080   :  { %v7716_v22 = vpop.f32.mrf.mxu0  ;;  %v7728_v37 = vpop.f32.mrf.mxu1 }
0x1081   :  { %3458 = vst.msk [vmem:[#allocation2 + $0x20] sm:$0xff] %vm101_vm2, %v3440_v6  ;;  %v3451_v42 = vadd.f32 %v7716_v22, %v6857_v60  ;;  %v3547_v19 = vadd.f32 %v7728_v37, %v6864_v53 }
0x1082   :  { %v3442_v16 = vpop.f32.mrf.mxu0  ;;  %v3538_v36 = vpop.f32.mrf.mxu1 }
0x1083   :  { %3461 = vst.msk [vmem:[#allocation2 + $0x38] sm:$0xff] %vm101_vm2, %v3451_v42  ;;  %v10106_v59 = vpack.c.bf16 %v3547_v19, %v3544_v55  ;;  %v3443_v9 = vadd.f32 %v6857_v60, %v3442_v16  ;;  %v3539_v50 = vadd.f32 %v6864_v53, %v3538_v36 }
0x1085   :  { %3459 = vst.msk [vmem:[#allocation2 + $0x28] sm:$0xff] %vm101_vm2, %v3443_v9  ;;  %v10109_v23 = vpack.c.bf16 %v3539_v50, %v3536_v0  ;;  %8126 = vmatprep.subr.msk.bf16.mxu0 %vm317_vm3, %v10106_v59  ;;  %v3585_v2 = vsel %vm317_vm3, %v10106_v59, 0 }
0x1086   :  { %7730 = vmatpush3.bf16.xpose.msra.mxu0 %v3585_v2 }
0x1087   :  { %8127 = vmatprep.subr.msk.bf16.mxu0 %vm317_vm3, %v10109_v23  ;;  %v3582_v45 = vsel %vm317_vm3, %v10109_v23, 0 }
0x108e   :  { %7732 = vmatpush3.bf16.xpose.msra.mxu0 %v3582_v45 }
0x108f   :  { %8128 = vmatprep.subr.msk.bf16.mxu0 %vm317_vm3, %v10117_v11 }
0x1096   :  { %7734 = vmatpush3.bf16.xpose.msra.mxu0 %v3579_v8 }
0x1097   :  { %8129 = vmatprep.subr.msk.bf16.mxu0 %vm317_vm3, %v10123_v62 }
0x109e   :  { %7736 = vmatpush3.bf16.xpose.msra.mxu0 %v3576_v27 }
0x10a5   :  { %7738 = vmatmul.mubr.msk.bf16.vlgmr.msra.gmra.mxu0 %vm317_vm3, %v3558_v30 }
0x10a6   :  { %7741 = vmatprep.mubr.msk.bf16.mxu0 %vm317_vm3, %v3560_v46 }
0x10ad   :  { %7742 = vmatmul.mubr.msk.bf16.gmra.mxu0 %vm317_vm3, %v3562_v47 }
0x1165   :  { %v7739_v28 = vpop.f32.mrf.mxu0 }
0x1166   :  { %v3658_v12 = vsel %vm407_vm4, %v7739_v28, -inf }
0x1167   :  { %v3621_v41 = vpop.f32.mrf.mxu0 }
0x1168   :  { %v3652_v39 = vsel %vm407_vm4, %v3621_v41, -inf }
0x1169   :  { %3653 = vmax.xlane.f32.xlu0 %v3652_v39  ;;  %v7740_v58 = vpop.f32.mrf.mxu0 }
0x116a   :  { %v3661_v29 = vsel %vm407_vm4, %v7740_v58, -inf }
0x116b   :  { %v3624_v7 = vpop.f32.mrf.mxu0 }
0x116c   :  { %v3655_v31 = vsel %vm407_vm4, %v3624_v7, -inf }
0x116d   :  { %3659 = vmax.xlane.f32.xlu0 %v3658_v12  ;;  %3656 = vmax.xlane.f32.xlu1 %v3655_v31  ;;  %v7743_v54 = vpop.f32.mrf.mxu0 }
0x116e   :  { %v3670_v24 = vsel %vm407_vm4, %v7743_v54, -inf }
0x116f   :  { %v3637_v56 = vpop.f32.mrf.mxu0 }
0x1170   :  { %v3664_v60 = vsel %vm407_vm4, %v3637_v56, -inf }
0x1171   :  { %3662 = vmax.xlane.f32.xlu0 %v3661_v29  ;;  %v7744_v5 = vpop.f32.mrf.mxu0 }
0x1172   :  { %v3673_v3 = vsel %vm407_vm4, %v7744_v5, -inf }
0x1173   :  { %3674 = vmax.xlane.f32.xlu1 %v3673_v3  ;;  %v3640_v4 = vpop.f32.mrf.mxu0 }
0x1174   :  { %v3667_v57 = vsel %vm407_vm4, %v3640_v4, -inf }
0x1175   :  { %3671 = vmax.xlane.f32.xlu0 %v3670_v24 }
0x1177   :  { %3668 = vmax.xlane.f32.xlu1 %v3667_v57 }
0x1179   :  { %3665 = vmax.xlane.f32.xlu0 %v3664_v60 }
0x1188   :  { %3748 = vrot.lane.b32.xlu1 %v8936_v34, %s8781_s9 }
0x118c   :  { %3746 = vrot.lane.b32.xlu1 %v8944_v38, %s8781_s9 }
0x118f   :  { %3750 = vrot.lane.b32.xlu0 %v8934_v32, %s8781_s9 }
0x1190   :  { %3744 = vrot.lane.b32.xlu1 %v8950_v44, %s8781_s9 }
0x11f2   :  { %v3654_v15 = vpop.xlane.xlu0 %3653 }
0x11f3   :  { %v3676_v63 = vsub.f32 %v3621_v41, %v3654_v15 }
0x11f5   :  { %v3684_v43 = vmul.f32 1.442695, %v3676_v63 }
0x11f6   :  { %v3660_v26 = vpop.xlane.xlu0 %3659  ;;  %v3657_v13 = vpop.xlane.xlu1 %3656 }
0x11f7   :  { %v3678_v51 = vsub.f32 %v7739_v28, %v3660_v26  ;;  %v3677_v52 = vsub.f32 %v3624_v7, %v3657_v13 }
0x11f9   :  { %v3688_v49 = vmul.f32 1.442695, %v3678_v51  ;;  %v3686_v40 = vmul.f32 1.442695, %v3677_v52 }
0x11fa   :  { %v3663_v61 = vpop.xlane.xlu0 %3662 }
0x11fb   :  { %8466 = vpow2.f32 %v3688_v49  ;;  %v3679_v21 = vsub.f32 %v7740_v58, %v3663_v61 }
0x11fc   :  { %v3675_v18 = vpop.xlane.xlu1 %3674  ;;  %8468 = vpow2.f32 %v3684_v43 }
0x11fd   :  { %v3690_v1 = vmul.f32 1.442695, %v3679_v21  ;;  %v3683_v48 = vsub.f32 %v7744_v5, %v3675_v18 }
0x11fe   :  { %v3672_v14 = vpop.xlane.xlu0 %3671 }
0x11ff   :  { %8470 = vpow2.f32 %v3690_v1  ;;  %v3682_v25 = vsub.f32 %v7743_v54, %v3672_v14  ;;  %v3698_v6 = vmul.f32 1.442695, %v3683_v48 }
0x1200   :  { %v3669_v35 = vpop.xlane.xlu1 %3668  ;;  %8472 = vpow2.f32 %v3686_v40 }
0x1201   :  { %v3696_v53 = vmul.f32 1.442695, %v3682_v25  ;;  %v3681_v22 = vsub.f32 %v3640_v4, %v3669_v35 }
0x1202   :  { %v3666_v37 = vpop.xlane.xlu0 %3665 }
0x1203   :  { %8474 = vpow2.f32 %v3696_v53  ;;  %v3680_v55 = vsub.f32 %v3637_v56, %v3666_v37  ;;  %v3694_v19 = vmul.f32 1.442695, %v3681_v22 }
0x1204   :  { %v3749_v42 = vpop.permute.xlu1 %3748  ;;  %8476 = vpow2.f32 %v3698_v6 }
0x1205   :  { %v3692_v16 = vmul.f32 1.442695, %v3680_v55 }
0x1206   :  { %v3751_v36 = vpop.permute.xlu0 %3750 }
0x1207   :  { %8478 = vpow2.f32 %v3692_v16  ;;  %7745 = vmatprep.subr.bf16.mxu1 %v3751_v36 }
0x1208   :  { %v10146_v0 = vpop.eup %8466  ;;  %7746 = vmatpush3.bf16.msra.mxu1 %v3751_v36  ;;  %8480 = vpow2.f32 %v3694_v19  ;;  %v3747_v2 = vpop.permute.xlu1 %3746 }
0x1209   :  { %7747 = vmatprep.subr.bf16.mxu1 %v3749_v42  ;;  %v3706_v9 = vsel %vm407_vm4, %v10146_v0, 0.0  ;;  %v8469_v50 = vpop.eup %8468 }
0x120a   :  { %3707 = vadd.xlane.f32.xlu0 %v3706_v9  ;;  %v3700_v10 = vsel %vm407_vm4, %v8469_v50, 0.0 }
0x120c   :  { %v8471_v20 = vpop.eup %8470  ;;  %7748 = vmatpush3.bf16.msra.mxu1 %v3749_v42  ;;  %v3745_v8 = vpop.permute.xlu1 %3744 }
0x120d   :  { %7749 = vmatprep.subr.bf16.mxu1 %v3747_v2  ;;  %v3709_v45 = vsel %vm407_vm4, %v8471_v20, 0.0  ;;  %v8473_v33 = vpop.eup %8472 }
0x120e   :  { %3701 = vadd.xlane.f32.xlu0 %v3700_v10  ;;  %3710 = vadd.xlane.f32.xlu1 %v3709_v45  ;;  %v3703_v30 = vsel %vm407_vm4, %v8473_v33, 0.0 }
0x1210   :  { %v10152_v17 = vpop.eup %8474  ;;  %7750 = vmatpush3.bf16.msra.mxu1 %v3747_v2 }
0x1211   :  { %7751 = vmatprep.subr.bf16.mxu1 %v3745_v8  ;;  %v3718_v27 = vsel %vm407_vm4, %v10152_v17, 0.0  ;;  %v8477_v46 = vpop.eup %8476 }
0x1212   :  { %3719 = vadd.xlane.f32.xlu0 %v3718_v27  ;;  %3704 = vadd.xlane.f32.xlu1 %v3703_v30  ;;  %v3721_v41 = vsel %vm407_vm4, %v8477_v46, 0.0 }
0x1214   :  { %v8479_v47 = vpop.eup %8478  ;;  %7752 = vmatpush3.bf16.msra.mxu1 %v3745_v8 }
0x1215   :  { %v3712_v28 = vsel %vm407_vm4, %v8479_v47, 0.0  ;;  %v8481_v39 = vpop.eup %8480 }
0x1216   :  { %3713 = vadd.xlane.f32.xlu1 %v3712_v28  ;;  %3722 = vadd.xlane.f32.xlu0 %v3721_v41  ;;  %v3715_v58 = vsel %vm407_vm4, %v8481_v39, 0.0 }
0x121a   :  { %3716 = vadd.xlane.f32.xlu0 %v3715_v58 }
0x1227   :  { %3854 = vrot.lane.b32.xlu1 %v10109_v23, %s8767_s5 }
0x122b   :  { %3852 = vrot.lane.b32.xlu1 %v10117_v11, %s8767_s5 }
0x122f   :  { %3850 = vrot.lane.b32.xlu1 %v10123_v62, %s8767_s5 }
0x1230   :  { %3856 = vrot.lane.b32.xlu0 %v10106_v59, %s8767_s5 }
0x1233   :  { %3840 = vrot.lane.b32.xlu1 %v8944_v38, %s8768_s4 }
0x1234   :  { %3838 = vrot.lane.b32.xlu0 %v8950_v44, %s8768_s4 }
0x1237   :  { %3844 = vrot.lane.b32.xlu1 %v8934_v32, %s8768_s4 }
0x1238   :  { %3842 = vrot.lane.b32.xlu0 %v8936_v34, %s8768_s4 }
0x1293   :  { %v3708_v7 = vpop.xlane.xlu0 %3707 }
0x1297   :  { %v3702_v12 = vpop.xlane.xlu0 %3701  ;;  %v3711_v31 = vpop.xlane.xlu1 %3710 }
0x1298   :  { %8482 = vrcp.f32 %v3711_v31 }
0x1299   :  { %8484 = vrcp.f32 %v3702_v12 }
0x129a   :  { %8486 = vrcp.f32 %v3708_v7 }
0x129b   :  { %v3720_v54 = vpop.xlane.xlu0 %3719  ;;  %v3705_v56 = vpop.xlane.xlu1 %3704 }
0x129c   :  { %8488 = vrcp.f32 %v3705_v56 }
0x129f   :  { %v3723_v29 = vpop.xlane.xlu0 %3722  ;;  %v3714_v5 = vpop.xlane.xlu1 %3713 }
0x12a0   :  { %8490 = vrcp.f32 %v3723_v29 }
0x12a1   :  { %8492 = vrcp.f32 %v3714_v5 }
0x12a2   :  { %8494 = vrcp.f32 %v3720_v54 }
0x12a3   :  { %v3717_v3 = vpop.xlane.xlu0 %3716  ;;  %v3855_v1 = vpop.permute.xlu1 %3854 }
0x12a4   :  { %8496 = vrcp.f32 %v3717_v3  ;;  %v3877_v37 = vsel %vm317_vm3, %v3855_v1, 0 }
0x12a5   :  { %v8483_v4 = vpop.eup %8482 }
0x12a6   :  { %v8485_v57 = vpop.eup %8484  ;;  %v3735_v63 = vmul.f32 %v8483_v4, %v8471_v20 }
0x12a7   :  { %v3857_v24 = vpop.permute.xlu0 %3856  ;;  %v8487_v60 = vpop.eup %8486  ;;  %v3732_v26 = vmul.f32 %v8485_v57, %v8469_v50  ;;  %v3837_v50 = vld [vmem:[%s11189_s10] sm:$0x3] }
0x12a8   :  { %8130 = vmatprep.subr.msk.bf16.mxu1 %vm317_vm3, %v3857_v24  ;;  %v3734_v51 = vmul.f32 %v8487_v60, %v10146_v0  ;;  %v3880_v18 = vsel %vm317_vm3, %v3857_v24, 0  ;;  %v3853_v55 = vpop.permute.xlu1 %3852  ;;  %v4227_v2 = vsel %vm906_vm5, %v3837_v50, 0 }
0x12a9   :  { %v8489_v15 = vpop.eup %8488  ;;  %v3874_v42 = vsel %vm317_vm3, %v3853_v55, 0 }
0x12aa   :  { %v3733_v13 = vmul.f32 %v8489_v15, %v8473_v33  ;;  %v3741_v52 = vpack.c.bf16 %v3735_v63, %v3734_v51 }
0x12ab   :  { %v3839_v22 = vpop.permute.xlu0 %3838 }
0x12ac   :  { %v3740_v43 = vpack.c.bf16 %v3733_v13, %v3732_v26  ;;  %v3851_v19 = vpop.permute.xlu1 %3850 }
0x12ad   :  { %v8491_v49 = vpop.eup %8490  ;;  %v3871_v16 = vsel %vm317_vm3, %v3851_v19, 0 }
0x12ae   :  { %v8493_v61 = vpop.eup %8492  ;;  %7753 = vmatprep.mubr.msk.bf16.mxu1 %vm407_vm4, %v3740_v43  ;;  %v3739_v25 = vmul.f32 %v8491_v49, %v8477_v46 }
0x12af   :  { %v8495_v21 = vpop.eup %8494  ;;  %7754 = vmatmul.mubr.msk.bf16.vlgmr.msra.gmra.mxu1 %vm407_vm4, %v3741_v52  ;;  %v3736_v48 = vmul.f32 %v8493_v61, %v8479_v47  ;;  %v3843_v0 = vpop.permute.xlu0 %3842 }
0x12b0   :  { %7762 = vmatpush3.bf16.xpose.msra.mxu1 %v3880_v18  ;;  %v3738_v6 = vmul.f32 %v8495_v21, %v10152_v17  ;;  %v3841_v36 = vpop.permute.xlu1 %3840 }
0x12b1   :  { %v8497_v40 = vpop.eup %8496  ;;  %8131 = vmatprep.subr.msk.bf16.mxu1 %vm317_vm3, %v3855_v1 }
0x12b2   :  { %v3737_v14 = vmul.f32 %v8497_v40, %v8481_v39  ;;  %v3743_v53 = vpack.c.bf16 %v3739_v25, %v3738_v6 }
0x12b4   :  { %v3742_v35 = vpack.c.bf16 %v3737_v14, %v3736_v48  ;;  %v3845_v9 = vpop.permute.xlu1 %3844 }
0x12b6   :  { %7757 = vmatprep.mubr.msk.bf16.mxu1 %vm407_vm4, %v3742_v35 }
0x12b7   :  { %7758 = vmatmul.mubr.msk.bf16.gmra.mxu1 %vm407_vm4, %v3743_v53 }
0x12b8   :  { %7764 = vmatpush3.bf16.xpose.msra.mxu1 %v3877_v37  ;;  %7769 = vmatprep.mubr.msk.bf16.mxu1 %vm317_vm3, %v3839_v22 }
0x12b9   :  { %8132 = vmatprep.subr.msk.bf16.mxu1 %vm317_vm3, %v3853_v55 }
0x12c0   :  { %7766 = vmatpush3.bf16.xpose.msra.mxu1 %v3874_v42 }
0x12c1   :  { %8133 = vmatprep.subr.msk.bf16.mxu1 %vm317_vm3, %v3851_v19 }
0x12c8   :  { %7768 = vmatpush3.bf16.xpose.msra.mxu1 %v3871_v16 }
0x12c9   :  { %8135 = vmatprep.subr.msk.bf16.mxu1 %vm906_vm5, %v3837_v50 }
0x12cf   :  { %7770 = vmatmul.mubr.msk.bf16.vlgmr.msra.gmra.mxu1 %vm317_vm3, %v3841_v36 }
0x12d0   :  { %7773 = vmatprep.mubr.msk.bf16.mxu1 %vm317_vm3, %v3843_v0  ;;  %7804 = vmatpush3.bf16.msra.mxu1 %v4227_v2 }
0x12d7   :  { %7774 = vmatmul.mubr.msk.bf16.gmra.mxu1 %vm317_vm3, %v3845_v9 }
0x136f   :  { %v7755_v20 = vpop.f32.mrf.mxu1 }
0x1371   :  { %v3802_v10 = vpop.f32.mrf.mxu1 }
0x1373   :  { %v7756_v45 = vpop.f32.mrf.mxu1 }
0x1374   :  { %v3834_v8 = vpack.c.bf16 %v7756_v45, %v7755_v20 }
0x1375   :  { %v3805_v33 = vpop.f32.mrf.mxu1 }
0x1376   :  { %v3833_v17 = vpack.c.bf16 %v3805_v33, %v3802_v10 }
0x1377   :  { %v7759_v27 = vpop.f32.mrf.mxu1 }
0x1378   :  { %7805 = vmatprep.mubr.msk.bf16.mxu1 %vm317_vm3, %v3833_v17 }
0x1379   :  { %v3818_v30 = vpop.f32.mrf.mxu1  ;;  %7806 = vmatmul.mubr.msk.bf16.vlgmr.msra.gmra.mxu1 %vm317_vm3, %v3834_v8 }
0x137b   :  { %v7760_v46 = vpop.f32.mrf.mxu1 }
0x137c   :  { %v3836_v41 = vpack.c.bf16 %v7760_v46, %v7759_v27 }
0x137d   :  { %v3821_v47 = vpop.f32.mrf.mxu1 }
0x137e   :  { %v3835_v28 = vpack.c.bf16 %v3821_v47, %v3818_v30 }
0x1380   :  { %7809 = vmatprep.mubr.msk.bf16.mxu1 %vm317_vm3, %v3835_v28 }
0x1381   :  { %7810 = vmatmul.mubr.msk.bf16.gmra.mxu1 %vm317_vm3, %v3836_v41 }
0x138f   :  { %v7771_v39 = vpop.f32.mrf.mxu1 }
0x1390   :  { %v3953_v54 = vsel %vm407_vm4, %v7771_v39, -inf }
0x1391   :  { %v3916_v58 = vpop.f32.mrf.mxu1 }
0x1392   :  { %v3947_v7 = vsel %vm407_vm4, %v3916_v58, -inf }
0x1393   :  { %3948 = vmax.xlane.f32.xlu0 %v3947_v7  ;;  %v7772_v12 = vpop.f32.mrf.mxu1 }
0x1394   :  { %v3956_v3 = vsel %vm407_vm4, %v7772_v12, -inf }
0x1395   :  { %v3919_v31 = vpop.f32.mrf.mxu1 }
0x1396   :  { %v3950_v56 = vsel %vm407_vm4, %v3919_v31, -inf }
0x1397   :  { %3954 = vmax.xlane.f32.xlu0 %v3953_v54  ;;  %3951 = vmax.xlane.f32.xlu1 %v3950_v56  ;;  %v7775_v29 = vpop.f32.mrf.mxu1 }
0x1398   :  { %v3965_v60 = vsel %vm407_vm4, %v7775_v29, -inf }
0x1399   :  { %v3932_v5 = vpop.f32.mrf.mxu1 }
0x139a   :  { %v3959_v63 = vsel %vm407_vm4, %v3932_v5, -inf }
0x139b   :  { %3957 = vmax.xlane.f32.xlu0 %v3956_v3  ;;  %v7776_v4 = vpop.f32.mrf.mxu1 }
0x139c   :  { %v3968_v24 = vsel %vm407_vm4, %v7776_v4, -inf }
0x139d   :  { %3969 = vmax.xlane.f32.xlu1 %v3968_v24  ;;  %v3935_v57 = vpop.f32.mrf.mxu1 }
0x139e   :  { %v3962_v15 = vsel %vm407_vm4, %v3935_v57, -inf }
0x139f   :  { %3966 = vmax.xlane.f32.xlu0 %v3965_v60 }
0x13a1   :  { %3963 = vmax.xlane.f32.xlu1 %v3962_v15 }
0x13a3   :  { %3960 = vmax.xlane.f32.xlu0 %v3959_v63 }
0x13b2   :  { %4043 = vrot.lane.b32.xlu1 %v8936_v34, %s8782_s6 }
0x13b9   :  { %4045 = vrot.lane.b32.xlu0 %v8934_v32, %s8782_s6 }
0x141c   :  { %v3949_v26 = vpop.xlane.xlu0 %3948 }
0x141d   :  { %v3971_v13 = vsub.f32 %v3916_v58, %v3949_v26 }
0x141f   :  { %v3979_v52 = vmul.f32 1.442695, %v3971_v13 }
0x1420   :  { %v3955_v51 = vpop.xlane.xlu0 %3954  ;;  %v3952_v43 = vpop.xlane.xlu1 %3951 }
0x1421   :  { %v3973_v49 = vsub.f32 %v7771_v39, %v3955_v51  ;;  %v3972_v21 = vsub.f32 %v3919_v31, %v3952_v43 }
0x1423   :  { %v3983_v61 = vmul.f32 1.442695, %v3973_v49  ;;  %v3981_v48 = vmul.f32 1.442695, %v3972_v21  ;;  %v6887_v49 = vld [vmem:[%s11189_s10 + $0x2] sm:$0x3] }
0x1424   :  { %v3958_v18 = vpop.xlane.xlu0 %3957 }
0x1425   :  { %8498 = vpow2.f32 %v3983_v61  ;;  %v3974_v40 = vsub.f32 %v7772_v12, %v3958_v18 }
0x1426   :  { %v3970_v1 = vpop.xlane.xlu1 %3969  ;;  %8500 = vpow2.f32 %v3979_v52 }
0x1427   :  { %v3985_v14 = vmul.f32 1.442695, %v3974_v40  ;;  %v3978_v42 = vsub.f32 %v7776_v4, %v3970_v1  ;;  %v4147_v40 = vsel %vm906_vm5, %v6887_v49, 0 }
0x1428   :  { %v3967_v25 = vpop.xlane.xlu0 %3966 }
0x1429   :  { %8502 = vpow2.f32 %v3985_v14  ;;  %v3977_v6 = vsub.f32 %v7775_v29, %v3967_v25  ;;  %v3993_v50 = vmul.f32 1.442695, %v3978_v42 }
0x142a   :  { %v3964_v35 = vpop.xlane.xlu1 %3963  ;;  %8504 = vpow2.f32 %v3981_v48 }
0x142b   :  { %v3976_v53 = vsub.f32 %v3935_v57, %v3964_v35  ;;  %v3991_v19 = vmul.f32 1.442695, %v3977_v6 }
0x142c   :  { %v3961_v22 = vpop.xlane.xlu0 %3960 }
0x142d   :  { %v3989_v37 = vmul.f32 1.442695, %v3976_v53  ;;  %v3975_v55 = vsub.f32 %v3932_v5, %v3961_v22 }
0x142e   :  { %v4044_v9 = vpop.permute.xlu1 %4043 }
0x142f   :  { %8506 = vpow2.f32 %v3989_v37  ;;  %v3987_v16 = vmul.f32 1.442695, %v3975_v55 }
0x1430   :  { %v4046_v36 = vpop.permute.xlu0 %4045 }
0x1431   :  { %8508 = vpow2.f32 %v3987_v16  ;;  %7777 = vmatprep.subr.bf16.mxu0 %v4046_v36 }
0x1432   :  { %v10215_v0 = vpop.eup %8498  ;;  %7778 = vmatpush3.bf16.msra.mxu0 %v4046_v36  ;;  %8510 = vpow2.f32 %v3991_v19 }
0x1433   :  { %7779 = vmatprep.subr.bf16.mxu0 %v4044_v9  ;;  %v4001_v2 = vsel %vm407_vm4, %v10215_v0, 0.0  ;;  %v10219_v20 = vpop.eup %8500  ;;  %8512 = vpow2.f32 %v3993_v50 }
0x1434   :  { %4002 = vadd.xlane.f32.xlu0 %v4001_v2  ;;  %v3995_v45 = vsel %vm407_vm4, %v10219_v20, 0.0 }
0x1436   :  { %v10221_v10 = vpop.eup %8502  ;;  %7780 = vmatpush3.bf16.msra.mxu0 %v4044_v9 }
0x1437   :  { %v4004_v33 = vsel %vm407_vm4, %v10221_v10, 0.0  ;;  %v8505_v17 = vpop.eup %8504 }
0x1438   :  { %3996 = vadd.xlane.f32.xlu0 %v3995_v45  ;;  %4005 = vadd.xlane.f32.xlu1 %v4004_v33  ;;  %v3998_v8 = vsel %vm407_vm4, %v8505_v17, 0.0 }
0x143c   :  { %v10228_v27 = vpop.eup %8506  ;;  %3999 = vadd.xlane.f32.xlu1 %v3998_v8 }
0x143d   :  { %v4010_v30 = vsel %vm407_vm4, %v10228_v27, 0.0 }
0x143e   :  { %v10232_v46 = vpop.eup %8508  ;;  %4011 = vadd.xlane.f32.xlu0 %v4010_v30 }
0x143f   :  { %v4007_v47 = vsel %vm407_vm4, %v10232_v46, 0.0  ;;  %v10236_v28 = vpop.eup %8510 }
0x1440   :  { %4008 = vadd.xlane.f32.xlu1 %v4007_v47  ;;  %v4013_v41 = vsel %vm407_vm4, %v10236_v28, 0.0  ;;  %v10240_v39 = vpop.eup %8512 }
0x1441   :  { %v4016_v58 = vsel %vm407_vm4, %v10240_v39, 0.0 }
0x1444   :  { %4014 = vadd.xlane.f32.xlu1 %v4013_v41 }
0x1448   :  { %4017 = vadd.xlane.f32.xlu1 %v4016_v58 }
0x1454   :  { %4041 = vrot.lane.b32.xlu0 %v8944_v38, %s8782_s6 }
0x1458   :  { %4308 = vrot.lane.b32.xlu0 %v10106_v59, %s8769_s20 }
0x1459   :  { %4039 = vrot.lane.b32.xlu1 %v8950_v44, %s8782_s6 }
0x145c   :  { %4304 = vrot.lane.b32.xlu0 %v10117_v11, %s8769_s20 }
0x145d   :  { %4306 = vrot.lane.b32.xlu1 %v10109_v23, %s8769_s20 }
0x1460   :  { %4294 = vrot.lane.b32.xlu0 %v8950_v44, %s8771_s26 }
0x1461   :  { %4302 = vrot.lane.b32.xlu1 %v10123_v62, %s8769_s20 }
0x1464   :  { %4298 = vrot.lane.b32.xlu0 %v8936_v34, %s8771_s26 }
0x1465   :  { %4296 = vrot.lane.b32.xlu1 %v8944_v38, %s8771_s26 }
0x1468   :  { %4688 = vrot.lane.b32.xlu0 %v10106_v59, %s8770_s21 }
0x1469   :  { %4300 = vrot.lane.b32.xlu1 %v8934_v32, %s8771_s26  ;;  %s8783_s26 = smov 56  }
0x146c   :  { %4684 = vrot.lane.b32.xlu0 %v10117_v11, %s8770_s21 }
0x146d   :  { %4686 = vrot.lane.b32.xlu1 %v10109_v23, %s8770_s21 }
0x1470   :  { %4674 = vrot.lane.b32.xlu0 %v8950_v44, %s8773_s29 }
0x1471   :  { %4682 = vrot.lane.b32.xlu1 %v10123_v62, %s8770_s21 }
0x1474   :  { %4678 = vrot.lane.b32.xlu0 %v8936_v34, %s8773_s29 }
0x1475   :  { %4676 = vrot.lane.b32.xlu1 %v8944_v38, %s8773_s29 }
0x1479   :  { %4680 = vrot.lane.b32.xlu1 %v8934_v32, %s8773_s29 }
0x14bd   :  { %v4003_v7 = vpop.xlane.xlu0 %4002 }
0x14c1   :  { %v3997_v12 = vpop.xlane.xlu0 %3996  ;;  %v4006_v31 = vpop.xlane.xlu1 %4005 }
0x14c2   :  { %8514 = vrcp.f32 %v3997_v12 }
0x14c3   :  { %8516 = vrcp.f32 %v4006_v31 }
0x14c4   :  { %8518 = vrcp.f32 %v4003_v7 }
0x14c5   :  { %v4000_v54 = vpop.xlane.xlu1 %3999 }
0x14c6   :  { %8520 = vrcp.f32 %v4000_v54 }
0x14c7   :  { %v4012_v56 = vpop.xlane.xlu0 %4011 }
0x14c8   :  { %8522 = vrcp.f32 %v4012_v56 }
0x14c9   :  { %v4009_v29 = vpop.xlane.xlu1 %4008 }
0x14ca   :  { %8524 = vrcp.f32 %v4009_v29 }
0x14cb   :  { %v4042_v5 = vpop.permute.xlu0 %4041 }
0x14cc   :  { %7781 = vmatprep.subr.bf16.mxu0 %v4042_v5 }
0x14cd   :  { %7782 = vmatpush3.bf16.msra.mxu0 %v4042_v5  ;;  %v4015_v3 = vpop.xlane.xlu1 %4014 }
0x14ce   :  { %8526 = vrcp.f32 %v4015_v3 }
0x14cf   :  { %v8515_v4 = vpop.eup %8514  ;;  %v4309_v25 = vpop.permute.xlu0 %4308 }
0x14d0   :  { %v8517_v24 = vpop.eup %8516  ;;  %v4027_v26 = vmul.f32 %v8515_v4, %v10219_v20  ;;  %v4332_v50 = vsel %vm317_vm3, %v4309_v25, 0 }
0x14d1   :  { %v4018_v57 = vpop.xlane.xlu1 %4017  ;;  %v8519_v60 = vpop.eup %8518  ;;  %v4030_v63 = vmul.f32 %v8517_v24, %v10221_v10 }
0x14d2   :  { %8528 = vrcp.f32 %v4018_v57  ;;  %v4029_v52 = vmul.f32 %v8519_v60, %v10215_v0 }
0x14d3   :  { %v8521_v15 = vpop.eup %8520  ;;  %v4305_v10 = vpop.permute.xlu0 %4304 }
0x14d4   :  { %v4028_v13 = vmul.f32 %v8521_v15, %v8505_v17  ;;  %v4036_v18 = vpack.c.bf16 %v4030_v63, %v4029_v52  ;;  %v4326_v47 = vsel %vm317_vm3, %v4305_v10, 0 }
0x14d5   :  { %v8523_v51 = vpop.eup %8522  ;;  %v4040_v43 = vpop.permute.xlu1 %4039 }
0x14d6   :  { %7783 = vmatprep.subr.bf16.mxu0 %v4040_v43  ;;  %v4035_v61 = vpack.c.bf16 %v4028_v13, %v4027_v26  ;;  %v4032_v48 = vmul.f32 %v8523_v51, %v10228_v27 }
0x14d7   :  { %v8525_v21 = vpop.eup %8524  ;;  %7784 = vmatpush3.bf16.msra.mxu0 %v4040_v43  ;;  %v4295_v30 = vpop.permute.xlu0 %4294 }
0x14d8   :  { %7785 = vmatprep.mubr.msk.bf16.mxu0 %vm407_vm4, %v4035_v61  ;;  %8134 = vmatprep.subr.msk.bf16.mxu0 %vm906_vm5, %v6887_v49  ;;  %v4031_v1 = vmul.f32 %v8525_v21, %v10232_v46 }
0x14d9   :  { %v4307_v2 = vpop.permute.xlu1 %4306 }
0x14da   :  { %7786 = vmatmul.mubr.msk.bf16.vlgmr.msra.gmra.mxu0 %vm407_vm4, %v4036_v18  ;;  %v4037_v14 = vpack.c.bf16 %v4032_v48, %v4031_v1  ;;  %v4329_v27 = vsel %vm317_vm3, %v4307_v2, 0 }
0x14db   :  { %7794 = vmatpush3.bf16.msra.mxu0 %v4147_v40  ;;  %v8527_v35 = vpop.eup %8526 }
0x14dc   :  { %7789 = vmatprep.mubr.msk.bf16.mxu0 %vm407_vm4, %v4037_v14  ;;  %8136 = vmatprep.subr.msk.bf16.mxu0 %vm317_vm3, %v4309_v25  ;;  %v4033_v53 = vmul.f32 %v8527_v35, %v10236_v28  ;;  %v4299_v28 = vpop.permute.xlu0 %4298 }
0x14dd   :  { %v4303_v46 = vpop.permute.xlu1 %4302 }
0x14df   :  { %v8529_v6 = vpop.eup %8528 }
0x14e0   :  { %v4034_v22 = vmul.f32 %v8529_v6, %v10240_v39  ;;  %v4323_v39 = vsel %vm317_vm3, %v4303_v46, 0  ;;  %v4689_v58 = vpop.permute.xlu0 %4688 }
0x14e1   :  { %v4297_v41 = vpop.permute.xlu1 %4296  ;;  %v4712_v12 = vsel %vm317_vm3, %v4689_v58, 0 }
0x14e2   :  { %v4038_v37 = vpack.c.bf16 %v4034_v22, %v4033_v53 }
0x14e4   :  { %7790 = vmatmul.mubr.msk.bf16.gmra.mxu0 %vm407_vm4, %v4038_v37  ;;  %v4685_v54 = vpop.permute.xlu0 %4684 }
0x14e5   :  { %v4301_v7 = vpop.permute.xlu1 %4300  ;;  %v4706_v5 = vsel %vm317_vm3, %v4685_v54, 0 }
0x14e8   :  { %v4675_v56 = vpop.permute.xlu0 %4674 }
0x14e9   :  { %v4687_v31 = vpop.permute.xlu1 %4686 }
0x14ea   :  { %v4709_v29 = vsel %vm317_vm3, %v4687_v31, 0 }
0x14ec   :  { %v4679_v57 = vpop.permute.xlu0 %4678 }
0x14ed   :  { %v4683_v3 = vpop.permute.xlu1 %4682 }
0x14ee   :  { %v4703_v4 = vsel %vm317_vm3, %v4683_v3, 0 }
0x14f1   :  { %v4677_v24 = vpop.permute.xlu1 %4676 }
0x14f5   :  { %v4681_v60 = vpop.permute.xlu1 %4680 }
0x159a   :  { %v7787_v55 = vpop.f32.mrf.mxu0 }
0x159c   :  { %v4097_v42 = vpop.f32.mrf.mxu0 }
0x159e   :  { %v7788_v19 = vpop.f32.mrf.mxu0 }
0x159f   :  { %v4129_v0 = vpack.c.bf16 %v7788_v19, %v7787_v55 }
0x15a0   :  { %v4100_v16 = vpop.f32.mrf.mxu0 }
0x15a1   :  { %v4128_v36 = vpack.c.bf16 %v4100_v16, %v4097_v42 }
0x15a3   :  { %7795 = vmatprep.mubr.msk.bf16.mxu0 %vm317_vm3, %v4128_v36 }
0x15a4   :  { %v7791_v9 = vpop.f32.mrf.mxu0  ;;  %7796 = vmatmul.mubr.msk.bf16.vlgmr.msra.gmra.mxu0 %vm317_vm3, %v4129_v0 }
0x15a5   :  { %7814 = vmatpush3.bf16.xpose.msra.mxu0 %v4332_v50 }
0x15a6   :  { %8137 = vmatprep.subr.msk.bf16.mxu0 %vm317_vm3, %v4307_v2  ;;  %v4113_v20 = vpop.f32.mrf.mxu0 }
0x15a8   :  { %v7792_v45 = vpop.f32.mrf.mxu0 }
0x15a9   :  { %v4131_v8 = vpack.c.bf16 %v7792_v45, %v7791_v9 }
0x15aa   :  { %v4116_v33 = vpop.f32.mrf.mxu0 }
0x15ab   :  { %v4130_v17 = vpack.c.bf16 %v4116_v33, %v4113_v20 }
0x15ad   :  { %7816 = vmatpush3.bf16.xpose.msra.mxu0 %v4329_v27  ;;  %7799 = vmatprep.mubr.msk.bf16.mxu0 %vm317_vm3, %v4130_v17 }
0x15ae   :  { %8138 = vmatprep.subr.msk.bf16.mxu0 %vm317_vm3, %v4305_v10  ;;  %7800 = vmatmul.mubr.msk.bf16.gmra.mxu0 %vm317_vm3, %v4131_v8 }
0x15af   :  { %7821 = vmatprep.mubr.msk.bf16.mxu0 %vm317_vm3, %v4295_v30 }
0x15b5   :  { %7818 = vmatpush3.bf16.xpose.msra.mxu0 %v4326_v47 }
0x15b6   :  { %8139 = vmatprep.subr.msk.bf16.mxu0 %vm317_vm3, %v4303_v46 }
0x15bd   :  { %7820 = vmatpush3.bf16.xpose.msra.mxu0 %v4323_v39 }
0x15be   :  { %8141 = vmatprep.subr.msk.bf16.mxu0 %vm317_vm3, %v4689_v58 }
0x15c4   :  { %7822 = vmatmul.mubr.msk.bf16.vlgmr.msra.gmra.mxu0 %vm317_vm3, %v4297_v41 }
0x15c5   :  { %7825 = vmatprep.mubr.msk.bf16.mxu0 %vm317_vm3, %v4299_v28  ;;  %7856 = vmatpush3.bf16.xpose.msra.mxu0 %v4712_v12 }
0x15c6   :  { %8142 = vmatprep.subr.msk.bf16.mxu0 %vm317_vm3, %v4687_v31 }
0x15cc   :  { %7826 = vmatmul.mubr.msk.bf16.gmra.mxu0 %vm317_vm3, %v4301_v7 }
0x15cd   :  { %7858 = vmatpush3.bf16.xpose.msra.mxu0 %v4709_v29  ;;  %7863 = vmatprep.mubr.msk.bf16.mxu0 %vm317_vm3, %v4675_v56 }
0x15ce   :  { %8143 = vmatprep.subr.msk.bf16.mxu0 %vm317_vm3, %v4685_v54 }
0x15d5   :  { %7860 = vmatpush3.bf16.xpose.msra.mxu0 %v4706_v5 }
0x15d6   :  { %8144 = vmatprep.subr.msk.bf16.mxu0 %vm317_vm3, %v4683_v3 }
0x15dd   :  { %7862 = vmatpush3.bf16.xpose.msra.mxu0 %v4703_v4 }
0x15e4   :  { %7864 = vmatmul.mubr.msk.bf16.vlgmr.msra.gmra.mxu0 %vm317_vm3, %v4677_v24 }
0x15e5   :  { %7867 = vmatprep.mubr.msk.bf16.mxu0 %vm317_vm3, %v4679_v57 }
0x15ec   :  { %7868 = vmatmul.mubr.msk.bf16.gmra.mxu0 %vm317_vm3, %v4681_v60 }
0x1664   :  { %v10324_v15 = vpop.f32.mrf.mxu0 }
0x1666   :  { %v10326_v63 = vpop.f32.mrf.mxu0 }
0x1668   :  { %v10328_v26 = vpop.f32.mrf.mxu0 }
0x166a   :  { %v10330_v13 = vpop.f32.mrf.mxu0 }
0x166e   :  { %v10332_v51 = vpop.f32.mrf.mxu0 }
0x1670   :  { %v10334_v43 = vpop.f32.mrf.mxu0 }
0x1672   :  { %v10336_v49 = vpop.f32.mrf.mxu0 }
0x1674   :  { %v10338_v52 = vpop.f32.mrf.mxu0 }
0x1684   :  { %v7823_v61 = vpop.f32.mrf.mxu0 }
0x1685   :  { %v4405_v48 = vsel %vm407_vm4, %v7823_v61, -inf }
0x1686   :  { %v4368_v21 = vpop.f32.mrf.mxu0 }
0x1687   :  { %v4399_v18 = vsel %vm407_vm4, %v4368_v21, -inf }
0x1688   :  { %4400 = vmax.xlane.f32.xlu0 %v4399_v18  ;;  %v7824_v40 = vpop.f32.mrf.mxu0 }
0x1689   :  { %v4408_v6 = vsel %vm407_vm4, %v7824_v40, -inf }
0x168a   :  { %v4371_v1 = vpop.f32.mrf.mxu0 }
0x168b   :  { %v4402_v14 = vsel %vm407_vm4, %v4371_v1, -inf }
0x168c   :  { %4406 = vmax.xlane.f32.xlu0 %v4405_v48  ;;  %4403 = vmax.xlane.f32.xlu1 %v4402_v14  ;;  %v7827_v25 = vpop.f32.mrf.mxu0 }
0x168d   :  { %v4417_v42 = vsel %vm407_vm4, %v7827_v25, -inf }
0x168e   :  { %v4384_v35 = vpop.f32.mrf.mxu0 }
0x168f   :  { %v4411_v37 = vsel %vm407_vm4, %v4384_v35, -inf }
0x1690   :  { %4409 = vmax.xlane.f32.xlu0 %v4408_v6  ;;  %v7828_v53 = vpop.f32.mrf.mxu0 }
0x1691   :  { %v4420_v19 = vsel %vm407_vm4, %v7828_v53, -inf }
0x1692   :  { %v4387_v22 = vpop.f32.mrf.mxu0 }
0x1693   :  { %v4414_v55 = vsel %vm407_vm4, %v4387_v22, -inf }
0x1694   :  { %4412 = vmax.xlane.f32.xlu0 %v4411_v37  ;;  %4415 = vmax.xlane.f32.xlu1 %v4414_v55 }
0x1698   :  { %4418 = vmax.xlane.f32.xlu0 %v4417_v42  ;;  %4421 = vmax.xlane.f32.xlu1 %v4420_v19 }
0x1711   :  { %v4401_v16 = vpop.xlane.xlu0 %4400 }
0x1712   :  { %v4423_v36 = vsub.f32 %v4368_v21, %v4401_v16 }
0x1714   :  { %v4431_v2 = vmul.f32 1.442695, %v4423_v36 }
0x1715   :  { %v4407_v0 = vpop.xlane.xlu0 %4406  ;;  %v4404_v9 = vpop.xlane.xlu1 %4403 }
0x1716   :  { %v4425_v50 = vsub.f32 %v7823_v61, %v4407_v0  ;;  %v4424_v10 = vsub.f32 %v4371_v1, %v4404_v9 }
0x1718   :  { %v4435_v20 = vmul.f32 1.442695, %v4425_v50  ;;  %v4433_v17 = vmul.f32 1.442695, %v4424_v10 }
0x1719   :  { %v4410_v45 = vpop.xlane.xlu0 %4409 }
0x171a   :  { %8530 = vpow2.f32 %v4435_v20  ;;  %v4426_v33 = vsub.f32 %v7824_v40, %v4410_v45 }
0x171b   :  { %8532 = vpow2.f32 %v4431_v2 }
0x171c   :  { %v4437_v8 = vmul.f32 1.442695, %v4426_v33 }
0x171d   :  { %v4413_v27 = vpop.xlane.xlu0 %4412  ;;  %v4416_v57 = vpop.xlane.xlu1 %4415 }
0x171e   :  { %8534 = vpow2.f32 %v4437_v8  ;;  %v4427_v30 = vsub.f32 %v4384_v35, %v4413_v27  ;;  %v4428_v21 = vsub.f32 %v4387_v22, %v4416_v57  ;;  %v10391_v35 = vpop.f32.mrf.mxu0 }
0x171f   :  { %8536 = vpow2.f32 %v4433_v17  ;;  %v4785_v55 = vsel %vm407_vm4, %v10391_v35, -inf }
0x1720   :  { %v4439_v28 = vmul.f32 1.442695, %v4427_v30  ;;  %v4441_v40 = vmul.f32 1.442695, %v4428_v21  ;;  %v10393_v6 = vpop.f32.mrf.mxu0 }
0x1721   :  { %v4419_v46 = vpop.xlane.xlu0 %4418  ;;  %v4422_v60 = vpop.xlane.xlu1 %4421  ;;  %v4779_v22 = vsel %vm407_vm4, %v10393_v6, -inf }
0x1722   :  { %v4429_v47 = vsub.f32 %v7827_v25, %v4419_v46  ;;  %v4430_v61 = vsub.f32 %v7828_v53, %v4422_v60  ;;  %v10395_v53 = vpop.f32.mrf.mxu0 }
0x1723   :  { %v4788_v19 = vsel %vm407_vm4, %v10395_v53, -inf }
0x1724   :  { %v4443_v41 = vmul.f32 1.442695, %v4429_v47  ;;  %v4445_v18 = vmul.f32 1.442695, %v4430_v61  ;;  %v10399_v37 = vpop.f32.mrf.mxu0 }
0x1725   :  { %v4782_v2 = vsel %vm407_vm4, %v10399_v37, -inf }
0x1726   :  { %8538 = vpow2.f32 %v4443_v41  ;;  %v10404_v42 = vpop.f32.mrf.mxu0 }
0x1727   :  { %v10348_v39 = vpop.eup %8530  ;;  %8540 = vpow2.f32 %v4439_v28  ;;  %v4797_v0 = vsel %vm407_vm4, %v10404_v42, -inf }
0x1728   :  { %v4453_v58 = vsel %vm407_vm4, %v10348_v39, 0.0  ;;  %v10352_v7 = vpop.eup %8532  ;;  %8542 = vpow2.f32 %v4445_v18  ;;  %v10410_v16 = vpop.f32.mrf.mxu0 }
0x1729   :  { %4454 = vadd.xlane.f32.xlu0 %v4453_v58  ;;  %v4447_v31 = vsel %vm407_vm4, %v10352_v7, 0.0  ;;  %8544 = vpow2.f32 %v4441_v40  ;;  %v4791_v36 = vsel %vm407_vm4, %v10410_v16, -inf }
0x172a   :  { %v10422_v9 = vpop.f32.mrf.mxu0 }
0x172b   :  { %v10354_v12 = vpop.eup %8534  ;;  %v4800_v8 = vsel %vm407_vm4, %v10422_v9, -inf }
0x172c   :  { %v4456_v54 = vsel %vm407_vm4, %v10354_v12, 0.0  ;;  %v10360_v56 = vpop.eup %8536  ;;  %v10426_v20 = vpop.f32.mrf.mxu0 }
0x172d   :  { %4448 = vadd.xlane.f32.xlu0 %v4447_v31  ;;  %4457 = vadd.xlane.f32.xlu1 %v4456_v54  ;;  %v4450_v29 = vsel %vm407_vm4, %v10360_v56, 0.0  ;;  %v4794_v33 = vsel %vm407_vm4, %v10426_v20, -inf }
0x1731   :  { %4451 = vadd.xlane.f32.xlu1 %v4450_v29 }
0x1733   :  { %v10364_v5 = vpop.eup %8538 }
0x1734   :  { %v4465_v3 = vsel %vm407_vm4, %v10364_v5, 0.0  ;;  %v10368_v4 = vpop.eup %8540 }
0x1735   :  { %4466 = vadd.xlane.f32.xlu0 %v4465_v3  ;;  %v4459_v24 = vsel %vm407_vm4, %v10368_v4, 0.0  ;;  %v10383_v1 = vpop.eup %8542 }
0x1736   :  { %v4468_v48 = vsel %vm407_vm4, %v10383_v1, 0.0  ;;  %v10387_v14 = vpop.eup %8544 }
0x1737   :  { %v4462_v25 = vsel %vm407_vm4, %v10387_v14, 0.0 }
0x1739   :  { %4460 = vadd.xlane.f32.xlu0 %v4459_v24 }
0x1742   :  { %4495 = vrot.lane.b32.xlu1 %v8936_v34, %s8783_s26 }
0x1746   :  { %4493 = vrot.lane.b32.xlu1 %v8944_v38, %s8783_s26 }
0x174f   :  { %4497 = vrot.lane.b32.xlu0 %v8934_v32, %s8783_s26 }
0x1753   :  { %5068 = vrot.lane.b32.xlu0 %v10106_v59, %s8772_s27 }
0x1757   :  { %5064 = vrot.lane.b32.xlu0 %v10117_v11, %s8772_s27 }
0x175b   :  { %5054 = vrot.lane.b32.xlu0 %v8950_v44, %s8775_s19 }
0x175f   :  { %5058 = vrot.lane.b32.xlu0 %v8936_v34, %s8775_s19 }
0x176a   :  { %4469 = vadd.xlane.f32.xlu1 %v4468_v48 }
0x176e   :  { %4463 = vadd.xlane.f32.xlu1 %v4462_v25 }
0x177e   :  { %4780 = vmax.xlane.f32.xlu0 %v4779_v22 }
0x177f   :  { %4491 = vrot.lane.b32.xlu1 %v8950_v44, %s8783_s26 }
0x1782   :  { %4786 = vmax.xlane.f32.xlu0 %v4785_v55 }
0x1783   :  { %5066 = vrot.lane.b32.xlu1 %v10109_v23, %s8772_s27 }
0x1786   :  { %4789 = vmax.xlane.f32.xlu0 %v4788_v19 }
0x1787   :  { %5062 = vrot.lane.b32.xlu1 %v10123_v62, %s8772_s27 }
0x178a   :  { %4792 = vmax.xlane.f32.xlu0 %v4791_v36 }
0x178b   :  { %5056 = vrot.lane.b32.xlu1 %v8944_v38, %s8775_s19 }
0x178e   :  { %4798 = vmax.xlane.f32.xlu0 %v4797_v0 }
0x178f   :  { %5060 = vrot.lane.b32.xlu1 %v8934_v32, %s8775_s19  ;;  %s8784_s19 = smov 52  }
0x17b2   :  { %v4455_v50 = vpop.xlane.xlu0 %4454 }
0x17b3   :  { %4783 = vmax.xlane.f32.xlu1 %v4782_v2 }
0x17b6   :  { %v4449_v10 = vpop.xlane.xlu0 %4448  ;;  %v4458_v45 = vpop.xlane.xlu1 %4457 }
0x17b7   :  { %4795 = vmax.xlane.f32.xlu1 %v4794_v33  ;;  %8546 = vrcp.f32 %v4449_v10 }
0x17ba   :  { %v4452_v17 = vpop.xlane.xlu1 %4451 }
0x17bb   :  { %8548 = vrcp.f32 %v4452_v17  ;;  %4801 = vmax.xlane.f32.xlu1 %v4800_v8 }
0x17bc   :  { %8550 = vrcp.f32 %v4458_v45 }
0x17bd   :  { %8552 = vrcp.f32 %v4455_v50 }
0x17be   :  { %v4467_v27 = vpop.xlane.xlu0 %4466  ;;  %v4496_v47 = vpop.permute.xlu1 %4495 }
0x17c2   :  { %v4461_v30 = vpop.xlane.xlu0 %4460  ;;  %v4494_v24 = vpop.permute.xlu1 %4493 }
0x17c4   :  { %v8547_v46 = vpop.eup %8546 }
0x17c5   :  { %v4479_v58 = vmul.f32 %v8547_v46, %v10352_v7 }
0x17c6   :  { %v4498_v28 = vpop.permute.xlu0 %4497 }
0x17c7   :  { %7829 = vmatprep.subr.bf16.mxu1 %v4498_v28 }
0x17c8   :  { %v8549_v41 = vpop.eup %8548  ;;  %7830 = vmatpush3.bf16.msra.mxu1 %v4498_v28 }
0x17c9   :  { %7831 = vmatprep.subr.bf16.mxu1 %v4496_v47  ;;  %v4480_v31 = vmul.f32 %v8549_v41, %v10360_v56  ;;  %v8551_v56 = vpop.eup %8550 }
0x17ca   :  { %v5069_v54 = vpop.permute.xlu0 %5068  ;;  %v8553_v21 = vpop.eup %8552  ;;  %v4482_v18 = vmul.f32 %v8551_v56, %v10354_v12 }
0x17cb   :  { %8146 = vmatprep.subr.msk.bf16.mxu0 %vm317_vm3, %v5069_v54  ;;  %v5092_v29 = vsel %vm317_vm3, %v5069_v54, 0  ;;  %v4487_v3 = vpack.c.bf16 %v4480_v31, %v4479_v58  ;;  %v4481_v48 = vmul.f32 %v8553_v21, %v10348_v39 }
0x17cc   :  { %7832 = vmatpush3.bf16.msra.mxu1 %v4496_v47  ;;  %7898 = vmatpush3.bf16.xpose.msra.mxu0 %v5092_v29 }
0x17cd   :  { %7833 = vmatprep.subr.bf16.mxu1 %v4494_v24  ;;  %7837 = vmatprep.mubr.msk.bf16.mxu1 %vm407_vm4, %v4487_v3  ;;  %v4488_v25 = vpack.c.bf16 %v4482_v18, %v4481_v48  ;;  %v6904_v48 = vld [vmem:[%s11189_s10 + $0x4] sm:$0x3] }
0x17ce   :  { %v5065_v57 = vpop.permute.xlu0 %5064 }
0x17cf   :  { %v5086_v17 = vsel %vm317_vm3, %v5065_v57, 0 }
0x17d0   :  { %7834 = vmatpush3.bf16.msra.mxu1 %v4494_v24 }
0x17d2   :  { %v5055_v60 = vpop.permute.xlu0 %5054 }
0x17d3   :  { %7905 = vmatprep.mubr.msk.bf16.mxu0 %vm317_vm3, %v5055_v60 }
0x17d6   :  { %v5059_v0 = vpop.permute.xlu0 %5058 }
0x17f3   :  { %v4470_v7 = vpop.xlane.xlu1 %4469 }
0x17f4   :  { %8554 = vrcp.f32 %v4470_v7 }
0x17f5   :  { %8556 = vrcp.f32 %v4461_v30 }
0x17f6   :  { %8558 = vrcp.f32 %v4467_v27 }
0x17f7   :  { %v4464_v61 = vpop.xlane.xlu1 %4463 }
0x17f8   :  { %8560 = vrcp.f32 %v4464_v61 }
0x17fb   :  { %v4492_v40 = vpop.permute.xlu1 %4491 }
0x17fc   :  { %7835 = vmatprep.subr.bf16.mxu1 %v4492_v40 }
0x17fd   :  { %7836 = vmatpush3.bf16.msra.mxu1 %v4492_v40 }
0x17fe   :  { %8140 = vmatprep.subr.msk.bf16.mxu1 %vm906_vm5, %v6904_v48 }
0x17ff   :  { %v5067_v22 = vpop.permute.xlu1 %5066 }
0x1800   :  { %7838 = vmatmul.mubr.msk.bf16.vlgmr.msra.gmra.mxu1 %vm407_vm4, %v4488_v25  ;;  %8147 = vmatprep.subr.msk.bf16.mxu0 %vm317_vm3, %v5067_v22  ;;  %v5089_v55 = vsel %vm317_vm3, %v5067_v22, 0  ;;  %v4599_v22 = vsel %vm906_vm5, %v6904_v48, 0 }
0x1801   :  { %7900 = vmatpush3.bf16.xpose.msra.mxu0 %v5089_v55  ;;  %v8555_v19 = vpop.eup %8554  ;;  %7846 = vmatpush3.bf16.msra.mxu1 %v4599_v22 }
0x1802   :  { %8148 = vmatprep.subr.msk.bf16.mxu0 %vm317_vm3, %v5065_v57  ;;  %v8557_v36 = vpop.eup %8556  ;;  %v4486_v39 = vmul.f32 %v8555_v19, %v10383_v1 }
0x1803   :  { %v8559_v12 = vpop.eup %8558  ;;  %v4483_v2 = vmul.f32 %v8557_v36, %v10368_v4  ;;  %v5063_v27 = vpop.permute.xlu1 %5062 }
0x1804   :  { %v4485_v33 = vmul.f32 %v8559_v12, %v10364_v5  ;;  %v5083_v41 = vsel %vm317_vm3, %v5063_v27, 0 }
0x1805   :  { %v8561_v50 = vpop.eup %8560 }
0x1806   :  { %v4484_v10 = vmul.f32 %v8561_v50, %v10387_v14  ;;  %v4490_v30 = vpack.c.bf16 %v4486_v39, %v4485_v33 }
0x1807   :  { %v4781_v45 = vpop.xlane.xlu0 %4780  ;;  %v5057_v54 = vpop.permute.xlu1 %5056 }
0x1808   :  { %v4489_v8 = vpack.c.bf16 %v4484_v10, %v4483_v2  ;;  %v4803_v46 = vsub.f32 %v10393_v6, %v4781_v45 }
0x1809   :  { %7902 = vmatpush3.bf16.xpose.msra.mxu0 %v5086_v17 }
0x180a   :  { %7841 = vmatprep.mubr.msk.bf16.mxu1 %vm407_vm4, %v4489_v8  ;;  %8149 = vmatprep.subr.msk.bf16.mxu0 %vm317_vm3, %v5063_v27  ;;  %v4811_v14 = vmul.f32 1.442695, %v4803_v46 }
0x180b   :  { %v4787_v1 = vpop.xlane.xlu0 %4786  ;;  %7842 = vmatmul.mubr.msk.bf16.gmra.mxu1 %vm407_vm4, %v4490_v30 }
0x180c   :  { %v4805_v4 = vsub.f32 %v10391_v35, %v4787_v1 }
0x180e   :  { %v4815_v47 = vmul.f32 1.442695, %v4805_v4 }
0x180f   :  { %v4790_v5 = vpop.xlane.xlu0 %4789 }
0x1810   :  { %8562 = vpow2.f32 %v4815_v47  ;;  %v4806_v28 = vsub.f32 %v10395_v53, %v4790_v5 }
0x1811   :  { %7904 = vmatpush3.bf16.xpose.msra.mxu0 %v5083_v41  ;;  %8564 = vpow2.f32 %v4811_v14 }
0x1812   :  { %v4817_v6 = vmul.f32 1.442695, %v4806_v28 }
0x1813   :  { %v4793_v58 = vpop.xlane.xlu0 %4792 }
0x1814   :  { %8566 = vpow2.f32 %v4817_v6  ;;  %v4807_v31 = vsub.f32 %v10410_v16, %v4793_v58  ;;  %v5061_v16 = vpop.permute.xlu1 %5060 }
0x1816   :  { %v4819_v35 = vmul.f32 1.442695, %v4807_v31 }
0x1817   :  { %v4799_v29 = vpop.xlane.xlu0 %4798 }
0x1818   :  { %v4809_v3 = vsub.f32 %v10404_v42, %v4799_v29  ;;  %7906 = vmatmul.mubr.msk.bf16.vlgmr.msra.gmra.mxu0 %vm317_vm3, %v5057_v54 }
0x1819   :  { %7909 = vmatprep.mubr.msk.bf16.mxu0 %vm317_vm3, %v5059_v0 }
0x181a   :  { %v4823_v24 = vmul.f32 1.442695, %v4809_v3 }
0x181c   :  { %8568 = vpow2.f32 %v4823_v24 }
0x181d   :  { %v10460_v53 = vpop.eup %8562  ;;  %8570 = vpow2.f32 %v4819_v35 }
0x181e   :  { %v4833_v57 = vsel %vm407_vm4, %v10460_v53, 0.0  ;;  %v10464_v60 = vpop.eup %8564 }
0x181f   :  { %4834 = vadd.xlane.f32.xlu0 %v4833_v57  ;;  %v4827_v7 = vsel %vm407_vm4, %v10464_v60, 0.0 }
0x1820   :  { %7910 = vmatmul.mubr.msk.bf16.gmra.mxu0 %vm317_vm3, %v5061_v16 }
0x1821   :  { %v10467_v42 = vpop.eup %8566 }
0x1822   :  { %v4836_v56 = vsel %vm407_vm4, %v10467_v42, 0.0 }
0x1823   :  { %4828 = vadd.xlane.f32.xlu0 %v4827_v7  ;;  %4837 = vadd.xlane.f32.xlu1 %v4836_v56 }
0x1829   :  { %v10473_v61 = vpop.eup %8568 }
0x182a   :  { %v4845_v21 = vsel %vm407_vm4, %v10473_v61, 0.0  ;;  %v10477_v18 = vpop.eup %8570 }
0x182b   :  { %4846 = vadd.xlane.f32.xlu0 %v4845_v21  ;;  %v4839_v40 = vsel %vm407_vm4, %v10477_v18, 0.0 }
0x182f   :  { %4840 = vadd.xlane.f32.xlu0 %v4839_v40 }
0x183c   :  { %v4784_v25 = vpop.xlane.xlu1 %4783 }
0x183d   :  { %v4804_v55 = vsub.f32 %v10399_v37, %v4784_v25 }
0x183f   :  { %v4813_v19 = vmul.f32 1.442695, %v4804_v55 }
0x1840   :  { %v4796_v37 = vpop.xlane.xlu1 %4795 }
0x1841   :  { %8572 = vpow2.f32 %v4813_v19  ;;  %v4808_v39 = vsub.f32 %v10426_v20, %v4796_v37 }
0x1843   :  { %v4821_v10 = vmul.f32 1.442695, %v4808_v39 }
0x1844   :  { %v4802_v12 = vpop.xlane.xlu1 %4801 }
0x1845   :  { %4877 = vrot.lane.b32.xlu0 %v8934_v32, %s8784_s19  ;;  %v4810_v50 = vsub.f32 %v10422_v9, %v4802_v12  ;;  %v10513_v9 = vpop.f32.mrf.mxu1 }
0x1847   :  { %v4825_v2 = vmul.f32 1.442695, %v4810_v50  ;;  %v10517_v20 = vpop.f32.mrf.mxu1 }
0x1849   :  { %5448 = vrot.lane.b32.xlu0 %v10106_v59, %s8774_s30  ;;  %8574 = vpow2.f32 %v4825_v2  ;;  %v10521_v27 = vpop.f32.mrf.mxu1 }
0x184a   :  { %8576 = vpow2.f32 %v4821_v10 }
0x184b   :  { %v10527_v46 = vpop.f32.mrf.mxu1 }
0x184d   :  { %5444 = vrot.lane.b32.xlu0 %v10117_v11, %s8774_s30  ;;  %v10531_v4 = vpop.f32.mrf.mxu1 }
0x184e   :  { %v10492_v36 = vpop.eup %8572 }
0x184f   :  { %v4830_v0 = vsel %vm407_vm4, %v10492_v36, 0.0  ;;  %v10535_v47 = vpop.f32.mrf.mxu1 }
0x1850   :  { %4831 = vadd.xlane.f32.xlu1 %v4830_v0 }
0x1851   :  { %5434 = vrot.lane.b32.xlu0 %v8950_v44, %s8777_s24  ;;  %v10539_v28 = vpop.f32.mrf.mxu1 }
0x1853   :  { %v10541_v6 = vpop.f32.mrf.mxu1 }
0x1855   :  { %5438 = vrot.lane.b32.xlu0 %v8936_v34, %s8777_s24 }
0x1856   :  { %v10504_v45 = vpop.eup %8574 }
0x1857   :  { %v4848_v33 = vsel %vm407_vm4, %v10504_v45, 0.0  ;;  %v10508_v17 = vpop.eup %8576 }
0x1858   :  { %v4842_v8 = vsel %vm407_vm4, %v10508_v17, 0.0 }
0x1861   :  { %4875 = vrot.lane.b32.xlu1 %v8936_v34, %s8784_s19 }
0x1865   :  { %4873 = vrot.lane.b32.xlu1 %v8944_v38, %s8784_s19 }
0x1889   :  { %4849 = vadd.xlane.f32.xlu1 %v4848_v33 }
0x188d   :  { %4843 = vadd.xlane.f32.xlu1 %v4842_v8 }
0x189e   :  { %4871 = vrot.lane.b32.xlu1 %v8950_v44, %s8784_s19 }
0x18a2   :  { %5446 = vrot.lane.b32.xlu1 %v10109_v23, %s8774_s30 }
0x18a6   :  { %5442 = vrot.lane.b32.xlu1 %v10123_v62, %s8774_s30 }
0x18a8   :  { %v10523_v30 = vpop.xlane.xlu0 %4834 }
0x18aa   :  { %5436 = vrot.lane.b32.xlu1 %v8944_v38, %s8777_s24 }
0x18ac   :  { %v4829_v1 = vpop.xlane.xlu0 %4828  ;;  %v4838_v55 = vpop.xlane.xlu1 %4837 }
0x18ad   :  { %8578 = vrcp.f32 %v4829_v1 }
0x18ae   :  { %5440 = vrot.lane.b32.xlu1 %v8934_v32, %s8777_s24 }
0x18b4   :  { %v10533_v14 = vpop.xlane.xlu0 %4846 }
0x18b8   :  { %v10537_v5 = vpop.xlane.xlu0 %4840 }
0x18bc   :  { %v4878_v41 = vpop.permute.xlu0 %4877 }
0x18bd   :  { %7871 = vmatprep.subr.bf16.mxu1 %v4878_v41 }
0x18c0   :  { %v5449_v58 = vpop.permute.xlu0 %5448  ;;  %v7839_v31 = vpop.f32.mrf.mxu1 }
0x18c1   :  { %8151 = vmatprep.subr.msk.bf16.mxu0 %vm317_vm3, %v5449_v58  ;;  %v5472_v54 = vsel %vm317_vm3, %v5449_v58, 0 }
0x18c2   :  { %v4549_v29 = vpop.f32.mrf.mxu1  ;;  %7940 = vmatpush3.bf16.xpose.msra.mxu0 %v5472_v54  ;;  %v8579_v54 = vpop.eup %8578 }
0x18c4   :  { %v10545_v3 = vpop.permute.xlu0 %5444  ;;  %v7840_v35 = vpop.f32.mrf.mxu1 }
0x18c5   :  { %v4581_v16 = vpack.c.bf16 %v7840_v35, %v7839_v31 }
0x18c6   :  { %v4552_v24 = vpop.f32.mrf.mxu1 }
0x18c7   :  { %v4580_v57 = vpack.c.bf16 %v4552_v24, %v4549_v29 }
0x18c8   :  { %v5435_v7 = vpop.permute.xlu0 %5434 }
0x18c9   :  { %7847 = vmatprep.mubr.msk.bf16.mxu1 %vm317_vm3, %v4580_v57  ;;  %7947 = vmatprep.mubr.msk.bf16.mxu0 %vm317_vm3, %v5435_v7 }
0x18ca   :  { %7848 = vmatmul.mubr.msk.bf16.vlgmr.msra.gmra.mxu1 %vm317_vm3, %v4581_v16  ;;  %v4859_v16 = vmul.f32 %v8579_v54, %v10464_v60  ;;  %v5466_v54 = vsel %vm317_vm3, %v10545_v3, 0 }
0x18cb   :  { %7872 = vmatpush3.bf16.msra.mxu1 %v4878_v41  ;;  %v7843_v56 = vpop.f32.mrf.mxu1 }
0x18cd   :  { %v4565_v21 = vpop.f32.mrf.mxu1 }
0x18cf   :  { %v7844_v40 = vpop.f32.mrf.mxu1 }
0x18d0   :  { %v4583_v22 = vpack.c.bf16 %v7844_v40, %v7843_v56 }
0x18d1   :  { %v4568_v48 = vpop.f32.mrf.mxu1 }
0x18d2   :  { %v4582_v25 = vpack.c.bf16 %v4568_v48, %v4565_v21 }
0x18d4   :  { %7851 = vmatprep.mubr.msk.bf16.mxu1 %vm317_vm3, %v4582_v25 }
0x18d5   :  { %7852 = vmatmul.mubr.msk.bf16.gmra.mxu1 %vm317_vm3, %v4583_v22 }
0x18d8   :  { %v10552_v19 = vpop.f32.mrf.mxu0 }
0x18d9   :  { %v4832_v0 = vpop.xlane.xlu1 %4831  ;;  %v5165_v10 = vsel %vm407_vm4, %v10552_v19, -inf }
0x18da   :  { %8580 = vrcp.f32 %v4832_v0  ;;  %v10554_v37 = vpop.f32.mrf.mxu0 }
0x18db   :  { %v5159_v12 = vsel %vm407_vm4, %v10554_v37, -inf  ;;  %8582 = vrcp.f32 %v4838_v55 }
0x18dc   :  { %5160 = vmax.xlane.f32.xlu0 %v5159_v12  ;;  %v10558_v50 = vpop.f32.mrf.mxu0  ;;  %8584 = vrcp.f32 %v10523_v30 }
0x18dd   :  { %v4876_v39 = vpop.permute.xlu1 %4875  ;;  %v5168_v58 = vsel %vm407_vm4, %v10558_v50, -inf }
0x18de   :  { %7873 = vmatprep.subr.bf16.mxu1 %v4876_v39  ;;  %v10560_v2 = vpop.f32.mrf.mxu0 }
0x18df   :  { %7874 = vmatpush3.bf16.msra.mxu1 %v4876_v39  ;;  %v5162_v33 = vsel %vm407_vm4, %v10560_v2, -inf }
0x18e0   :  { %5166 = vmax.xlane.f32.xlu0 %v5165_v10  ;;  %v10566_v8 = vpop.f32.mrf.mxu0  ;;  %5163 = vmax.xlane.f32.xlu1 %v5162_v33 }
0x18e1   :  { %v4874_v1 = vpop.permute.xlu1 %4873  ;;  %v5177_v21 = vsel %vm407_vm4, %v10566_v8, -inf }
0x18e2   :  { %7875 = vmatprep.subr.bf16.mxu1 %v4874_v1  ;;  %v10568_v41 = vpop.f32.mrf.mxu0 }
0x18e3   :  { %7876 = vmatpush3.bf16.msra.mxu1 %v4874_v1  ;;  %v5171_v24 = vsel %vm407_vm4, %v10568_v41, -inf }
0x18e4   :  { %5169 = vmax.xlane.f32.xlu0 %v5168_v58  ;;  %v10572_v31 = vpop.f32.mrf.mxu0 }
0x18e5   :  { %v5180_v40 = vsel %vm407_vm4, %v10572_v31, -inf }
0x18e6   :  { %v10574_v29 = vpop.f32.mrf.mxu0 }
0x18e7   :  { %v8581_v35 = vpop.eup %8580  ;;  %v5174_v57 = vsel %vm407_vm4, %v10574_v29, -inf }
0x18e8   :  { %5172 = vmax.xlane.f32.xlu0 %v5171_v24  ;;  %5175 = vmax.xlane.f32.xlu1 %v5174_v57  ;;  %v4860_v7 = vmul.f32 %v8581_v35, %v10492_v36  ;;  %v8583_v60 = vpop.eup %8582 }
0x18e9   :  { %v8585_v25 = vpop.eup %8584  ;;  %v4862_v22 = vmul.f32 %v8583_v60, %v10467_v42 }
0x18ea   :  { %v4867_v56 = vpack.c.bf16 %v4860_v7, %v4859_v16  ;;  %v4861_v12 = vmul.f32 %v8585_v25, %v10460_v53  ;;  %v6917_v16 = vld [vmem:[%s11189_s10 + $0x6] sm:$0x3] }
0x18eb   :  { %v4979_v7 = vsel %vm906_vm5, %v6917_v16, 0 }
0x18ec   :  { %5178 = vmax.xlane.f32.xlu0 %v5177_v21  ;;  %5181 = vmax.xlane.f32.xlu1 %v5180_v40  ;;  %v4868_v55 = vpack.c.bf16 %v4862_v22, %v4861_v12 }
0x18ed   :  { %7879 = vmatprep.mubr.msk.bf16.mxu1 %vm407_vm4, %v4867_v56 }
0x1912   :  { %v4850_v48 = vpop.xlane.xlu1 %4849 }
0x1913   :  { %8586 = vrcp.f32 %v4850_v48 }
0x1914   :  { %8588 = vrcp.f32 %v10537_v5 }
0x1915   :  { %8590 = vrcp.f32 %v10533_v14 }
0x1916   :  { %v4844_v36 = vpop.xlane.xlu1 %4843 }
0x1917   :  { %8592 = vrcp.f32 %v4844_v36 }
0x191a   :  { %v4872_v0 = vpop.permute.xlu1 %4871 }
0x191b   :  { %7877 = vmatprep.subr.bf16.mxu1 %v4872_v0 }
0x191c   :  { %7878 = vmatpush3.bf16.msra.mxu1 %v4872_v0 }
0x191d   :  { %8145 = vmatprep.subr.msk.bf16.mxu1 %vm906_vm5, %v6917_v16 }
0x191e   :  { %v5447_v39 = vpop.permute.xlu1 %5446 }
0x191f   :  { %7880 = vmatmul.mubr.msk.bf16.vlgmr.msra.gmra.mxu1 %vm407_vm4, %v4868_v55  ;;  %8152 = vmatprep.subr.msk.bf16.mxu0 %vm317_vm3, %v5447_v39  ;;  %v5469_v30 = vsel %vm317_vm3, %v5447_v39, 0 }
0x1920   :  { %7942 = vmatpush3.bf16.xpose.msra.mxu0 %v5469_v30  ;;  %v8587_v14 = vpop.eup %8586  ;;  %7888 = vmatpush3.bf16.msra.mxu1 %v4979_v7 }
0x1921   :  { %8153 = vmatprep.subr.msk.bf16.mxu0 %vm317_vm3, %v10545_v3  ;;  %v8589_v5 = vpop.eup %8588  ;;  %v4866_v53 = vmul.f32 %v8587_v14, %v10504_v45 }
0x1922   :  { %v8591_v42 = vpop.eup %8590  ;;  %v4863_v33 = vmul.f32 %v8589_v5, %v10477_v18  ;;  %v5443_v24 = vpop.permute.xlu1 %5442 }
0x1923   :  { %v4865_v58 = vmul.f32 %v8591_v42, %v10473_v61  ;;  %v5463_v45 = vsel %vm317_vm3, %v5443_v24, 0 }
0x1924   :  { %v8593_v10 = vpop.eup %8592 }
0x1925   :  { %v4864_v1 = vmul.f32 %v8593_v10, %v10508_v17  ;;  %v4870_v57 = vpack.c.bf16 %v4866_v53, %v4865_v58  ;;  %v5439_v17 = vpop.permute.xlu0 %5438 }
0x1926   :  { %v5437_v18 = vpop.permute.xlu1 %5436 }
0x1927   :  { %v4869_v35 = vpack.c.bf16 %v4864_v1, %v4863_v33 }
0x1928   :  { %7944 = vmatpush3.bf16.xpose.msra.mxu0 %v5466_v54 }
0x1929   :  { %7883 = vmatprep.mubr.msk.bf16.mxu1 %vm407_vm4, %v4869_v35  ;;  %8154 = vmatprep.subr.msk.bf16.mxu0 %vm317_vm3, %v5443_v24  ;;  %v4272_v35 = vadd.f32 %v10513_v9, %v10324_v15  ;;  %v4267_v15 = vadd.f32 %v10527_v46, %v10330_v13  ;;  %v4291_v13 = vadd.f32 %v10539_v28, %v10336_v49 }
0x192a   :  { %7884 = vmatmul.mubr.msk.bf16.gmra.mxu1 %vm407_vm4, %v4870_v57  ;;  %v5441_v61 = vpop.permute.xlu1 %5440  ;;  %v4264_v57 = vadd.f32 %v10517_v20, %v10326_v63  ;;  %v4288_v20 = vadd.f32 %v10531_v4, %v10332_v51 }
0x1930   :  { %7946 = vmatpush3.bf16.xpose.msra.mxu0 %v5463_v45 }
0x1937   :  { %7948 = vmatmul.mubr.msk.bf16.vlgmr.msra.gmra.mxu0 %vm317_vm3, %v5437_v18 }
0x1938   :  { %7951 = vmatprep.mubr.msk.bf16.mxu0 %vm317_vm3, %v5439_v17 }
0x193f   :  { %7952 = vmatmul.mubr.msk.bf16.gmra.mxu0 %vm317_vm3, %v5441_v61  ;;  %v4275_v61 = vadd.f32 %v10521_v27, %v10328_v26 }
0x1965   :  { %v5161_v3 = vpop.xlane.xlu0 %5160 }
0x1966   :  { %v5183_v56 = vsub.f32 %v10554_v37, %v5161_v3 }
0x1968   :  { %v5191_v60 = vmul.f32 1.442695, %v5183_v56 }
0x1969   :  { %v5167_v21 = vpop.xlane.xlu0 %5166  ;;  %v5164_v40 = vpop.xlane.xlu1 %5163 }
0x196a   :  { %v5185_v48 = vsub.f32 %v10552_v19, %v5167_v21  ;;  %v5184_v25 = vsub.f32 %v10560_v2, %v5164_v40  ;;  %v4280_v21 = vadd.f32 %v10535_v47, %v10334_v43 }
0x196c   :  { %v5195_v36 = vmul.f32 1.442695, %v5185_v48  ;;  %v5193_v12 = vmul.f32 1.442695, %v5184_v25 }
0x196d   :  { %v5170_v22 = vpop.xlane.xlu0 %5169 }
0x196e   :  { %8594 = vpow2.f32 %v5195_v36  ;;  %v5186_v0 = vsub.f32 %v10558_v50, %v5170_v22 }
0x196f   :  { %8596 = vpow2.f32 %v5191_v60 }
0x1970   :  { %v5197_v55 = vmul.f32 1.442695, %v5186_v0 }
0x1971   :  { %v5173_v39 = vpop.xlane.xlu0 %5172  ;;  %v5176_v51 = vpop.xlane.xlu1 %5175 }
0x1972   :  { %8598 = vpow2.f32 %v5197_v55  ;;  %v5187_v37 = vsub.f32 %v10568_v41, %v5173_v39  ;;  %v5188_v47 = vsub.f32 %v10574_v29, %v5176_v51 }
0x1973   :  { %8600 = vpow2.f32 %v5193_v12 }
0x1974   :  { %v5199_v19 = vmul.f32 1.442695, %v5187_v37  ;;  %v5201_v49 = vmul.f32 1.442695, %v5188_v47 }
0x1975   :  { %v5179_v30 = vpop.xlane.xlu0 %5178  ;;  %v5182_v4 = vpop.xlane.xlu1 %5181 }
0x1976   :  { %v5189_v14 = vsub.f32 %v10566_v8, %v5179_v30  ;;  %v5190_v43 = vsub.f32 %v10572_v31, %v5182_v4 }
0x1978   :  { %v5203_v5 = vmul.f32 1.442695, %v5189_v14  ;;  %v5205_v60 = vmul.f32 1.442695, %v5190_v43 }
0x197a   :  { %8602 = vpow2.f32 %v5203_v5 }
0x197b   :  { %v10621_v42 = vpop.eup %8594  ;;  %8604 = vpow2.f32 %v5199_v19 }
0x197c   :  { %v5213_v50 = vsel %vm407_vm4, %v10621_v42, 0.0  ;;  %v10625_v2 = vpop.eup %8596  ;;  %8606 = vpow2.f32 %v5205_v60 }
0x197d   :  { %5214 = vadd.xlane.f32.xlu0 %v5213_v50  ;;  %v5207_v41 = vsel %vm407_vm4, %v10625_v2, 0.0  ;;  %8608 = vpow2.f32 %v5201_v49 }
0x197f   :  { %v10627_v10 = vpop.eup %8598 }
0x1980   :  { %v5216_v8 = vsel %vm407_vm4, %v10627_v10, 0.0  ;;  %v10633_v53 = vpop.eup %8600 }
0x1981   :  { %5208 = vadd.xlane.f32.xlu0 %v5207_v41  ;;  %5217 = vadd.xlane.f32.xlu1 %v5216_v8  ;;  %v5210_v33 = vsel %vm407_vm4, %v10633_v53, 0.0 }
0x1985   :  { %5211 = vadd.xlane.f32.xlu1 %v5210_v33 }
0x1987   :  { %v10637_v1 = vpop.eup %8602 }
0x1988   :  { %v5225_v58 = vsel %vm407_vm4, %v10637_v1, 0.0  ;;  %v10641_v54 = vpop.eup %8604 }
0x1989   :  { %5226 = vadd.xlane.f32.xlu0 %v5225_v58  ;;  %v5219_v17 = vsel %vm407_vm4, %v10641_v54, 0.0  ;;  %v10686_v28 = vpop.eup %8606 }
0x198a   :  { %v7849_v24 = vpop.f32.mrf.mxu1  ;;  %v5228_v31 = vsel %vm407_vm4, %v10686_v28, 0.0  ;;  %v10690_v36 = vpop.eup %8608 }
0x198b   :  { %v10647_v45 = vadd.f32 %v7849_v24, %v4272_v35  ;;  %v5222_v29 = vsel %vm407_vm4, %v10690_v36, 0.0 }
0x198c   :  { %v4635_v18 = vpop.f32.mrf.mxu1 }
0x198d   :  { %v10653_v3 = vadd.f32 %v4635_v18, %v4264_v57  ;;  %5220 = vadd.xlane.f32.xlu0 %v5219_v17 }
0x198e   :  { %v7850_v16 = vpop.f32.mrf.mxu1 }
0x198f   :  { %v10657_v9 = vadd.f32 %v7850_v16, %v4275_v61 }
0x1990   :  { %v4638_v7 = vpop.f32.mrf.mxu1 }
0x1991   :  { %v10659_v63 = vadd.f32 %v4638_v7, %v4267_v15 }
0x1995   :  { %v7853_v56 = vpop.f32.mrf.mxu1 }
0x1996   :  { %v10665_v26 = vadd.f32 %v7853_v56, %v4288_v20  ;;  %5255 = vrot.lane.b32.xlu1 %v8936_v34, %s8785_s28 }
0x1997   :  { %v4651_v27 = vpop.f32.mrf.mxu1 }
0x1998   :  { %v10670_v46 = vadd.f32 %v4651_v27, %v4280_v21 }
0x1999   :  { %v7854_v40 = vpop.f32.mrf.mxu1 }
0x199a   :  { %v10672_v48 = vadd.f32 %v7854_v40, %v4291_v13  ;;  %5253 = vrot.lane.b32.xlu1 %v8944_v38, %s8785_s28 }
0x199b   :  { %v10699_v25 = vpop.f32.mrf.mxu1 }
0x19a3   :  { %5257 = vrot.lane.b32.xlu0 %v8934_v32, %s8785_s28 }
0x19a7   :  { %5828 = vrot.lane.b32.xlu0 %v10106_v59, %s8776_s1 }
0x19ab   :  { %5824 = vrot.lane.b32.xlu0 %v10117_v11, %s8776_s1 }
0x19af   :  { %5814 = vrot.lane.b32.xlu0 %v8950_v44, %s8779_s18 }
0x19b3   :  { %5818 = vrot.lane.b32.xlu0 %v8936_v34, %s8779_s18 }
0x19be   :  { %5229 = vadd.xlane.f32.xlu1 %v5228_v31 }
0x19c2   :  { %5223 = vadd.xlane.f32.xlu1 %v5222_v29 }
0x19d3   :  { %5251 = vrot.lane.b32.xlu1 %v8950_v44, %s8785_s28 }
0x19d7   :  { %5826 = vrot.lane.b32.xlu1 %v10109_v23, %s8776_s1 }
0x19db   :  { %5822 = vrot.lane.b32.xlu1 %v10123_v62, %s8776_s1 }
0x19df   :  { %v7881_v22 = vpop.f32.mrf.mxu1  ;;  %5816 = vrot.lane.b32.xlu1 %v8944_v38, %s8779_s18 }
0x19e1   :  { %v4929_v0 = vpop.f32.mrf.mxu1 }
0x19e3   :  { %v7882_v12 = vpop.f32.mrf.mxu1  ;;  %5820 = vrot.lane.b32.xlu1 %v8934_v32, %s8779_s18 }
0x19e4   :  { %v4961_v37 = vpack.c.bf16 %v7882_v12, %v7881_v22 }
0x19e5   :  { %v4932_v55 = vpop.f32.mrf.mxu1 }
0x19e6   :  { %v4960_v39 = vpack.c.bf16 %v4932_v55, %v4929_v0 }
0x19e8   :  { %7889 = vmatprep.mubr.msk.bf16.mxu1 %vm317_vm3, %v4960_v39 }
0x19e9   :  { %7890 = vmatmul.mubr.msk.bf16.vlgmr.msra.gmra.mxu1 %vm317_vm3, %v4961_v37 }
0x19ea   :  { %v7885_v30 = vpop.f32.mrf.mxu1 }
0x19ec   :  { %v4945_v14 = vpop.f32.mrf.mxu1 }
0x19ee   :  { %v7886_v19 = vpop.f32.mrf.mxu1 }
0x19ef   :  { %v4963_v41 = vpack.c.bf16 %v7886_v19, %v7885_v30 }
0x19f0   :  { %v4948_v5 = vpop.f32.mrf.mxu1 }
0x19f1   :  { %v4962_v50 = vpack.c.bf16 %v4948_v5, %v4945_v14 }
0x19f3   :  { %7893 = vmatprep.mubr.msk.bf16.mxu1 %vm317_vm3, %v4962_v50 }
0x19f4   :  { %7894 = vmatmul.mubr.msk.bf16.gmra.mxu1 %vm317_vm3, %v4963_v41 }
0x19f7   :  { %v10709_v8 = vpop.f32.mrf.mxu0 }
0x19f8   :  { %v5545_v57 = vsel %vm407_vm4, %v10709_v8, -inf }
0x19f9   :  { %v10711_v33 = vpop.f32.mrf.mxu0 }
0x19fa   :  { %v5539_v58 = vsel %vm407_vm4, %v10711_v33, -inf }
0x19fb   :  { %5540 = vmax.xlane.f32.xlu0 %v5539_v58  ;;  %v10715_v35 = vpop.f32.mrf.mxu0 }
0x19fc   :  { %v5548_v61 = vsel %vm407_vm4, %v10715_v35, -inf }
0x19fd   :  { %v10717_v24 = vpop.f32.mrf.mxu0 }
0x19fe   :  { %v5542_v20 = vsel %vm407_vm4, %v10717_v24, -inf }
0x19ff   :  { %5546 = vmax.xlane.f32.xlu0 %v5545_v57  ;;  %v10721_v18 = vpop.f32.mrf.mxu0 }
0x1a00   :  { %v5557_v13 = vsel %vm407_vm4, %v10721_v18, -inf }
0x1a01   :  { %v10723_v17 = vpop.f32.mrf.mxu0 }
0x1a02   :  { %v5551_v7 = vsel %vm407_vm4, %v10723_v17, -inf }
0x1a03   :  { %5549 = vmax.xlane.f32.xlu0 %v5548_v61  ;;  %v10727_v16 = vpop.f32.mrf.mxu0 }
0x1a04   :  { %v5560_v4 = vsel %vm407_vm4, %v10727_v16, -inf }
0x1a05   :  { %v10733_v56 = vpop.f32.mrf.mxu0 }
0x1a06   :  { %v5215_v15 = vpop.xlane.xlu0 %5214  ;;  %v5554_v40 = vsel %vm407_vm4, %v10733_v56, -inf }
0x1a07   :  { %5552 = vmax.xlane.f32.xlu0 %v5551_v7  ;;  %5543 = vmax.xlane.f32.xlu1 %v5542_v20 }
0x1a0a   :  { %v5209_v21 = vpop.xlane.xlu0 %5208  ;;  %v5218_v27 = vpop.xlane.xlu1 %5217 }
0x1a0b   :  { %5558 = vmax.xlane.f32.xlu0 %v5557_v13  ;;  %5555 = vmax.xlane.f32.xlu1 %v5554_v40  ;;  %8610 = vrcp.f32 %v5209_v21 }
0x1a0e   :  { %v5212_v51 = vpop.xlane.xlu1 %5211 }
0x1a0f   :  { %8612 = vrcp.f32 %v5212_v51  ;;  %5561 = vmax.xlane.f32.xlu1 %v5560_v4 }
0x1a10   :  { %8614 = vrcp.f32 %v5218_v27 }
0x1a11   :  { %8616 = vrcp.f32 %v5215_v15 }
0x1a12   :  { %v5227_v43 = vpop.xlane.xlu0 %5226  ;;  %v5256_v49 = vpop.permute.xlu1 %5255 }
0x1a16   :  { %v5221_v47 = vpop.xlane.xlu0 %5220  ;;  %v5254_v37 = vpop.permute.xlu1 %5253 }
0x1a18   :  { %v8611_v60 = vpop.eup %8610 }
0x1a19   :  { %v5239_v22 = vmul.f32 %v8611_v60, %v10625_v2 }
0x1a1a   :  { %v5258_v31 = vpop.permute.xlu0 %5257 }
0x1a1b   :  { %7913 = vmatprep.subr.bf16.mxu1 %v5258_v31 }
0x1a1c   :  { %v8613_v29 = vpop.eup %8612  ;;  %7914 = vmatpush3.bf16.msra.mxu1 %v5258_v31 }
0x1a1d   :  { %7915 = vmatprep.subr.bf16.mxu1 %v5256_v49  ;;  %v5240_v0 = vmul.f32 %v8613_v29, %v10633_v53  ;;  %v8615_v53 = vpop.eup %8614 }
0x1a1e   :  { %v5829_v12 = vpop.permute.xlu0 %5828  ;;  %v8617_v5 = vpop.eup %8616  ;;  %v5242_v50 = vmul.f32 %v8615_v53, %v10627_v10 }
0x1a1f   :  { %v5852_v55 = vsel %vm317_vm3, %v5829_v12, 0  ;;  %8156 = vmatprep.subr.msk.bf16.mxu0 %vm317_vm3, %v5829_v12  ;;  %v5247_v39 = vpack.c.bf16 %v5240_v0, %v5239_v22  ;;  %v5241_v58 = vmul.f32 %v8617_v5, %v10621_v42 }
0x1a20   :  { %7916 = vmatpush3.bf16.msra.mxu1 %v5256_v49  ;;  %7982 = vmatpush3.bf16.xpose.msra.mxu0 %v5852_v55 }
0x1a21   :  { %7917 = vmatprep.subr.bf16.mxu1 %v5254_v37  ;;  %7921 = vmatprep.mubr.msk.bf16.mxu1 %vm407_vm4, %v5247_v39  ;;  %v5248_v57 = vpack.c.bf16 %v5242_v50, %v5241_v58 }
0x1a22   :  { %v5825_v30 = vpop.permute.xlu0 %5824 }
0x1a23   :  { %v5846_v51 = vsel %vm317_vm3, %v5825_v30, 0 }
0x1a24   :  { %7918 = vmatpush3.bf16.msra.mxu1 %v5254_v37 }
0x1a26   :  { %v5815_v14 = vpop.permute.xlu0 %5814 }
0x1a27   :  { %7989 = vmatprep.mubr.msk.bf16.mxu0 %vm317_vm3, %v5815_v14 }
0x1a2a   :  { %v5819_v60 = vpop.permute.xlu0 %5818 }
0x1a47   :  { %v5230_v2 = vpop.xlane.xlu1 %5229 }
0x1a48   :  { %8618 = vrcp.f32 %v5230_v2 }
0x1a49   :  { %8620 = vrcp.f32 %v5221_v47 }
0x1a4a   :  { %8622 = vrcp.f32 %v5227_v43 }
0x1a4b   :  { %v5224_v19 = vpop.xlane.xlu1 %5223 }
0x1a4c   :  { %8624 = vrcp.f32 %v5224_v19 }
0x1a4f   :  { %v5252_v41 = vpop.permute.xlu1 %5251 }
0x1a50   :  { %7919 = vmatprep.subr.bf16.mxu1 %v5252_v41 }
0x1a51   :  { %7920 = vmatpush3.bf16.msra.mxu1 %v5252_v41 }
0x1a53   :  { %v5827_v61 = vpop.permute.xlu1 %5826 }
0x1a54   :  { %v5849_v7 = vsel %vm317_vm3, %v5827_v61, 0  ;;  %7922 = vmatmul.mubr.msk.bf16.vlgmr.msra.gmra.mxu1 %vm407_vm4, %v5248_v57  ;;  %8157 = vmatprep.subr.msk.bf16.mxu0 %vm317_vm3, %v5827_v61 }
0x1a55   :  { %7984 = vmatpush3.bf16.xpose.msra.mxu0 %v5849_v7  ;;  %v8619_v15 = vpop.eup %8618 }
0x1a56   :  { %8158 = vmatprep.subr.msk.bf16.mxu0 %vm317_vm3, %v5825_v30  ;;  %v8621_v20 = vpop.eup %8620  ;;  %v5246_v27 = vmul.f32 %v8619_v15, %v10686_v28 }
0x1a57   :  { %v8623_v21 = vpop.eup %8622  ;;  %v5243_v42 = vmul.f32 %v8621_v20, %v10641_v54  ;;  %v5823_v43 = vpop.permute.xlu1 %5822 }
0x1a58   :  { %v5245_v40 = vmul.f32 %v8623_v21, %v10637_v1  ;;  %v5843_v28 = vsel %vm317_vm3, %v5823_v43, 0 }
0x1a59   :  { %v8625_v10 = vpop.eup %8624 }
0x1a5a   :  { %v5244_v13 = vmul.f32 %v8625_v10, %v10690_v36  ;;  %v5250_v47 = vpack.c.bf16 %v5246_v27, %v5245_v40 }
0x1a5b   :  { %v5817_v54 = vpop.permute.xlu1 %5816 }
0x1a5c   :  { %v5249_v4 = vpack.c.bf16 %v5244_v13, %v5243_v42 }
0x1a5d   :  { %7986 = vmatpush3.bf16.xpose.msra.mxu0 %v5846_v51 }
0x1a5e   :  { %7925 = vmatprep.mubr.msk.bf16.mxu1 %vm407_vm4, %v5249_v4  ;;  %8159 = vmatprep.subr.msk.bf16.mxu0 %vm317_vm3, %v5823_v43 }
0x1a5f   :  { %7926 = vmatmul.mubr.msk.bf16.gmra.mxu1 %vm407_vm4, %v5250_v47  ;;  %v5821_v1 = vpop.permute.xlu1 %5820 }
0x1a65   :  { %7988 = vmatpush3.bf16.xpose.msra.mxu0 %v5843_v28 }
0x1a6c   :  { %7990 = vmatmul.mubr.msk.bf16.vlgmr.msra.gmra.mxu0 %vm317_vm3, %v5817_v54 }
0x1a6d   :  { %7993 = vmatprep.mubr.msk.bf16.mxu0 %vm317_vm3, %v5819_v60 }
0x1a74   :  { %7994 = vmatmul.mubr.msk.bf16.gmra.mxu0 %vm317_vm3, %v5821_v1 }
0x1a84   :  { %v5541_v36 = vpop.xlane.xlu0 %5540 }
0x1a85   :  { %v5563_v49 = vsub.f32 %v10711_v33, %v5541_v36 }
0x1a87   :  { %v5571_v22 = vmul.f32 1.442695, %v5563_v49 }
0x1a88   :  { %v5547_v31 = vpop.xlane.xlu0 %5546 }
0x1a89   :  { %v5565_v29 = vsub.f32 %v10709_v8, %v5547_v31 }
0x1a8b   :  { %v5575_v0 = vmul.f32 1.442695, %v5565_v29 }
0x1a8c   :  { %v5550_v12 = vpop.xlane.xlu0 %5549 }
0x1a8d   :  { %8626 = vpow2.f32 %v5575_v0  ;;  %v5566_v55 = vsub.f32 %v10715_v35, %v5550_v12  ;;  %v6930_v35 = vld [vmem:[%s11189_s10 + $0x8] sm:$0x3] }
0x1a8e   :  { %8628 = vpow2.f32 %v5571_v22  ;;  %8150 = vmatprep.subr.msk.bf16.mxu1 %vm906_vm5, %v6930_v35 }
0x1a8f   :  { %v5577_v39 = vmul.f32 1.442695, %v5566_v55 }
0x1a90   :  { %v5553_v37 = vpop.xlane.xlu0 %5552  ;;  %v5544_v30 = vpop.xlane.xlu1 %5543 }
0x1a91   :  { %8630 = vpow2.f32 %v5577_v39  ;;  %v5564_v14 = vsub.f32 %v10717_v24, %v5544_v30  ;;  %v5567_v2 = vsub.f32 %v10723_v17, %v5553_v37  ;;  %v5359_v17 = vsel %vm906_vm5, %v6930_v35, 0 }
0x1a92   :  { %7930 = vmatpush3.bf16.msra.mxu1 %v5359_v17 }
0x1a93   :  { %v5573_v53 = vmul.f32 1.442695, %v5564_v14  ;;  %v5579_v8 = vmul.f32 1.442695, %v5567_v2 }
0x1a94   :  { %v5559_v33 = vpop.xlane.xlu0 %5558 }
0x1a95   :  { %v5569_v19 = vsub.f32 %v10721_v18, %v5559_v33  ;;  %8632 = vpow2.f32 %v5573_v53 }
0x1a97   :  { %v5583_v5 = vmul.f32 1.442695, %v5569_v19 }
0x1a99   :  { %8634 = vpow2.f32 %v5583_v5 }
0x1a9a   :  { %v10771_v50 = vpop.eup %8626  ;;  %8636 = vpow2.f32 %v5579_v8 }
0x1a9b   :  { %v5593_v24 = vsel %vm407_vm4, %v10771_v50, 0.0  ;;  %v10780_v41 = vpop.eup %8628 }
0x1a9c   :  { %5594 = vadd.xlane.f32.xlu0 %v5593_v24  ;;  %v5587_v58 = vsel %vm407_vm4, %v10780_v41, 0.0 }
0x1a9e   :  { %v10782_v18 = vpop.eup %8630 }
0x1a9f   :  { %v5596_v57 = vsel %vm407_vm4, %v10782_v18, 0.0 }
0x1aa0   :  { %5588 = vadd.xlane.f32.xlu0 %v5587_v58  ;;  %5597 = vadd.xlane.f32.xlu1 %v5596_v57 }
0x1aa2   :  { %v10788_v61 = vpop.eup %8632 }
0x1aa3   :  { %v5590_v7 = vsel %vm407_vm4, %v10788_v61, 0.0 }
0x1aa4   :  { %5591 = vadd.xlane.f32.xlu1 %v5590_v7 }
0x1aa6   :  { %v10792_v15 = vpop.eup %8634 }
0x1aa7   :  { %v5605_v20 = vsel %vm407_vm4, %v10792_v15, 0.0  ;;  %v10796_v21 = vpop.eup %8636 }
0x1aa8   :  { %5606 = vadd.xlane.f32.xlu0 %v5605_v20  ;;  %v5599_v13 = vsel %vm407_vm4, %v10796_v21, 0.0 }
0x1aa9   :  { %v7891_v10 = vpop.f32.mrf.mxu1 }
0x1aaa   :  { %v10799_v27 = vadd.f32 %v7891_v10, %v10647_v45 }
0x1aab   :  { %v5015_v42 = vpop.f32.mrf.mxu1 }
0x1aac   :  { %v10804_v40 = vadd.f32 %v5015_v42, %v10653_v3  ;;  %5600 = vadd.xlane.f32.xlu0 %v5599_v13 }
0x1aad   :  { %v7892_v51 = vpop.f32.mrf.mxu1 }
0x1aae   :  { %v10807_v4 = vadd.f32 %v7892_v51, %v10657_v9  ;;  %v5556_v9 = vpop.xlane.xlu1 %5555 }
0x1aaf   :  { %v5018_v43 = vpop.f32.mrf.mxu1  ;;  %v5568_v36 = vsub.f32 %v10733_v56, %v5556_v9 }
0x1ab0   :  { %v10810_v47 = vadd.f32 %v5018_v43, %v10659_v63 }
0x1ab2   :  { %v5562_v63 = vpop.xlane.xlu1 %5561 }
0x1ab4   :  { %v7895_v28 = vpop.f32.mrf.mxu1 }
0x1ab5   :  { %v10813_v45 = vadd.f32 %v7895_v28, %v10665_v26  ;;  %5635 = vrot.lane.b32.xlu1 %v8936_v34, %s8786_s0  ;;  %v5570_v26 = vsub.f32 %v10727_v16, %v5562_v63 }
0x1ab6   :  { %v5031_v54 = vpop.f32.mrf.mxu1 }
0x1ab7   :  { %v10817_v3 = vadd.f32 %v5031_v54, %v10670_v46  ;;  %v5585_v49 = vmul.f32 1.442695, %v5570_v26  ;;  %v5581_v46 = vmul.f32 1.442695, %v5568_v36 }
0x1ab8   :  { %v7896_v60 = vpop.f32.mrf.mxu1 }
0x1ab9   :  { %v10820_v1 = vadd.f32 %v7896_v60, %v10672_v48  ;;  %5633 = vrot.lane.b32.xlu1 %v8944_v38, %s8786_s0  ;;  %8638 = vpow2.f32 %v5585_v49 }
0x1aba   :  { %8640 = vpow2.f32 %v5581_v46  ;;  %v10851_v56 = vpop.f32.mrf.mxu1 }
0x1ac2   :  { %5637 = vrot.lane.b32.xlu0 %v8934_v32, %s8786_s0 }
0x1ac6   :  { %6208 = vrot.lane.b32.xlu0 %v10106_v59, %s11207_s22  ;;  %v10834_v48 = vpop.eup %8638 }
0x1ac7   :  { %v5608_v59 = vsel %vm407_vm4, %v10834_v48, 0.0  ;;  %v10838_v16 = vpop.eup %8640 }
0x1aca   :  { %6204 = vrot.lane.b32.xlu0 %v10117_v11, %s11207_s22  ;;  %v5602_v11 = vsel %vm407_vm4, %v10838_v16, 0.0 }
0x1ace   :  { %6194 = vrot.lane.b32.xlu0 %v8950_v44, %s11208_s3 }
0x1ad2   :  { %6198 = vrot.lane.b32.xlu0 %v8936_v34, %s11208_s3 }
0x1add   :  { %5609 = vadd.xlane.f32.xlu1 %v5608_v59 }
0x1ae1   :  { %5603 = vadd.xlane.f32.xlu1 %v5602_v11 }
0x1af2   :  { %5631 = vrot.lane.b32.xlu1 %v8950_v44, %s8786_s0 }
0x1af6   :  { %6206 = vrot.lane.b32.xlu1 %v10109_v23, %s11207_s22 }
0x1afa   :  { %6202 = vrot.lane.b32.xlu1 %v10123_v62, %s11207_s22 }
0x1afe   :  { %6196 = vrot.lane.b32.xlu1 %v8944_v38, %s11208_s3 }
0x1b02   :  { %6200 = vrot.lane.b32.xlu1 %v8934_v32, %s11208_s3 }
0x1b14   :  { %v7923_v31 = vpop.f32.mrf.mxu1 }
0x1b16   :  { %v5309_v29 = vpop.f32.mrf.mxu1 }
0x1b18   :  { %v7924_v22 = vpop.f32.mrf.mxu1 }
0x1b19   :  { %v5341_v55 = vpack.c.bf16 %v7924_v22, %v7923_v31 }
0x1b1a   :  { %v5312_v0 = vpop.f32.mrf.mxu1 }
0x1b1b   :  { %v5340_v12 = vpack.c.bf16 %v5312_v0, %v5309_v29 }
0x1b1d   :  { %7931 = vmatprep.mubr.msk.bf16.mxu1 %vm317_vm3, %v5340_v12 }
0x1b1e   :  { %7932 = vmatmul.mubr.msk.bf16.vlgmr.msra.gmra.mxu1 %vm317_vm3, %v5341_v55 }
0x1b1f   :  { %v7927_v23 = vpop.f32.mrf.mxu1 }
0x1b21   :  { %v5325_v62 = vpop.f32.mrf.mxu1 }
0x1b23   :  { %v7928_v39 = vpop.f32.mrf.mxu1 }
0x1b24   :  { %v5343_v2 = vpack.c.bf16 %v7928_v39, %v7927_v23 }
0x1b25   :  { %v5595_v37 = vpop.xlane.xlu0 %5594  ;;  %v5328_v30 = vpop.f32.mrf.mxu1 }
0x1b26   :  { %v5342_v14 = vpack.c.bf16 %v5328_v30, %v5325_v62 }
0x1b28   :  { %7935 = vmatprep.mubr.msk.bf16.mxu1 %vm317_vm3, %v5342_v14 }
0x1b29   :  { %7936 = vmatmul.mubr.msk.bf16.gmra.mxu1 %vm317_vm3, %v5343_v2  ;;  %v5598_v53 = vpop.xlane.xlu1 %5597  ;;  %v5589_v33 = vpop.xlane.xlu0 %5588 }
0x1b2a   :  { %8642 = vrcp.f32 %v5589_v33 }
0x1b2c   :  { %v10857_v19 = vpop.f32.mrf.mxu0 }
0x1b2d   :  { %v5592_v8 = vpop.xlane.xlu1 %5591  ;;  %v5925_v57 = vsel %vm407_vm4, %v10857_v19, -inf }
0x1b2e   :  { %v10859_v5 = vpop.f32.mrf.mxu0  ;;  %8644 = vrcp.f32 %v5592_v8 }
0x1b2f   :  { %v5919_v35 = vsel %vm407_vm4, %v10859_v5, -inf  ;;  %8646 = vrcp.f32 %v5598_v53 }
0x1b30   :  { %5920 = vmax.xlane.f32.xlu0 %v5919_v35  ;;  %v10863_v24 = vpop.f32.mrf.mxu0  ;;  %8648 = vrcp.f32 %v5595_v37 }
0x1b31   :  { %v5607_v17 = vpop.xlane.xlu0 %5606  ;;  %v5928_v13 = vsel %vm407_vm4, %v10863_v24, -inf  ;;  %v5636_v54 = vpop.permute.xlu1 %5635 }
0x1b32   :  { %v10865_v58 = vpop.f32.mrf.mxu0 }
0x1b33   :  { %v5922_v7 = vsel %vm407_vm4, %v10865_v58, -inf }
0x1b34   :  { %5926 = vmax.xlane.f32.xlu0 %v5925_v57  ;;  %v10871_v20 = vpop.f32.mrf.mxu0  ;;  %5923 = vmax.xlane.f32.xlu1 %v5922_v7 }
0x1b35   :  { %v5601_v10 = vpop.xlane.xlu0 %5600  ;;  %v5937_v11 = vsel %vm407_vm4, %v10871_v20, -inf  ;;  %v5634_v22 = vpop.permute.xlu1 %5633 }
0x1b36   :  { %v10873_v42 = vpop.f32.mrf.mxu0 }
0x1b37   :  { %v8643_v28 = vpop.eup %8642  ;;  %v5931_v9 = vsel %vm407_vm4, %v10873_v42, -inf }
0x1b38   :  { %5929 = vmax.xlane.f32.xlu0 %v5928_v13  ;;  %v10877_v51 = vpop.f32.mrf.mxu0  ;;  %v5619_v49 = vmul.f32 %v8643_v28, %v10780_v41 }
0x1b39   :  { %v5638_v43 = vpop.permute.xlu0 %5637  ;;  %v5940_v31 = vsel %vm407_vm4, %v10877_v51, -inf }
0x1b3a   :  { %7955 = vmatprep.subr.bf16.mxu1 %v5638_v43  ;;  %v10879_v60 = vpop.f32.mrf.mxu0 }
0x1b3b   :  { %7956 = vmatpush3.bf16.msra.mxu1 %v5638_v43  ;;  %v5934_v63 = vsel %vm407_vm4, %v10879_v60, -inf  ;;  %v8645_v26 = vpop.eup %8644 }
0x1b3c   :  { %5932 = vmax.xlane.f32.xlu0 %v5931_v9  ;;  %5935 = vmax.xlane.f32.xlu1 %v5934_v63  ;;  %v5620_v46 = vmul.f32 %v8645_v26, %v10788_v61  ;;  %v8647_v12 = vpop.eup %8646 }
0x1b3d   :  { %7957 = vmatprep.subr.bf16.mxu1 %v5636_v54  ;;  %v6209_v36 = vpop.permute.xlu0 %6208  ;;  %v8649_v23 = vpop.eup %8648  ;;  %v5622_v62 = vmul.f32 %v8647_v12, %v10782_v18 }
0x1b3e   :  { %v6232_v59 = vsel %vm317_vm3, %v6209_v36, 0  ;;  %8161 = vmatprep.subr.msk.bf16.mxu0 %vm317_vm3, %v6209_v36  ;;  %v5627_v29 = vpack.c.bf16 %v5620_v46, %v5619_v49  ;;  %v5621_v30 = vmul.f32 %v8649_v23, %v10771_v50 }
0x1b3f   :  { %7958 = vmatpush3.bf16.msra.mxu1 %v5636_v54  ;;  %8024 = vmatpush3.bf16.xpose.msra.mxu0 %v6232_v59  ;;  %v6943_v54 = vld [vmem:[%s11189_s10 + $0xa] sm:$0x3] }
0x1b40   :  { %5938 = vmax.xlane.f32.xlu0 %v5937_v11  ;;  %5941 = vmax.xlane.f32.xlu1 %v5940_v31  ;;  %v5628_v14 = vpack.c.bf16 %v5622_v62, %v5621_v30  ;;  %v5739_v9 = vsel %vm906_vm5, %v6943_v54, 0 }
0x1b41   :  { %7959 = vmatprep.subr.bf16.mxu1 %v5634_v22  ;;  %7963 = vmatprep.mubr.msk.bf16.mxu1 %vm407_vm4, %v5627_v29  ;;  %v6205_v41 = vpop.permute.xlu0 %6204 }
0x1b42   :  { %v6226_v7 = vsel %vm317_vm3, %v6205_v41, 0 }
0x1b43   :  { %7960 = vmatpush3.bf16.msra.mxu1 %v5634_v22 }
0x1b45   :  { %v6195_v61 = vpop.permute.xlu0 %6194 }
0x1b46   :  { %8031 = vmatprep.mubr.msk.bf16.mxu0 %vm317_vm3, %v6195_v61 }
0x1b49   :  { %v6199_v28 = vpop.permute.xlu0 %6198 }
0x1b66   :  { %v5610_v0 = vpop.xlane.xlu1 %5609 }
0x1b67   :  { %8650 = vrcp.f32 %v5610_v0 }
0x1b68   :  { %8652 = vrcp.f32 %v5601_v10 }
0x1b69   :  { %8654 = vrcp.f32 %v5607_v17 }
0x1b6a   :  { %v5604_v55 = vpop.xlane.xlu1 %5603 }
0x1b6b   :  { %8656 = vrcp.f32 %v5604_v55 }
0x1b6e   :  { %v5632_v39 = vpop.permute.xlu1 %5631 }
0x1b6f   :  { %7961 = vmatprep.subr.bf16.mxu1 %v5632_v39 }
0x1b70   :  { %7962 = vmatpush3.bf16.msra.mxu1 %v5632_v39 }
0x1b71   :  { %8155 = vmatprep.subr.msk.bf16.mxu1 %vm906_vm5, %v6943_v54 }
0x1b72   :  { %v6207_v2 = vpop.permute.xlu1 %6206 }
0x1b73   :  { %v6229_v53 = vsel %vm317_vm3, %v6207_v2, 0  ;;  %7964 = vmatmul.mubr.msk.bf16.vlgmr.msra.gmra.mxu1 %vm407_vm4, %v5628_v14  ;;  %8162 = vmatprep.subr.msk.bf16.mxu0 %vm317_vm3, %v6207_v2 }
0x1b74   :  { %8026 = vmatpush3.bf16.xpose.msra.mxu0 %v6229_v53  ;;  %v8651_v37 = vpop.eup %8650  ;;  %7972 = vmatpush3.bf16.msra.mxu1 %v5739_v9 }
0x1b75   :  { %8163 = vmatprep.subr.msk.bf16.mxu0 %vm317_vm3, %v6205_v41  ;;  %v8653_v33 = vpop.eup %8652  ;;  %v5626_v35 = vmul.f32 %v8651_v37, %v10834_v48 }
0x1b76   :  { %v8655_v8 = vpop.eup %8654  ;;  %v5623_v50 = vmul.f32 %v8653_v33, %v10796_v21  ;;  %v6203_v13 = vpop.permute.xlu1 %6202 }
0x1b77   :  { %v5625_v57 = vmul.f32 %v8655_v8, %v10792_v15  ;;  %v6223_v48 = vsel %vm317_vm3, %v6203_v13, 0 }
0x1b78   :  { %v8657_v18 = vpop.eup %8656 }
0x1b79   :  { %v5624_v17 = vmul.f32 %v8657_v18, %v10838_v16  ;;  %v5630_v43 = vpack.c.bf16 %v5626_v35, %v5625_v57 }
0x1b7a   :  { %v6197_v21 = vpop.permute.xlu1 %6196 }
0x1b7b   :  { %v5629_v10 = vpack.c.bf16 %v5624_v17, %v5623_v50 }
0x1b7c   :  { %8028 = vmatpush3.bf16.xpose.msra.mxu0 %v6226_v7 }
0x1b7d   :  { %7967 = vmatprep.mubr.msk.bf16.mxu1 %vm407_vm4, %v5629_v10  ;;  %8164 = vmatprep.subr.msk.bf16.mxu0 %vm317_vm3, %v6203_v13 }
0x1b7e   :  { %7968 = vmatmul.mubr.msk.bf16.gmra.mxu1 %vm407_vm4, %v5630_v43  ;;  %v6201_v15 = vpop.permute.xlu1 %6200 }
0x1b84   :  { %8030 = vmatpush3.bf16.xpose.msra.mxu0 %v6223_v48 }
0x1b8b   :  { %8032 = vmatmul.mubr.msk.bf16.vlgmr.msra.gmra.mxu0 %vm317_vm3, %v6197_v21 }
0x1b8c   :  { %8035 = vmatprep.mubr.msk.bf16.mxu0 %vm317_vm3, %v6199_v28 }
0x1b93   :  { %8036 = vmatmul.mubr.msk.bf16.gmra.mxu0 %vm317_vm3, %v6201_v15 }
0x1bb9   :  { %v5921_v16 = vpop.xlane.xlu0 %5920 }
0x1bba   :  { %v5943_v63 = vsub.f32 %v10859_v5, %v5921_v16 }
0x1bbc   :  { %v5951_v46 = vmul.f32 1.442695, %v5943_v63 }
0x1bbd   :  { %v5927_v26 = vpop.xlane.xlu0 %5926  ;;  %v5924_v36 = vpop.xlane.xlu1 %5923 }
0x1bbe   :  { %v5945_v49 = vsub.f32 %v10857_v19, %v5927_v26  ;;  %v5944_v11 = vsub.f32 %v10865_v58, %v5924_v36 }
0x1bc0   :  { %v5955_v59 = vmul.f32 1.442695, %v5945_v49  ;;  %v5953_v22 = vmul.f32 1.442695, %v5944_v11 }
0x1bc1   :  { %v5930_v31 = vpop.xlane.xlu0 %5929 }
0x1bc2   :  { %8658 = vpow2.f32 %v5955_v59  ;;  %v5946_v29 = vsub.f32 %v10863_v24, %v5930_v31 }
0x1bc3   :  { %8660 = vpow2.f32 %v5951_v46 }
0x1bc4   :  { %v5957_v41 = vmul.f32 1.442695, %v5946_v29 }
0x1bc5   :  { %v5933_v61 = vpop.xlane.xlu0 %5932 }
0x1bc6   :  { %8662 = vpow2.f32 %v5957_v41  ;;  %v5947_v5 = vsub.f32 %v10873_v42, %v5933_v61 }
0x1bc7   :  { %8664 = vpow2.f32 %v5953_v22 }
0x1bc8   :  { %v5959_v19 = vmul.f32 1.442695, %v5947_v5 }
0x1bc9   :  { %v5939_v0 = vpop.xlane.xlu0 %5938 }
0x1bca   :  { %v5949_v12 = vsub.f32 %v10871_v20, %v5939_v0 }
0x1bcc   :  { %v5963_v55 = vmul.f32 1.442695, %v5949_v12 }
0x1bce   :  { %8666 = vpow2.f32 %v5963_v55 }
0x1bcf   :  { %v10924_v23 = vpop.eup %8658  ;;  %8668 = vpow2.f32 %v5959_v19 }
0x1bd0   :  { %v5973_v24 = vsel %vm407_vm4, %v10924_v23, 0.0  ;;  %v10928_v58 = vpop.eup %8660 }
0x1bd1   :  { %5974 = vadd.xlane.f32.xlu0 %v5973_v24  ;;  %v5967_v42 = vsel %vm407_vm4, %v10928_v58, 0.0 }
0x1bd3   :  { %v10930_v62 = vpop.eup %8662 }
0x1bd4   :  { %v5976_v20 = vsel %vm407_vm4, %v10930_v62, 0.0  ;;  %v10936_v39 = vpop.eup %8664 }
0x1bd5   :  { %5968 = vadd.xlane.f32.xlu0 %v5967_v42  ;;  %5977 = vadd.xlane.f32.xlu1 %v5976_v20  ;;  %v5970_v30 = vsel %vm407_vm4, %v10936_v39, 0.0 }
0x1bd9   :  { %5971 = vadd.xlane.f32.xlu1 %v5970_v30 }
0x1bdb   :  { %v10940_v14 = vpop.eup %8666 }
0x1bdc   :  { %v5985_v2 = vsel %vm407_vm4, %v10940_v14, 0.0  ;;  %v10944_v53 = vpop.eup %8668 }
0x1bdd   :  { %5986 = vadd.xlane.f32.xlu0 %v5985_v2  ;;  %v5979_v18 = vsel %vm407_vm4, %v10944_v53, 0.0 }
0x1bde   :  { %v7933_v37 = vpop.f32.mrf.mxu1 }
0x1bdf   :  { %v10947_v33 = vadd.f32 %v7933_v37, %v10799_v27 }
0x1be0   :  { %v5395_v8 = vpop.f32.mrf.mxu1 }
0x1be1   :  { %v10952_v35 = vadd.f32 %v5395_v8, %v10804_v40  ;;  %5980 = vadd.xlane.f32.xlu0 %v5979_v18 }
0x1be2   :  { %v7934_v50 = vpop.f32.mrf.mxu1 }
0x1be3   :  { %v10955_v17 = vadd.f32 %v7934_v50, %v10807_v4  ;;  %v5936_v4 = vpop.xlane.xlu1 %5935 }
0x1be4   :  { %v5398_v57 = vpop.f32.mrf.mxu1  ;;  %v5948_v21 = vsub.f32 %v10879_v60, %v5936_v4 }
0x1be5   :  { %v10958_v7 = vadd.f32 %v5398_v57, %v10810_v47 }
0x1be6   :  { %v5961_v15 = vmul.f32 1.442695, %v5948_v21 }
0x1be7   :  { %v5942_v47 = vpop.xlane.xlu1 %5941 }
0x1be9   :  { %v7937_v10 = vpop.f32.mrf.mxu1 }
0x1bea   :  { %v10961_v27 = vadd.f32 %v7937_v10, %v10813_v45  ;;  %6015 = vrot.lane.b32.xlu1 %v8936_v34, %s8787_s12  ;;  %v5950_v45 = vsub.f32 %v10877_v51, %v5942_v47 }
0x1beb   :  { %v5411_v13 = vpop.f32.mrf.mxu1 }
0x1bec   :  { %v10965_v40 = vadd.f32 %v5411_v13, %v10817_v3  ;;  %v5965_v28 = vmul.f32 1.442695, %v5950_v45 }
0x1bed   :  { %v7938_v43 = vpop.f32.mrf.mxu1 }
0x1bee   :  { %v10968_v48 = vadd.f32 %v7938_v43, %v10820_v1  ;;  %6013 = vrot.lane.b32.xlu1 %v8944_v38, %s8787_s12  ;;  %8670 = vpow2.f32 %v5965_v28 }
0x1bef   :  { %8672 = vpow2.f32 %v5961_v15  ;;  %v10983_v51 = vpop.f32.mrf.mxu1 }
0x1bf7   :  { %6017 = vrot.lane.b32.xlu0 %v8934_v32, %s8787_s12 }
0x1bfb   :  { %v10974_v3 = vpop.eup %8670 }
0x1bfc   :  { %v5988_v1 = vsel %vm407_vm4, %v10974_v3, 0.0  ;;  %v10978_v16 = vpop.eup %8672 }
0x1bfd   :  { %v5982_v54 = vsel %vm407_vm4, %v10978_v16, 0.0 }
0x1c12   :  { %5989 = vadd.xlane.f32.xlu1 %v5988_v1 }
0x1c16   :  { %5983 = vadd.xlane.f32.xlu1 %v5982_v54 }
0x1c27   :  { %6011 = vrot.lane.b32.xlu1 %v8950_v44, %s8787_s12 }
0x1c33   :  { %v7965_v60 = vpop.f32.mrf.mxu1 }
0x1c35   :  { %v5689_v9 = vpop.f32.mrf.mxu1 }
0x1c37   :  { %v7966_v63 = vpop.f32.mrf.mxu1 }
0x1c38   :  { %v5721_v49 = vpack.c.bf16 %v7966_v63, %v7965_v60 }
0x1c39   :  { %v5692_v26 = vpop.f32.mrf.mxu1 }
0x1c3a   :  { %v5720_v36 = vpack.c.bf16 %v5692_v26, %v5689_v9 }
0x1c3c   :  { %7973 = vmatprep.mubr.msk.bf16.mxu1 %vm317_vm3, %v5720_v36 }
0x1c3d   :  { %7974 = vmatmul.mubr.msk.bf16.vlgmr.msra.gmra.mxu1 %vm317_vm3, %v5721_v49 }
0x1c3e   :  { %v7969_v46 = vpop.f32.mrf.mxu1 }
0x1c40   :  { %v5705_v59 = vpop.f32.mrf.mxu1 }
0x1c42   :  { %v7970_v11 = vpop.f32.mrf.mxu1 }
0x1c43   :  { %v5723_v22 = vpack.c.bf16 %v7970_v11, %v7969_v46 }
0x1c44   :  { %v5708_v31 = vpop.f32.mrf.mxu1 }
0x1c45   :  { %v5722_v29 = vpack.c.bf16 %v5708_v31, %v5705_v59 }
0x1c47   :  { %7977 = vmatprep.mubr.msk.bf16.mxu1 %vm317_vm3, %v5722_v29 }
0x1c48   :  { %7978 = vmatmul.mubr.msk.bf16.gmra.mxu1 %vm317_vm3, %v5723_v22 }
0x1c4b   :  { %v10989_v41 = vpop.f32.mrf.mxu0 }
0x1c4c   :  { %v6305_v19 = vsel %vm407_vm4, %v10989_v41, -inf }
0x1c4d   :  { %v10991_v61 = vpop.f32.mrf.mxu0 }
0x1c4e   :  { %v6299_v5 = vsel %vm407_vm4, %v10991_v61, -inf }
0x1c4f   :  { %6300 = vmax.xlane.f32.xlu0 %v6299_v5  ;;  %v10995_v0 = vpop.f32.mrf.mxu0 }
0x1c50   :  { %v6308_v20 = vsel %vm407_vm4, %v10995_v0, -inf }
0x1c51   :  { %v10997_v12 = vpop.f32.mrf.mxu0 }
0x1c52   :  { %v6302_v55 = vsel %vm407_vm4, %v10997_v12, -inf }
0x1c53   :  { %6306 = vmax.xlane.f32.xlu0 %v6305_v19  ;;  %v11003_v24 = vpop.f32.mrf.mxu0  ;;  %6303 = vmax.xlane.f32.xlu1 %v6302_v55 }
0x1c54   :  { %v6317_v10 = vsel %vm407_vm4, %v11003_v24, -inf }
0x1c55   :  { %v11005_v42 = vpop.f32.mrf.mxu0 }
0x1c56   :  { %v6311_v8 = vsel %vm407_vm4, %v11005_v42, -inf }
0x1c57   :  { %6309 = vmax.xlane.f32.xlu0 %v6308_v20  ;;  %v11009_v30 = vpop.f32.mrf.mxu0 }
0x1c58   :  { %v6320_v13 = vsel %vm407_vm4, %v11009_v30, -inf }
0x1c59   :  { %v11011_v2 = vpop.f32.mrf.mxu0 }
0x1c5a   :  { %v5975_v37 = vpop.xlane.xlu0 %5974  ;;  %v6314_v18 = vsel %vm407_vm4, %v11011_v2, -inf }
0x1c5b   :  { %6312 = vmax.xlane.f32.xlu0 %v6311_v8  ;;  %6315 = vmax.xlane.f32.xlu1 %v6314_v18 }
0x1c5e   :  { %v5969_v50 = vpop.xlane.xlu0 %5968  ;;  %v5978_v57 = vpop.xlane.xlu1 %5977 }
0x1c5f   :  { %6318 = vmax.xlane.f32.xlu0 %v6317_v10  ;;  %6321 = vmax.xlane.f32.xlu1 %v6320_v13  ;;  %8674 = vrcp.f32 %v5969_v50 }
0x1c62   :  { %v5972_v43 = vpop.xlane.xlu1 %5971 }
0x1c63   :  { %8676 = vrcp.f32 %v5972_v43 }
0x1c64   :  { %8678 = vrcp.f32 %v5978_v57 }
0x1c65   :  { %8680 = vrcp.f32 %v5975_v37 }
0x1c66   :  { %v5987_v4 = vpop.xlane.xlu0 %5986  ;;  %v6016_v21 = vpop.permute.xlu1 %6015 }
0x1c6a   :  { %v5981_v47 = vpop.xlane.xlu0 %5980  ;;  %v6014_v9 = vpop.permute.xlu1 %6013 }
0x1c6c   :  { %v8675_v45 = vpop.eup %8674 }
0x1c6d   :  { %v5999_v1 = vmul.f32 %v8675_v45, %v10928_v58 }
0x1c6e   :  { %v6018_v28 = vpop.permute.xlu0 %6017 }
0x1c6f   :  { %7997 = vmatprep.subr.bf16.mxu1 %v6018_v28 }
0x1c70   :  { %v8677_v15 = vpop.eup %8676  ;;  %7998 = vmatpush3.bf16.msra.mxu1 %v6018_v28 }
0x1c71   :  { %7999 = vmatprep.subr.bf16.mxu1 %v6016_v21  ;;  %v6000_v54 = vmul.f32 %v8677_v15, %v10936_v39  ;;  %v8679_v26 = vpop.eup %8678 }
0x1c72   :  { %v8681_v49 = vpop.eup %8680  ;;  %v6002_v58 = vmul.f32 %v8679_v26, %v10930_v62 }
0x1c73   :  { %v6007_v60 = vpack.c.bf16 %v6000_v54, %v5999_v1  ;;  %v6001_v46 = vmul.f32 %v8681_v49, %v10924_v23 }
0x1c74   :  { %8000 = vmatpush3.bf16.msra.mxu1 %v6016_v21 }
0x1c75   :  { %8001 = vmatprep.subr.bf16.mxu1 %v6014_v9  ;;  %8005 = vmatprep.mubr.msk.bf16.mxu1 %vm407_vm4, %v6007_v60  ;;  %v6008_v59 = vpack.c.bf16 %v6002_v58, %v6001_v46 }
0x1c78   :  { %8002 = vmatpush3.bf16.msra.mxu1 %v6014_v9 }
0x1c9b   :  { %v5990_v63 = vpop.xlane.xlu1 %5989 }
0x1c9c   :  { %8682 = vrcp.f32 %v5990_v63 }
0x1c9d   :  { %8684 = vrcp.f32 %v5981_v47 }
0x1c9e   :  { %8686 = vrcp.f32 %v5987_v4 }
0x1c9f   :  { %v5984_v36 = vpop.xlane.xlu1 %5983 }
0x1ca0   :  { %8688 = vrcp.f32 %v5984_v36 }
0x1ca3   :  { %v6012_v39 = vpop.permute.xlu1 %6011 }
0x1ca4   :  { %8003 = vmatprep.subr.bf16.mxu1 %v6012_v39 }
0x1ca5   :  { %8004 = vmatpush3.bf16.msra.mxu1 %v6012_v39 }
0x1ca8   :  { %8006 = vmatmul.mubr.msk.bf16.vlgmr.msra.gmra.mxu1 %vm407_vm4, %v6008_v59 }
0x1ca9   :  { %v8683_v11 = vpop.eup %8682 }
0x1caa   :  { %v8685_v31 = vpop.eup %8684  ;;  %v6006_v5 = vmul.f32 %v8683_v11, %v10974_v3 }
0x1cab   :  { %v8687_v29 = vpop.eup %8686  ;;  %v6003_v19 = vmul.f32 %v8685_v31, %v10944_v53 }
0x1cac   :  { %v6005_v62 = vmul.f32 %v8687_v29, %v10940_v14 }
0x1cad   :  { %v8689_v22 = vpop.eup %8688 }
0x1cae   :  { %v6004_v55 = vmul.f32 %v8689_v22, %v10978_v16  ;;  %v6010_v37 = vpack.c.bf16 %v6006_v5, %v6005_v62 }
0x1cb0   :  { %v6009_v20 = vpack.c.bf16 %v6004_v55, %v6003_v19 }
0x1cb2   :  { %8009 = vmatprep.mubr.msk.bf16.mxu1 %vm407_vm4, %v6009_v20 }
0x1cb3   :  { %8010 = vmatmul.mubr.msk.bf16.gmra.mxu1 %vm407_vm4, %v6010_v37 }
0x1cd8   :  { %v6301_v23 = vpop.xlane.xlu0 %6300 }
0x1cd9   :  { %v6323_v8 = vsub.f32 %v10991_v61, %v6301_v23 }
0x1cdb   :  { %v6331_v3 = vmul.f32 1.442695, %v6323_v8 }
0x1cdc   :  { %v6307_v18 = vpop.xlane.xlu0 %6306  ;;  %v6304_v50 = vpop.xlane.xlu1 %6303 }
0x1cdd   :  { %v6325_v57 = vsub.f32 %v10989_v41, %v6307_v18  ;;  %v6324_v53 = vsub.f32 %v10997_v12, %v6304_v50 }
0x1cdf   :  { %v6335_v10 = vmul.f32 1.442695, %v6325_v57  ;;  %v6333_v13 = vmul.f32 1.442695, %v6324_v53 }
0x1ce0   :  { %v6310_v16 = vpop.xlane.xlu0 %6309 }
0x1ce1   :  { %8690 = vpow2.f32 %v6335_v10  ;;  %v6326_v14 = vsub.f32 %v10995_v0, %v6310_v16  ;;  %v6956_v0 = vld [vmem:[%s11189_s10 + $0xc] sm:$0x3] }
0x1ce2   :  { %8692 = vpow2.f32 %v6331_v3  ;;  %8160 = vmatprep.subr.msk.bf16.mxu1 %vm906_vm5, %v6956_v0 }
0x1ce3   :  { %v6337_v43 = vmul.f32 1.442695, %v6326_v14 }
0x1ce4   :  { %v6313_v4 = vpop.xlane.xlu0 %6312 }
0x1ce5   :  { %8694 = vpow2.f32 %v6337_v43  ;;  %v6327_v61 = vsub.f32 %v11005_v42, %v6313_v4  ;;  %v6119_v42 = vsel %vm906_vm5, %v6956_v0, 0 }
0x1ce6   :  { %8696 = vpow2.f32 %v6333_v13  ;;  %8014 = vmatpush3.bf16.msra.mxu1 %v6119_v42 }
0x1ce7   :  { %v6339_v41 = vmul.f32 1.442695, %v6327_v61 }
0x1ce8   :  { %v6319_v47 = vpop.xlane.xlu0 %6318 }
0x1ce9   :  { %v6329_v45 = vsub.f32 %v11003_v24, %v6319_v47 }
0x1ceb   :  { %v6343_v21 = vmul.f32 1.442695, %v6329_v45 }
0x1ced   :  { %8698 = vpow2.f32 %v6343_v21 }
0x1cee   :  { %v11039_v28 = vpop.eup %8690  ;;  %8700 = vpow2.f32 %v6339_v41 }
0x1cef   :  { %v6353_v12 = vsel %vm407_vm4, %v11039_v28, 0.0  ;;  %v11048_v15 = vpop.eup %8692 }
0x1cf0   :  { %6354 = vadd.xlane.f32.xlu0 %v6353_v12  ;;  %v6347_v1 = vsel %vm407_vm4, %v11048_v15, 0.0 }
0x1cf2   :  { %v11050_v24 = vpop.eup %8694 }
0x1cf3   :  { %v6356_v54 = vsel %vm407_vm4, %v11050_v24, 0.0  ;;  %v11056_v60 = vpop.eup %8696 }
0x1cf4   :  { %6348 = vadd.xlane.f32.xlu0 %v6347_v1  ;;  %6357 = vadd.xlane.f32.xlu1 %v6356_v54  ;;  %v6350_v9 = vsel %vm407_vm4, %v11056_v60, 0.0 }
0x1cf8   :  { %6351 = vadd.xlane.f32.xlu1 %v6350_v9 }
0x1cfa   :  { %v11060_v63 = vpop.eup %8698 }
0x1cfb   :  { %v6365_v26 = vsel %vm407_vm4, %v11060_v63, 0.0  ;;  %v11064_v36 = vpop.eup %8700 }
0x1cfc   :  { %6366 = vadd.xlane.f32.xlu0 %v6365_v26  ;;  %v6359_v46 = vsel %vm407_vm4, %v11064_v36, 0.0 }
0x1cfd   :  { %v7975_v49 = vpop.f32.mrf.mxu1 }
0x1cfe   :  { %v11067_v58 = vadd.f32 %v7975_v49, %v10947_v33 }
0x1cff   :  { %v5775_v39 = vpop.f32.mrf.mxu1 }
0x1d00   :  { %v11072_v59 = vadd.f32 %v5775_v39, %v10952_v35  ;;  %6360 = vadd.xlane.f32.xlu0 %v6359_v46 }
0x1d01   :  { %v7976_v11 = vpop.f32.mrf.mxu1 }
0x1d02   :  { %v11075_v31 = vadd.f32 %v7976_v11, %v10955_v17  ;;  %v6316_v17 = vpop.xlane.xlu1 %6315 }
0x1d03   :  { %v5778_v29 = vpop.f32.mrf.mxu1  ;;  %v6328_v20 = vsub.f32 %v11011_v2, %v6316_v17 }
0x1d04   :  { %v11078_v22 = vadd.f32 %v5778_v29, %v10958_v7  ;;  %v6969_v29 = vld [vmem:[%s11189_s10 + $0xe] sm:$0x3] }
0x1d06   :  { %v6322_v7 = vpop.xlane.xlu1 %6321 }
0x1d08   :  { %v7979_v5 = vpop.f32.mrf.mxu1 }
0x1d09   :  { %v11081_v33 = vadd.f32 %v7979_v5, %v10961_v27  ;;  %6395 = vrot.lane.b32.xlu1 %v8936_v34, %s8788_s13  ;;  %v6330_v27 = vsub.f32 %v11009_v30, %v6322_v7  ;;  %v6341_v34 = vmul.f32 1.442695, %v6328_v20 }
0x1d0a   :  { %v5791_v19 = vpop.f32.mrf.mxu1 }
0x1d0b   :  { %v11085_v35 = vadd.f32 %v5791_v19, %v10965_v40  ;;  %v6345_v37 = vmul.f32 1.442695, %v6330_v27  ;;  %v6499_v19 = vsel %vm906_vm5, %v6969_v29, 0 }
0x1d0c   :  { %v7980_v55 = vpop.f32.mrf.mxu1 }
0x1d0d   :  { %v11088_v62 = vadd.f32 %v7980_v55, %v10968_v48  ;;  %6393 = vrot.lane.b32.xlu1 %v8944_v38, %s8788_s13  ;;  %8702 = vpow2.f32 %v6345_v37 }
0x1d0e   :  { %8704 = vpow2.f32 %v6341_v34 }
0x1d16   :  { %6397 = vrot.lane.b32.xlu0 %v8934_v32, %s8788_s13  ;;  %v11103_v32 = vpop.f32.mrf.mxu1 }
0x1d1a   :  { %v11094_v40 = vpop.eup %8702 }
0x1d1b   :  { %v6368_v48 = vsel %vm407_vm4, %v11094_v40, 0.0  ;;  %v11098_v23 = vpop.eup %8704 }
0x1d1c   :  { %v6362_v38 = vsel %vm407_vm4, %v11098_v23, 0.0 }
0x1d31   :  { %6369 = vadd.xlane.f32.xlu1 %v6368_v48 }
0x1d35   :  { %6363 = vadd.xlane.f32.xlu1 %v6362_v38 }
0x1d46   :  { %6391 = vrot.lane.b32.xlu1 %v8950_v44, %s8788_s13 }
0x1d68   :  { %v8007_v30 = vpop.f32.mrf.mxu1 }
0x1d6a   :  { %v6069_v2 = vpop.f32.mrf.mxu1 }
0x1d6c   :  { %v8008_v8 = vpop.f32.mrf.mxu1 }
0x1d6d   :  { %v6101_v57 = vpack.c.bf16 %v8008_v8, %v8007_v30 }
0x1d6e   :  { %v6072_v18 = vpop.f32.mrf.mxu1 }
0x1d6f   :  { %v6100_v50 = vpack.c.bf16 %v6072_v18, %v6069_v2 }
0x1d71   :  { %8015 = vmatprep.mubr.msk.bf16.mxu1 %vm317_vm3, %v6100_v50 }
0x1d72   :  { %8016 = vmatmul.mubr.msk.bf16.vlgmr.msra.gmra.mxu1 %vm317_vm3, %v6101_v57 }
0x1d73   :  { %v8011_v3 = vpop.f32.mrf.mxu1 }
0x1d75   :  { %v6085_v10 = vpop.f32.mrf.mxu1 }
0x1d77   :  { %v8012_v53 = vpop.f32.mrf.mxu1 }
0x1d78   :  { %v6103_v43 = vpack.c.bf16 %v8012_v53, %v8011_v3 }
0x1d79   :  { %v6088_v16 = vpop.f32.mrf.mxu1  ;;  %v6355_v14 = vpop.xlane.xlu0 %6354 }
0x1d7a   :  { %v6102_v13 = vpack.c.bf16 %v6088_v16, %v6085_v10 }
0x1d7c   :  { %8019 = vmatprep.mubr.msk.bf16.mxu1 %vm317_vm3, %v6102_v13 }
0x1d7d   :  { %8020 = vmatmul.mubr.msk.bf16.gmra.mxu1 %vm317_vm3, %v6103_v43  ;;  %v6349_v44 = vpop.xlane.xlu0 %6348  ;;  %v6358_v4 = vpop.xlane.xlu1 %6357 }
0x1d7e   :  { %8706 = vrcp.f32 %v6349_v44 }
0x1d81   :  { %v6352_v61 = vpop.xlane.xlu1 %6351 }
0x1d82   :  { %8708 = vrcp.f32 %v6352_v61 }
0x1d83   :  { %8710 = vrcp.f32 %v6358_v4 }
0x1d84   :  { %8712 = vrcp.f32 %v6355_v14 }
0x1d85   :  { %v6367_v47 = vpop.xlane.xlu0 %6366  ;;  %v6396_v21 = vpop.permute.xlu1 %6395 }
0x1d89   :  { %v6361_v45 = vpop.xlane.xlu0 %6360  ;;  %v6394_v9 = vpop.permute.xlu1 %6393 }
0x1d8b   :  { %v8707_v41 = vpop.eup %8706 }
0x1d8c   :  { %v6379_v42 = vmul.f32 %v8707_v41, %v11048_v15 }
0x1d8d   :  { %v6398_v0 = vpop.permute.xlu0 %6397 }
0x1d8e   :  { %8039 = vmatprep.subr.bf16.mxu1 %v6398_v0 }
0x1d8f   :  { %v8709_v12 = vpop.eup %8708  ;;  %8040 = vmatpush3.bf16.msra.mxu1 %v6398_v0  ;;  %v6974_v0 = vld [vmem:[%s11190_s11] ss:$0 sm:$0xff]  ;;  %s8789_s11 = smov [#allocation2]  }
0x1d90   :  { %8041 = vmatprep.subr.bf16.mxu1 %v6396_v21  ;;  %v6380_v1 = vmul.f32 %v8709_v12, %v11056_v60  ;;  %v8711_v49 = vpop.eup %8710 }
0x1d91   :  { %v8713_v46 = vpop.eup %8712  ;;  %v6382_v15 = vmul.f32 %v8711_v49, %v11050_v24 }
0x1d92   :  { %v6387_v54 = vpack.c.bf16 %v6380_v1, %v6379_v42  ;;  %v6381_v11 = vmul.f32 %v8713_v46, %v11039_v28 }
0x1d93   :  { %8042 = vmatpush3.bf16.msra.mxu1 %v6396_v21 }
0x1d94   :  { %8043 = vmatprep.subr.bf16.mxu1 %v6394_v9  ;;  %8047 = vmatprep.mubr.msk.bf16.mxu1 %vm407_vm4, %v6387_v54  ;;  %v6388_v5 = vpack.c.bf16 %v6382_v15, %v6381_v11  ;;  %v4283_v54 = vadd.f32 %v10541_v6, %v10338_v52 }
0x1d96   :  { %v4671_v46 = vadd.f32 %v10699_v25, %v4283_v54 }
0x1d97   :  { %8044 = vmatpush3.bf16.msra.mxu1 %v6394_v9 }
0x1dba   :  { %v6370_v26 = vpop.xlane.xlu1 %6369 }
0x1dbb   :  { %8714 = vrcp.f32 %v6370_v26 }
0x1dbc   :  { %8716 = vrcp.f32 %v6361_v45 }
0x1dbd   :  { %8718 = vrcp.f32 %v6367_v47  ;;  %v8209_v47 = vld [vmem:[%s11193_s14] sm:$0xff]  }
0x1dbe   :  { %v6364_v39 = vpop.xlane.xlu1 %6363 }
0x1dbf   :  { %8720 = vrcp.f32 %v6364_v39 }
0x1dc2   :  { %v6392_v60 = vpop.permute.xlu1 %6391 }
0x1dc3   :  { %8045 = vmatprep.subr.bf16.mxu1 %v6392_v60 }
0x1dc4   :  { %8046 = vmatpush3.bf16.msra.mxu1 %v6392_v60 }
0x1dc5   :  { %8165 = vmatprep.subr.msk.bf16.mxu1 %vm906_vm5, %v6969_v29  ;;  %v5051_v29 = vadd.f32 %v10851_v56, %v4671_v46 }
0x1dc7   :  { %8048 = vmatmul.mubr.msk.bf16.vlgmr.msra.gmra.mxu1 %vm407_vm4, %v6388_v5 }
0x1dc8   :  { %8056 = vmatpush3.bf16.msra.mxu1 %v6499_v19  ;;  %v8715_v55 = vpop.eup %8714 }
0x1dc9   :  { %v8717_v17 = vpop.eup %8716  ;;  %v6386_v28 = vmul.f32 %v8715_v55, %v11094_v40  ;;  %v5431_v55 = vadd.f32 %v10983_v51, %v5051_v29 }
0x1dca   :  { %v8719_v24 = vpop.eup %8718  ;;  %v6383_v27 = vmul.f32 %v8717_v17, %v11064_v36 }
0x1dcb   :  { %v6385_v37 = vmul.f32 %v8719_v24, %v11060_v63  ;;  %v5811_v52 = vadd.f32 %v11103_v32, %v5431_v55 }
0x1dcc   :  { %v8721_v7 = vpop.eup %8720 }
0x1dcd   :  { %v6384_v20 = vmul.f32 %v8721_v7, %v11098_v23  ;;  %v6390_v48 = vpack.c.bf16 %v6386_v28, %v6385_v37 }
0x1dcf   :  { %v6389_v34 = vpack.c.bf16 %v6384_v20, %v6383_v27 }
0x1dd1   :  { %8051 = vmatprep.mubr.msk.bf16.mxu1 %vm407_vm4, %v6389_v34 }
0x1dd2   :  { %8052 = vmatmul.mubr.msk.bf16.gmra.mxu1 %vm407_vm4, %v6390_v48 }
0x1e32   :  { %v8017_v38 = vpop.f32.mrf.mxu1 }
0x1e33   :  { %v6188_v30 = vadd.f32 %v8017_v38, %v11067_v58 }
0x1e34   :  { %v6155_v2 = vpop.f32.mrf.mxu1 }
0x1e35   :  { %v6186_v8 = vadd.f32 %v6155_v2, %v11072_v59 }
0x1e36   :  { %v8018_v18 = vpop.f32.mrf.mxu1 }
0x1e37   :  { %v6189_v40 = vadd.f32 %v8018_v18, %v11075_v31 }
0x1e38   :  { %v6158_v36 = vpop.f32.mrf.mxu1 }
0x1e39   :  { %v6187_v23 = vadd.f32 %v6158_v36, %v11078_v22 }
0x1e3d   :  { %v8021_v50 = vpop.f32.mrf.mxu1 }
0x1e3e   :  { %v6192_v63 = vadd.f32 %v8021_v50, %v11081_v33 }
0x1e3f   :  { %v6171_v57 = vpop.f32.mrf.mxu1 }
0x1e40   :  { %v6190_v3 = vadd.f32 %v6171_v57, %v11085_v35 }
0x1e41   :  { %v8022_v10 = vpop.f32.mrf.mxu1 }
0x1e42   :  { %v6193_v53 = vadd.f32 %v8022_v10, %v11088_v62  ;;  %v8208_v62 = vld [vmem:[%s11193_s14 + $0x8] sm:$0xff]   ;;  %s6705_s14 = sshll.u32 %s8789_s11, 4  ;;  %s6706_s14 = int_to_ptr.vmem [resolvable:$true] %s6705_s14 }
0x1e43   :  { %v6174_v16 = vpop.f32.mrf.mxu1  ;;  %8065 = vmatprep.subr.bf16.mxu0 %v8208_v62  ;;  %s8722_s26 = scalar_lea.vmem %s6706_s14, 1024  ;;  %p8727_p1 = scmp.lt.s32.totalorder %s6706_s14, %s6706_s14 }
0x1e44   :  { %8066 = vmatpush3.bf16.msra.mxu0 %v8208_v62  ;;  %v6191_v7 = vadd.f32 %v6174_v16, %v5811_v52  ;;  %p8723_p0 = scmp.ne.s32.totalorder %s6706_s14, %s8722_s26  ;;  %p8728_p2 = scmp.lt.s32.totalorder %s8722_s26, %s8722_s26 }
0x1e45   :  { %8067 = vmatprep.subr.bf16.mxu0 %v8209_v47 }
0x1e46   :  { %p8729_p3 = por %p8728_p2, %p8727_p1 }
0x1e48   :  { %8068 = vmatpush3.bf16.msra.mxu0 %v8209_v47  ;;  %p8730_p4 = pnand %p8729_p3, %p8723_p0 }
0x1e87   :  { %v8049_v58 = vpop.f32.mrf.mxu1 }
0x1e89   :  { %v6449_v14 = vpop.f32.mrf.mxu1 }
0x1e8b   :  { %v8050_v13 = vpop.f32.mrf.mxu1 }
0x1e8c   :  { %v6481_v44 = vpack.c.bf16 %v8050_v13, %v8049_v58 }
0x1e8d   :  { %v6452_v59 = vpop.f32.mrf.mxu1 }
0x1e8e   :  { %v6480_v43 = vpack.c.bf16 %v6452_v59, %v6449_v14 }
0x1e90   :  { %8057 = vmatprep.mubr.msk.bf16.mxu1 %vm317_vm3, %v6480_v43 }
0x1e91   :  { %8058 = vmatmul.mubr.msk.bf16.vlgmr.msra.gmra.mxu1 %vm317_vm3, %v6481_v44 }
0x1e92   :  { %v8053_v31 = vpop.f32.mrf.mxu1 }
0x1e94   :  { %v6465_v22 = vpop.f32.mrf.mxu1 }
0x1e96   :  { %v8054_v33 = vpop.f32.mrf.mxu1 }
0x1e97   :  { %v6483_v35 = vpack.c.bf16 %v8054_v33, %v8053_v31 }
0x1e98   :  { %v6468_v4 = vpop.f32.mrf.mxu1 }
0x1e99   :  { %v6482_v61 = vpack.c.bf16 %v6468_v4, %v6465_v22 }
0x1e9b   :  { %8061 = vmatprep.mubr.msk.bf16.mxu1 %vm317_vm3, %v6482_v61 }
0x1e9c   :  { %8062 = vmatmul.mubr.msk.bf16.gmra.mxu1 %vm317_vm3, %v6483_v35 }
0x1f51   :  { %v8059_v45 = vpop.f32.mrf.mxu1 }
0x1f52   :  { %v6568_v21 = vadd.f32 %v8059_v45, %v6188_v30 }
0x1f53   :  { %v6535_v41 = vpop.f32.mrf.mxu1 }
0x1f54   :  { %v6566_v42 = vadd.f32 %v6535_v41, %v6186_v8  ;;  %v6582_v26 = vadd.f32 %v6974_v0, %v6568_v21 }
0x1f55   :  { %v8060_v12 = vpop.f32.mrf.mxu1 }
0x1f56   :  { %v6569_v1 = vadd.f32 %v8060_v12, %v6189_v40  ;;  %v6580_v15 = vadd.f32 %v6974_v0, %v6566_v42 }
0x1f57   :  { %v6538_v9 = vpop.f32.mrf.mxu1 }
0x1f58   :  { %v6583_v49 = vadd.f32 %v6974_v0, %v6569_v1  ;;  %v6567_v39 = vadd.f32 %v6538_v9, %v6187_v23 }
0x1f5a   :  { %v6589_v60 = vpack.c.bf16 %v6583_v49, %v6582_v26  ;;  %v6581_v11 = vadd.f32 %v6974_v0, %v6567_v39 }
0x1f5c   :  { %v6588_v5 = vpack.c.bf16 %v6581_v11, %v6580_v15  ;;  %v8063_v19 = vpop.f32.mrf.mxu1 }
0x1f5d   :  { %v6572_v6 = vadd.f32 %v8063_v19, %v6192_v63 }
0x1f5e   :  { %v6551_v17 = vpop.f32.mrf.mxu1  ;;  %8069 = vmatprep.mubr.msk.bf16.mxu0 %vm3376_vm6, %v6588_v5 }
0x1f5f   :  { %8070 = vmatmul.mubr.msk.bf16.vlgmr.msra.gmra.mxu0 %vm3376_vm6, %v6589_v60  ;;  %v6570_v25 = vadd.f32 %v6551_v17, %v6190_v3  ;;  %v6586_v20 = vadd.f32 %v6974_v0, %v6572_v6 }
0x1f60   :  { %v8064_v24 = vpop.f32.mrf.mxu1 }
0x1f61   :  { %v6573_v28 = vadd.f32 %v8064_v24, %v6193_v53  ;;  %v6584_v34 = vadd.f32 %v6974_v0, %v6570_v25 }
0x1f62   :  { %v6554_v27 = vpop.f32.mrf.mxu1 }
0x1f63   :  { %v6587_v37 = vadd.f32 %v6974_v0, %v6573_v28  ;;  %v6571_v56 = vadd.f32 %v6554_v27, %v6191_v7 }
0x1f65   :  { %v6591_v48 = vpack.c.bf16 %v6587_v37, %v6586_v20  ;;  %v6585_v38 = vadd.f32 %v6974_v0, %v6571_v56 }
0x1f67   :  { %v6590_v51 = vpack.c.bf16 %v6585_v38, %v6584_v34 }
0x1f69   :  { %8073 = vmatprep.mubr.msk.bf16.mxu0 %vm3376_vm6, %v6590_v51 }
0x1f6a   :  { %8074 = vmatmul.mubr.msk.bf16.gmra.mxu0 %vm3376_vm6, %v6591_v48 }
0x1f6b   :  { %8733 = shalt.err (!%p8730_p4)
}
0x1f6c   :  { %s8790_s27 = smov 128   ;;  %s8791_s29 = smov 8   ;;  %v6975_v32 = vld [vmem:[%s11194_s15] ss:$0 sm:$0xff] }
0x1f6d   :  { %6711 = dma.vmem_to_hbm [thread:$0]  %s6706_s14, 1024, %s11195_s16, [#allocation3], %s8790_s27, %s8790_s27, %s8791_s29  }
0x1f6e   :  { %s8792_s15 = smov [#allocation4]  }
0x1f6f   :  { %s6717_s16 = sshll.u32 %s8792_s15, 4  ;;  %s6718_s16 = int_to_ptr.vmem [resolvable:$true] %s6717_s16 }
0x1f70   :  { %s8742_s1 = scalar_lea.vmem %s6718_s16, 1024  ;;  %p8747_p6 = scmp.lt.s32.totalorder %s6718_s16, %s6718_s16 }
0x1f71   :  { %p8743_p5 = scmp.ne.s32.totalorder %s6718_s16, %s8742_s1  ;;  %p8748_p7 = scmp.lt.s32.totalorder %s8742_s1, %s8742_s1 }
0x1f73   :  { %p8749_p8 = por %p8748_p7, %p8747_p6 }
0x1f75   :  { %p8750_p9 = pnand %p8749_p8, %p8743_p5 }
0x201f   :  { %v8071_v30 = vpop.f32.mrf.mxu0 }
0x2020   :  { %v6670_v2 = vadd.f32 %v8071_v30, %v6975_v32 }
0x2021   :  { %v6661_v8 = vpop.f32.mrf.mxu0 }
0x2022   :  { %6694 = vst.msk [vmem:[#allocation4 + $0x10] sm:$0xff] %vm230_vm1, %v6670_v2  ;;  %v6662_v18 = vadd.f32 %v6975_v32, %v6661_v8 }
0x2023   :  { %v8072_v40 = vpop.f32.mrf.mxu0 }
0x2024   :  { %6692 = vst.msk [vmem:[#allocation4] sm:$0xff] %vm230_vm1, %v6662_v18  ;;  %v6673_v36 = vadd.f32 %v8072_v40, %v6975_v32 }
0x2025   :  { %v6664_v23 = vpop.f32.mrf.mxu0 }
0x2026   :  { %6695 = vst.msk [vmem:[#allocation4 + $0x18] sm:$0xff] %vm230_vm1, %v6673_v36  ;;  %v6665_v50 = vadd.f32 %v6975_v32, %v6664_v23 }
0x2028   :  { %6693 = vst.msk [vmem:[#allocation4 + $0x8] sm:$0xff] %vm230_vm1, %v6665_v50 }
0x202a   :  { %v8075_v63 = vpop.f32.mrf.mxu0 }
0x202b   :  { %v6686_v57 = vadd.f32 %v8075_v63, %v6975_v32 }
0x202c   :  { %v6677_v3 = vpop.f32.mrf.mxu0 }
0x202d   :  { %6698 = vst.msk [vmem:[#allocation4 + $0x30] sm:$0xff] %vm230_vm1, %v6686_v57  ;;  %v6678_v10 = vadd.f32 %v6975_v32, %v6677_v3 }
0x202e   :  { %v8076_v53 = vpop.f32.mrf.mxu0 }
0x202f   :  { %6696 = vst.msk [vmem:[#allocation4 + $0x20] sm:$0xff] %vm230_vm1, %v6678_v10  ;;  %v6689_v16 = vadd.f32 %v8076_v53, %v6975_v32 }
0x2030   :  { %v6680_v58 = vpop.f32.mrf.mxu0 }
0x2031   :  { %6699 = vst.msk [vmem:[#allocation4 + $0x38] sm:$0xff] %vm230_vm1, %v6689_v16  ;;  %v6681_v14 = vadd.f32 %v6975_v32, %v6680_v58 }
0x2033   :  { %6697 = vst.msk [vmem:[#allocation4 + $0x28] sm:$0xff] %vm230_vm1, %v6681_v14 }
0x2034   :  { %8753 = shalt.err (!%p8750_p9)
}
0x2035   :  { %6723 = dma.vmem_to_hbm [thread:$0]  %s6718_s16, 1024, %s11196_s17, [#allocation5], %s8790_s27, %s8790_s27, %s8791_s29  }
0x2036   :  { %8762 = dma.done.wait [#allocation3], 1024  }
0x2037   :  { %8763 = vsyncadd [#allocation3], 4294966272 }
0x2038   :  { %8764 = dma.done.wait [#allocation5], 1024  }
0x2039   :  { %8765 = vsyncadd [#allocation5], 4294966272 }
0x203a   :  { %6730 = vsyncpa [#allocation3], 1 }
0x203b   :  { %6731 = vsyncpa [#allocation5], 1 }

</bundles_post_ra>
